<compile_context>
chip_gen: v5e
topology: v5e:2x2
jax: 0.10.0
libtpu: 0.0.40
codegen_flags: <defaults>
</compile_context>

<pallas_src>
import math
from functools import partial

import jax
import jax.numpy as jnp
from jax.experimental import pallas as pl
from jax.experimental.pallas import tpu as pltpu


def _round_up(x, m):
    return ((x + m - 1) // m) * m


def _cdiv(a, b):
    return -(-a // b)


# ----------------------------------------------------------------------------
# Pallas kernel:  out = tanh?( W(CO,K) @ X(K, M_blk) + b(CO,1) )
# ----------------------------------------------------------------------------
def _gemm_bias_act_kernel(w_ref, x_ref, b_ref, o_ref, *, apply_tanh):
    acc = jnp.dot(w_ref[...], x_ref[...], preferred_element_type=jnp.float32)
    acc = acc + b_ref[...]                      # (CO, M_blk) + (CO, 1): lane broadcast
    if apply_tanh:
        acc = jnp.tanh(acc)                     # EUP; effectively free here
    o_ref[...] = acc.astype(o_ref.dtype)


def _choose_m_tiling(M, K, N, *, vmem_budget=20 * 1024 * 1024):
    """Pick the M (output-spatial) block size.

    Prefer one full-M block per batch element (no HBM padding, minimum grid steps).
    Split M only when (a) N == 1, so both v7x TensorCores get a 'parallel' block, or
    (b) a double-buffered full-M input tile would not fit the VMEM budget."""
    def tile_bytes(bm):   # double-buffered f32 input tile incl. (8,128) layout padding
        return 2 * 4 * _round_up(K, 8) * _round_up(bm, 128)

    tiles = 1 if N >= 2 else 2          # v7x: >=2 parallel blocks when batch == 1
    while tiles < M and tile_bytes(_cdiv(M, tiles)) > vmem_budget:
        tiles += 1
    if tiles == 1:
        return M, 1                     # full-dim block: no alignment constraint
    block_m = _round_up(_cdiv(M, tiles), 128)
    if block_m >= M:
        return M, 1
    return block_m, _cdiv(M, block_m)


def conv2d_gemm(x_nchw, w_mat, b_col, kh, kw, *, stride=1, padding=0,
                lhs_dilation=1, rhs_dilation=1, apply_tanh=False):
    """Conv2d (optionally with lhs_dilation, i.e. the transposed-conv lowering) as a
    single Pallas GEMM per layer.

    x: (N, CI, H, W) NCHW;  w_mat: (CO, CI*kh*kw) pre-flattened;  b_col: (CO, 1)."""
    N, CI, H, W = x_nchw.shape
    CO, K = w_mat.shape
    assert K == CI * kh * kw

    # im2col: pure data movement, one XLA op.  Feature dim is channel-major
    # (k = ci*kh*kw + ikh*kw + ikw), matching w_mat = weight.reshape(CO, -1).
    # HIGHEST precision => exact pass-through of the patch values.
    patches = jax.lax.conv_general_dilated_patches(
        x_nchw, (kh, kw), (stride, stride),
        padding=[(padding, padding), (padding, padding)],
        lhs_dilation=(lhs_dilation, lhs_dilation),
        rhs_dilation=(rhs_dilation, rhs_dilation),
        precision=jax.lax.Precision.HIGHEST,
    )
    _, K2, OH, OW = patches.shape
    assert K2 == K
    M = OH * OW
    patches = patches.reshape(N, K, M)          # metadata-only reshape (no copy, no pad)

    block_m, m_tiles = _choose_m_tiling(M, K, N)

    out = pl.pallas_call(
        partial(_gemm_bias_act_kernel, apply_tanh=apply_tanh),
        out_shape=jax.ShapeDtypeStruct((N, CO, M), jnp.float32),
        grid=(N, m_tiles),
        in_specs=[
            # Weights / bias: full arrays, resident across the whole grid.
            pl.BlockSpec((CO, K), lambda b, m: (0, 0)),
            # Patches: full-extent K dim, full-M (or 128-multiple) M tile; no HBM pad.
            pl.BlockSpec((None, K, block_m), lambda b, m: (b, 0, m)),
            pl.BlockSpec((CO, 1), lambda b, m: (0, 0)),
        ],
        out_specs=pl.BlockSpec((None, CO, block_m), lambda b, m: (b, 0, m)),
        compiler_params=pltpu.CompilerParams(
            dimension_semantics=("parallel", "parallel"),
            vmem_limit_bytes=32 * 1024 * 1024,   # worst case here ~11 MiB; safe on v5e..v7x
        ),
    )(w_mat, patches, b_col)

    # Output is already channel-major per batch element -> directly NCHW.
    return out.reshape(N, CO, OH, OW)


# ----------------------------------------------------------------------------
# One-time parameter preparation (hoisted out of the per-step jit).
# ----------------------------------------------------------------------------
def prepare_params(params):
    """ConvTranspose2d -> equivalent forward-conv weights (spatial flip + channel swap),
    then flatten everything into the (CO, K) / (CO, 1) GEMM layout."""
    w1 = params["conv_w"]                                                    # (7,3,16,16)
    w2 = jnp.transpose(params["tconv1_w"][:, :, ::-1, ::-1], (1, 0, 2, 3))   # (13,7,4,4)
    w3 = jnp.transpose(params["tconv2_w"][:, :, ::-1, ::-1], (1, 0, 2, 3))   # (19,13,5,5)
    return {
        "w1": w1.reshape(w1.shape[0], -1), "b1": params["conv_b"].reshape(-1, 1),
        "w2": w2.reshape(w2.shape[0], -1), "b2": params["tconv1_b"].reshape(-1, 1),
        "w3": w3.reshape(w3.shape[0], -1), "b3": params["tconv2_b"].reshape(-1, 1),
    }


# ----------------------------------------------------------------------------
# Model: Conv2d(3,7,16,s=3,p=5,d=3) -> tanh -> ConvT(7,13,4,s=2) -> tanh
#        -> ConvT(13,19,5,s=3,p=4)
# ----------------------------------------------------------------------------
def model_tanh_forward(x, p):
    # Conv2d + tanh
    v2 = conv2d_gemm(x, p["w1"], p["b1"], 16, 16,
                     stride=3, padding=5, rhs_dilation=3, apply_tanh=True)
    # ConvTranspose2d(7,13,4,s=2) + tanh  ==  conv(k=4, pad=4-1-0=3, lhs_dilation=2)
    v4 = conv2d_gemm(v2, p["w2"], p["b2"], 4, 4,
                     padding=3, lhs_dilation=2, apply_tanh=True)
    # ConvTranspose2d(13,19,5,s=3,p=4)    ==  conv(k=5, pad=5-1-4=0, lhs_dilation=3)
    v5 = conv2d_gemm(v4, p["w3"], p["b3"], 5, 5,
                     padding=0, lhs_dilation=3, apply_tanh=False)
    return v5


def init_params(key):
    ks = jax.random.split(key, 6)

    def uinit(k, shape, fan_in):
        b = 1.0 / math.sqrt(fan_in)
        return jax.random.uniform(k, shape, jnp.float32, -b, b)

    return {
        "conv_w":   uinit(ks[0], (7, 3, 16, 16), 3 * 16 * 16),
        "conv_b":   uinit(ks[1], (7,),           3 * 16 * 16),
        "tconv1_w": uinit(ks[2], (7, 13, 4, 4),  7 * 4 * 4),
        "tconv1_b": uinit(ks[3], (13,),          7 * 4 * 4),
        "tconv2_w": uinit(ks[4], (13, 19, 5, 5), 13 * 5 * 5),
        "tconv2_b": uinit(ks[5], (19,),          13 * 5 * 5),
    }


# Pure-JAX reference (XLA convs) for a numerical sanity check of the im2col ordering
# and the unaligned-K GEMM handling.
def _ref_forward(x, params):
    dn = ("NCHW", "OIHW", "NCHW")
    prec = jax.lax.Precision.HIGHEST
    v1 = jax.lax.conv_general_dilated(
        x, params["conv_w"], (3, 3), [(5, 5), (5, 5)], rhs_dilation=(3, 3),
        dimension_numbers=dn, precision=prec) + params["conv_b"][None, :, None, None]
    v2 = jnp.tanh(v1)
    w1 = jnp.transpose(params["tconv1_w"][:, :, ::-1, ::-1], (1, 0, 2, 3))
    v3 = jax.lax.conv_general_dilated(
        v2, w1, (1, 1), [(3, 3), (3, 3)], lhs_dilation=(2, 2),
        dimension_numbers=dn, precision=prec) + params["tconv1_b"][None, :, None, None]
    v4 = jnp.tanh(v3)
    w2 = jnp.transpose(params["tconv2_w"][:, :, ::-1, ::-1], (1, 0, 2, 3))
    v5 = jax.lax.conv_general_dilated(
        v4, w2, (1, 1), [(0, 0), (0, 0)], lhs_dilation=(3, 3),
        dimension_numbers=dn, precision=prec) + params["tconv2_b"][None, :, None, None]
    return v5


if __name__ == "__main__":
    key = jax.random.PRNGKey(0)
    kx, kp = jax.random.split(key)
    # Note: the original repro used (1,3,4,64), which is invalid for this conv
    # (negative output height).  Use a small valid spatial size; batch=2 exercises
    # the batch-parallel grid axis (one full-M tile per batch element).
    x = jax.random.normal(kx, (2, 3, 64, 64), jnp.float32)
    params = init_params(kp)

    prep = prepare_params(params)        # one-time weight prep, outside the step jit
    fwd = jax.jit(model_tanh_forward)

    out = jax.block_until_ready(fwd(x, prep))
    assert out.shape == (2, 19, 60, 60), out.shape

    ref = _ref_forward(x, params)
    err = float(jnp.max(jnp.abs(out - ref)))
    assert err < 2e-3, f"max abs err {err}"

    print("KERNEL_OK")
</pallas_src>

<mosaic_0001>
module attributes {stable_mosaic.version = 11 : i64} {
  func.func @_gemm_bias_act_kernel(%arg0: i32, %arg1: i32, %arg2: memref<7x768xf32, #tpu.memory_space<vmem>>, %arg3: memref<1x768x100xf32, #tpu.memory_space<vmem>>, %arg4: memref<7x1xf32, #tpu.memory_space<vmem>>, %arg5: memref<1x7x100xf32, #tpu.memory_space<vmem>>) attributes {dimension_semantics = [#tpu.dimension_semantics<parallel>, #tpu.dimension_semantics<parallel>], iteration_bounds = array<i64: 2, 1>, scalar_prefetch = 0 : i64, scratch_operands = 0 : i64, tpu.core_type = #tpu.core_type<tc>, window_params = [{pipeline_mode = #tpu.pipeline_mode<synchronous>, transform_indices = @transform_0, window_bounds = array<i64: 7, 768>}, {transform_indices = @transform_1, window_bounds = array<i64: 1, 768, 100>}, {pipeline_mode = #tpu.pipeline_mode<synchronous>, transform_indices = @transform_2, window_bounds = array<i64: 7, 1>}, {transform_indices = @transform_3, window_bounds = array<i64: 1, 7, 100>}]} {
    %c0 = arith.constant 0 : index
    %c0_0 = arith.constant 0 : index
    %0 = vector.load %arg2[%c0, %c0_0] : memref<7x768xf32, #tpu.memory_space<vmem>>, vector<7x768xf32>
    %c0_1 = arith.constant 0 : index
    %c0_2 = arith.constant 0 : index
    %c0_3 = arith.constant 0 : index
    %1 = vector.load %arg3[%c0_1, %c0_2, %c0_3] : memref<1x768x100xf32, #tpu.memory_space<vmem>>, vector<1x768x100xf32>
    %2 = vector.shape_cast %1 : vector<1x768x100xf32> to vector<768x100xf32>
    %cst = arith.constant dense<0.000000e+00> : vector<7x100xf32>
    %3 = tpu.matmul %0, %2, %cst {dimension_numbers = #tpu.dot_dimension_numbers<[1], [0], [0], [1], [0, 0, 1, 1], [], []>} : vector<7x768xf32>, vector<768x100xf32>, vector<7x100xf32> -> vector<7x100xf32>
    %c0_4 = arith.constant 0 : index
    %c0_5 = arith.constant 0 : index
    %4 = vector.load %arg4[%c0_4, %c0_5] : memref<7x1xf32, #tpu.memory_space<vmem>>, vector<7x1xf32>
    %5 = vector.broadcast %4 : vector<7x1xf32> to vector<7x100xf32>
    %6 = arith.addf %3, %5 : vector<7x100xf32>
    %7 = math.tanh %6 : vector<7x100xf32>
    %c0_6 = arith.constant 0 : index
    %c0_7 = arith.constant 0 : index
    %c0_8 = arith.constant 0 : index
    %8 = vector.load %arg5[%c0_6, %c0_7, %c0_8] : memref<1x7x100xf32, #tpu.memory_space<vmem>>, vector<1x7x100xf32>
    %9 = vector.shape_cast %8 : vector<1x7x100xf32> to vector<7x100xf32>
    %10 = vector.shape_cast %7 : vector<7x100xf32> to vector<1x7x100xf32>
    tpu.vector_store %arg5[%c0_6, %c0_7, %c0_8], %10 {strides = array<i32>} : memref<1x7x100xf32, #tpu.memory_space<vmem>>, vector<1x7x100xf32>,
    return
  }
  func.func @transform_0(%arg0: i32, %arg1: i32) -> (i32, i32) {
    %c0_i32 = arith.constant 0 : i32
    %c0_i32_0 = arith.constant 0 : i32
    %c0_i32_1 = arith.constant 0 : i32
    return %c0_i32, %c0_i32_0 : i32, i32
  }
  func.func @transform_1(%arg0: i32, %arg1: i32) -> (i32, i32, i32) {
    %c0_i32 = arith.constant 0 : i32
    %c0_i32_0 = arith.constant 0 : i32
    return %arg0, %c0_i32, %arg1 : i32, i32, i32
  }
  func.func @transform_2(%arg0: i32, %arg1: i32) -> (i32, i32) {
    %c0_i32 = arith.constant 0 : i32
    %c0_i32_0 = arith.constant 0 : i32
    %c0_i32_1 = arith.constant 0 : i32
    return %c0_i32, %c0_i32_0 : i32, i32
  }
  func.func @transform_3(%arg0: i32, %arg1: i32) -> (i32, i32, i32) {
    %c0_i32 = arith.constant 0 : i32
    %c0_i32_0 = arith.constant 0 : i32
    return %arg0, %c0_i32, %arg1 : i32, i32, i32
  }
}

module attributes {stable_mosaic.version = 11 : i64} {
  func.func @_gemm_bias_act_kernel(%arg0: i32, %arg1: i32, %arg2: memref<13x112xf32, #tpu.memory_space<vmem>>, %arg3: memref<1x112x484xf32, #tpu.memory_space<vmem>>, %arg4: memref<13x1xf32, #tpu.memory_space<vmem>>, %arg5: memref<1x13x484xf32, #tpu.memory_space<vmem>>) attributes {dimension_semantics = [#tpu.dimension_semantics<parallel>, #tpu.dimension_semantics<parallel>], iteration_bounds = array<i64: 2, 1>, scalar_prefetch = 0 : i64, scratch_operands = 0 : i64, tpu.core_type = #tpu.core_type<tc>, window_params = [{pipeline_mode = #tpu.pipeline_mode<synchronous>, transform_indices = @transform_0, window_bounds = array<i64: 13, 112>}, {transform_indices = @transform_1, window_bounds = array<i64: 1, 112, 484>}, {pipeline_mode = #tpu.pipeline_mode<synchronous>, transform_indices = @transform_2, window_bounds = array<i64: 13, 1>}, {transform_indices = @transform_3, window_bounds = array<i64: 1, 13, 484>}]} {
    %c0 = arith.constant 0 : index
    %c0_0 = arith.constant 0 : index
    %0 = vector.load %arg2[%c0, %c0_0] : memref<13x112xf32, #tpu.memory_space<vmem>>, vector<13x112xf32>
    %c0_1 = arith.constant 0 : index
    %c0_2 = arith.constant 0 : index
    %c0_3 = arith.constant 0 : index
    %1 = vector.load %arg3[%c0_1, %c0_2, %c0_3] : memref<1x112x484xf32, #tpu.memory_space<vmem>>, vector<1x112x484xf32>
    %2 = vector.shape_cast %1 : vector<1x112x484xf32> to vector<112x484xf32>
    %cst = arith.constant dense<0.000000e+00> : vector<13x484xf32>
    %3 = tpu.matmul %0, %2, %cst {dimension_numbers = #tpu.dot_dimension_numbers<[1], [0], [0], [1], [0, 0, 1, 1], [], []>} : vector<13x112xf32>, vector<112x484xf32>, vector<13x484xf32> -> vector<13x484xf32>
    %c0_4 = arith.constant 0 : index
    %c0_5 = arith.constant 0 : index
    %4 = vector.load %arg4[%c0_4, %c0_5] : memref<13x1xf32, #tpu.memory_space<vmem>>, vector<13x1xf32>
    %5 = vector.broadcast %4 : vector<13x1xf32> to vector<13x484xf32>
    %6 = arith.addf %3, %5 : vector<13x484xf32>
    %7 = math.tanh %6 : vector<13x484xf32>
    %c0_6 = arith.constant 0 : index
    %c0_7 = arith.constant 0 : index
    %c0_8 = arith.constant 0 : index
    %8 = vector.load %arg5[%c0_6, %c0_7, %c0_8] : memref<1x13x484xf32, #tpu.memory_space<vmem>>, vector<1x13x484xf32>
    %9 = vector.shape_cast %8 : vector<1x13x484xf32> to vector<13x484xf32>
    %10 = vector.shape_cast %7 : vector<13x484xf32> to vector<1x13x484xf32>
    tpu.vector_store %arg5[%c0_6, %c0_7, %c0_8], %10 {strides = array<i32>} : memref<1x13x484xf32, #tpu.memory_space<vmem>>, vector<1x13x484xf32>,
    return
  }
  func.func @transform_0(%arg0: i32, %arg1: i32) -> (i32, i32) {
    %c0_i32 = arith.constant 0 : i32
    %c0_i32_0 = arith.constant 0 : i32
    %c0_i32_1 = arith.constant 0 : i32
    return %c0_i32, %c0_i32_0 : i32, i32
  }
  func.func @transform_1(%arg0: i32, %arg1: i32) -> (i32, i32, i32) {
    %c0_i32 = arith.constant 0 : i32
    %c0_i32_0 = arith.constant 0 : i32
    return %arg0, %c0_i32, %arg1 : i32, i32, i32
  }
  func.func @transform_2(%arg0: i32, %arg1: i32) -> (i32, i32) {
    %c0_i32 = arith.constant 0 : i32
    %c0_i32_0 = arith.constant 0 : i32
    %c0_i32_1 = arith.constant 0 : i32
    return %c0_i32, %c0_i32_0 : i32, i32
  }
  func.func @transform_3(%arg0: i32, %arg1: i32) -> (i32, i32, i32) {
    %c0_i32 = arith.constant 0 : i32
    %c0_i32_0 = arith.constant 0 : i32
    return %arg0, %c0_i32, %arg1 : i32, i32, i32
  }
}

module attributes {stable_mosaic.version = 11 : i64} {
  func.func @_gemm_bias_act_kernel(%arg0: i32, %arg1: i32, %arg2: memref<19x325xf32, #tpu.memory_space<vmem>>, %arg3: memref<1x325x3600xf32, #tpu.memory_space<vmem>>, %arg4: memref<19x1xf32, #tpu.memory_space<vmem>>, %arg5: memref<1x19x3600xf32, #tpu.memory_space<vmem>>) attributes {dimension_semantics = [#tpu.dimension_semantics<parallel>, #tpu.dimension_semantics<parallel>], iteration_bounds = array<i64: 2, 1>, scalar_prefetch = 0 : i64, scratch_operands = 0 : i64, tpu.core_type = #tpu.core_type<tc>, window_params = [{pipeline_mode = #tpu.pipeline_mode<synchronous>, transform_indices = @transform_0, window_bounds = array<i64: 19, 325>}, {transform_indices = @transform_1, window_bounds = array<i64: 1, 325, 3600>}, {pipeline_mode = #tpu.pipeline_mode<synchronous>, transform_indices = @transform_2, window_bounds = array<i64: 19, 1>}, {transform_indices = @transform_3, window_bounds = array<i64: 1, 19, 3600>}]} {
    %c0 = arith.constant 0 : index
    %c0_0 = arith.constant 0 : index
    %0 = vector.load %arg2[%c0, %c0_0] : memref<19x325xf32, #tpu.memory_space<vmem>>, vector<19x325xf32>
    %c0_1 = arith.constant 0 : index
    %c0_2 = arith.constant 0 : index
    %c0_3 = arith.constant 0 : index
    %1 = vector.load %arg3[%c0_1, %c0_2, %c0_3] : memref<1x325x3600xf32, #tpu.memory_space<vmem>>, vector<1x325x3600xf32>
    %2 = vector.shape_cast %1 : vector<1x325x3600xf32> to vector<325x3600xf32>
    %cst = arith.constant dense<0.000000e+00> : vector<19x3600xf32>
    %3 = tpu.matmul %0, %2, %cst {dimension_numbers = #tpu.dot_dimension_numbers<[1], [0], [0], [1], [0, 0, 1, 1], [], []>} : vector<19x325xf32>, vector<325x3600xf32>, vector<19x3600xf32> -> vector<19x3600xf32>
    %c0_4 = arith.constant 0 : index
    %c0_5 = arith.constant 0 : index
    %4 = vector.load %arg4[%c0_4, %c0_5] : memref<19x1xf32, #tpu.memory_space<vmem>>, vector<19x1xf32>
    %5 = vector.broadcast %4 : vector<19x1xf32> to vector<19x3600xf32>
    %6 = arith.addf %3, %5 : vector<19x3600xf32>
    %c0_6 = arith.constant 0 : index
    %c0_7 = arith.constant 0 : index
    %c0_8 = arith.constant 0 : index
    %7 = vector.load %arg5[%c0_6, %c0_7, %c0_8] : memref<1x19x3600xf32, #tpu.memory_space<vmem>>, vector<1x19x3600xf32>
    %8 = vector.shape_cast %7 : vector<1x19x3600xf32> to vector<19x3600xf32>
    %9 = vector.shape_cast %6 : vector<19x3600xf32> to vector<1x19x3600xf32>
    tpu.vector_store %arg5[%c0_6, %c0_7, %c0_8], %9 {strides = array<i32>} : memref<1x19x3600xf32, #tpu.memory_space<vmem>>, vector<1x19x3600xf32>,
    return
  }
  func.func @transform_0(%arg0: i32, %arg1: i32) -> (i32, i32) {
    %c0_i32 = arith.constant 0 : i32
    %c0_i32_0 = arith.constant 0 : i32
    %c0_i32_1 = arith.constant 0 : i32
    return %c0_i32, %c0_i32_0 : i32, i32
  }
  func.func @transform_1(%arg0: i32, %arg1: i32) -> (i32, i32, i32) {
    %c0_i32 = arith.constant 0 : i32
    %c0_i32_0 = arith.constant 0 : i32
    return %arg0, %c0_i32, %arg1 : i32, i32, i32
  }
  func.func @transform_2(%arg0: i32, %arg1: i32) -> (i32, i32) {
    %c0_i32 = arith.constant 0 : i32
    %c0_i32_0 = arith.constant 0 : i32
    %c0_i32_1 = arith.constant 0 : i32
    return %c0_i32, %c0_i32_0 : i32, i32
  }
  func.func @transform_3(%arg0: i32, %arg1: i32) -> (i32, i32, i32) {
    %c0_i32 = arith.constant 0 : i32
    %c0_i32_0 = arith.constant 0 : i32
    return %arg0, %c0_i32, %arg1 : i32, i32, i32
  }
}

</mosaic_0001>

<bundles_post_ra>
// kernel: model_tanh_forward.3
= control target key start
LH: loop header
LB: loop body
LE: loop exit
PB: predicated region body
PF: predicated region fallthrough
CT: control target
= control target key end

     0   :  { %s591_s12 = smov 0   ;;  %s593_s13 = smov 0   ;;  %s747_s0 = inlined_call_operand.vmem [shape: f32[7,768], index: 0, kind: input, shape index: {}]   ;;  %s748_s1 = inlined_call_operand.vmem [shape: f32[2,768,100], index: 1, kind: input, shape index: {}]   ;;  %s749_s2 = inlined_call_operand.vmem [shape: f32[7,1], index: 2, kind: input, shape index: {}]   ;;  %s750_s3 = inlined_call_operand.vmem [shape: f32[2,7,100], index: 3, kind: output, shape index: {}]  }
   0x1   :  { %s595_s14 = smov 0  }
   0x2 LB: > { %s25_s15 = sadd.s32 1, %s564_s13  ;;  %p512_p0 = scmp.ge.s32.totalorder %s568_s14, 1  ;;  %s568_s14 = sphi %s595_s14, %s13_s14   ;;  %s564_s13 = sphi %s593_s13, %s752_s13   ;;  %s560_s12 = sphi %s591_s12, %s751_s12  }
   0x3   : > { %p27_p1 = scmp.ge.s32.totalorder %s25_s15, 2  ;;  %p156_p2 = scmp.lt.s32.totalorder %s568_s14, 3 }
   0x5   : > { %s754_s15 = smov (%p27_p1, %s25_s15), 0  ;;  %p157_p3 = pnand %p512_p0, %p156_p2 }
   0x6   : > { %p185_p4 = scmp.lt.s32.totalorder (!%p157_p3), %s560_s12, 1 }
   0x7   : > { %160 = sbr.rel (%p157_p3) target bundleno = 218 (0xda), region = 32 }
   0xc   : > { %s756_s12 = smov (!%p185_p4, %s560_s12), 1  ;;  %vm429_vm0 = vcmask 817152  }
   0xd   : > { %s517_s16 = smul.u32 768, %s756_s12  ;;  %s514_s7 = sshll.u32 %s756_s12, 3 }
   0xe   : > { %s199_s10 = scalar_lea.vmem %s750_s3, %s514_s7 }
   0xf   : > { %s615_s19 = scalar_lea.vmem %s748_s1, %s517_s16 }
  0x10   : > { %v221_v0 = vld [vmem:[%s615_s19 + $0x78] sm:$0xff]  ;;  %v220_v1 = vld [vmem:[%s615_s19 + $0x70] sm:$0xff]  ;;  %v219_v4 = vld [vmem:[%s615_s19 + $0x68] sm:$0xff] }
  0x11   : > { %v237_v2 = vld [vmem:[%s615_s19 + $0xf8] sm:$0xff]  ;;  %308 = vmatpush.msra.mxu0 %v221_v0  ;;  %v236_v3 = vld [vmem:[%s615_s19 + $0xf0] sm:$0xff]  ;;  %v235_v5 = vld [vmem:[%s615_s19 + $0xe8] sm:$0xff] }
  0x12   : > { %328 = vmatpush.msra.mxu1 %v237_v2  ;;  %v218_v6 = vld [vmem:[%s615_s19 + $0x60] sm:$0xff]  ;;  %v217_v8 = vld [vmem:[%s615_s19 + $0x58] sm:$0xff]  ;;  %v216_v10 = vld [vmem:[%s615_s19 + $0x50] sm:$0xff] }
  0x13   : > { %309 = vmatpush.msra.mxu0 %v220_v1  ;;  %v234_v7 = vld [vmem:[%s615_s19 + $0xe0] sm:$0xff]  ;;  %v233_v9 = vld [vmem:[%s615_s19 + $0xd8] sm:$0xff]  ;;  %v232_v12 = vld [vmem:[%s615_s19 + $0xd0] sm:$0xff] }
  0x14   : > { %329 = vmatpush.msra.mxu1 %v236_v3  ;;  %v253_v11 = vld [vmem:[%s615_s19 + $0x178] sm:$0xff]  ;;  %v252_v13 = vld [vmem:[%s615_s19 + $0x170] sm:$0xff]  ;;  %v251_v15 = vld [vmem:[%s615_s19 + $0x168] sm:$0xff] }
  0x15   : > { %310 = vmatpush.msra.mxu0 %v219_v4  ;;  %348 = vmatpush.msra.mxu2 %v253_v11  ;;  %v269_v14 = vld [vmem:[%s615_s19 + $0x1f8] sm:$0xff]  ;;  %v268_v16 = vld [vmem:[%s615_s19 + $0x1f0] sm:$0xff]  ;;  %v215_v17 = vld [vmem:[%s615_s19 + $0x48] sm:$0xff] }
  0x16   : > { %330 = vmatpush.msra.mxu1 %v235_v5  ;;  %v231_v18 = vld [vmem:[%s615_s19 + $0xc8] sm:$0xff]  ;;  %368 = vmatpush.msra.mxu3 %v269_v14  ;;  %v250_v19 = vld [vmem:[%s615_s19 + $0x160] sm:$0xff]  ;;  %v249_v23 = vld [vmem:[%s615_s19 + $0x158] sm:$0xff] }
  0x17   : > { %311 = vmatpush.msra.mxu0 %v218_v6  ;;  %349 = vmatpush.msra.mxu2 %v252_v13  ;;  %v267_v20 = vld [vmem:[%s615_s19 + $0x1e8] sm:$0xff]  ;;  %v214_v21 = vld [vmem:[%s615_s19 + $0x40] sm:$0xff]  ;;  %v213_v25 = vld [vmem:[%s615_s19 + $0x38] sm:$0xff] }
  0x18   : > { %331 = vmatpush.msra.mxu1 %v234_v7  ;;  %v230_v22 = vld [vmem:[%s615_s19 + $0xc0] sm:$0xff]  ;;  %369 = vmatpush.msra.mxu3 %v268_v16  ;;  %v229_v26 = vld [vmem:[%s615_s19 + $0xb8] sm:$0xff]  ;;  %v248_v27 = vld [vmem:[%s615_s19 + $0x150] sm:$0xff] }
  0x19   : > { %312 = vmatpush.msra.mxu0 %v217_v8  ;;  %350 = vmatpush.msra.mxu2 %v251_v15  ;;  %v266_v24 = vld [vmem:[%s615_s19 + $0x1e0] sm:$0xff]  ;;  %v265_v28 = vld [vmem:[%s615_s19 + $0x1d8] sm:$0xff]  ;;  %v212_v29 = vld [vmem:[%s615_s19 + $0x30] sm:$0xff] }
  0x1a   : > { %332 = vmatpush.msra.mxu1 %v233_v9  ;;  %370 = vmatpush.msra.mxu3 %v267_v20  ;;  %v228_v30 = vld [vmem:[%s615_s19 + $0xb0] sm:$0xff]  ;;  %v247_v31 = vld [vmem:[%s615_s19 + $0x148] sm:$0xff]  ;;  %v246_v35 = vld [vmem:[%s615_s19 + $0x140] sm:$0xff] }
  0x1b   : > { %313 = vmatpush.msra.mxu0 %v216_v10  ;;  %351 = vmatpush.msra.mxu2 %v250_v19  ;;  %v264_v32 = vld [vmem:[%s615_s19 + $0x1d0] sm:$0xff]  ;;  %v211_v33 = vld [vmem:[%s615_s19 + $0x28] sm:$0xff]  ;;  %v210_v37 = vld [vmem:[%s615_s19 + $0x20] sm:$0xff] }
  0x1c   : > { %333 = vmatpush.msra.mxu1 %v232_v12  ;;  %371 = vmatpush.msra.mxu3 %v266_v24  ;;  %v227_v34 = vld [vmem:[%s615_s19 + $0xa8] sm:$0xff]  ;;  %v226_v38 = vld [vmem:[%s615_s19 + $0xa0] sm:$0xff]  ;;  %v245_v39 = vld [vmem:[%s615_s19 + $0x138] sm:$0xff] }
  0x1d   : > { %314 = vmatpush.msra.mxu0 %v215_v17  ;;  %352 = vmatpush.msra.mxu2 %v249_v23  ;;  %v263_v36 = vld [vmem:[%s615_s19 + $0x1c8] sm:$0xff]  ;;  %v262_v40 = vld [vmem:[%s615_s19 + $0x1c0] sm:$0xff]  ;;  %v209_v41 = vld [vmem:[%s615_s19 + $0x18] sm:$0xff]  ;;  %v570_v23 = vmov 0  }
  0x1e   : > { %334 = vmatpush.msra.mxu1 %v231_v18  ;;  %372 = vmatpush.msra.mxu3 %v265_v28  ;;  %v225_v42 = vld [vmem:[%s615_s19 + $0x98] sm:$0xff]  ;;  %v244_v43 = vld [vmem:[%s615_s19 + $0x130] sm:$0xff]  ;;  %v243_v47 = vld [vmem:[%s615_s19 + $0x128] sm:$0xff] }
  0x1f   : > { %315 = vmatpush.msra.mxu0 %v214_v21  ;;  %353 = vmatpush.msra.mxu2 %v248_v27  ;;  %v261_v44 = vld [vmem:[%s615_s19 + $0x1b8] sm:$0xff]  ;;  %v208_v45 = vld [vmem:[%s615_s19 + $0x10] sm:$0xff]  ;;  %v207_v49 = vld [vmem:[%s615_s19 + $0x8] sm:$0xff] }
  0x20   : > { %335 = vmatpush.msra.mxu1 %v230_v22  ;;  %373 = vmatpush.msra.mxu3 %v264_v32  ;;  %v224_v46 = vld [vmem:[%s615_s19 + $0x90] sm:$0xff]  ;;  %v223_v50 = vld [vmem:[%s615_s19 + $0x88] sm:$0xff]  ;;  %v242_v51 = vld [vmem:[%s615_s19 + $0x120] sm:$0xff] }
  0x21   : > { %316 = vmatpush.msra.mxu0 %v213_v25  ;;  %354 = vmatpush.msra.mxu2 %v247_v31  ;;  %v260_v48 = vld [vmem:[%s615_s19 + $0x1b0] sm:$0xff]  ;;  %v259_v52 = vld [vmem:[%s615_s19 + $0x1a8] sm:$0xff]  ;;  %v206_v53 = vld [vmem:[%s615_s19] sm:$0xff] }
  0x22   : > { %336 = vmatpush.msra.mxu1 %v229_v26  ;;  %374 = vmatpush.msra.mxu3 %v263_v36  ;;  %v222_v54 = vld [vmem:[%s615_s19 + $0x80] sm:$0xff]  ;;  %v285_v55 = vld [vmem:[%s615_s19 + $0x278] sm:$0xff]  ;;  %v284_v59 = vld [vmem:[%s615_s19 + $0x270] sm:$0xff] }
  0x23   : > { %317 = vmatpush.msra.mxu0 %v212_v29  ;;  %355 = vmatpush.msra.mxu2 %v246_v35  ;;  %v301_v56 = vld [vmem:[%s615_s19 + $0x2f8] sm:$0xff]  ;;  %v258_v58 = vld [vmem:[%s615_s19 + $0x1a0] sm:$0xff]  ;;  %v300_v60 = vld [vmem:[%s615_s19 + $0x2f0] sm:$0xff] }
  0x24   : > { %337 = vmatpush.msra.mxu1 %v228_v30  ;;  %375 = vmatpush.msra.mxu3 %v262_v40  ;;  %v241_v57 = vld [vmem:[%s615_s19 + $0x118] sm:$0xff]  ;;  %v240_v61 = vld [vmem:[%s615_s19 + $0x110] sm:$0xff]  ;;  %v283_v63 = vld [vmem:[%s615_s19 + $0x268] sm:$0xff] }
  0x25   : > { %318 = vmatpush.msra.mxu0 %v211_v33  ;;  %356 = vmatpush.msra.mxu2 %v245_v39  ;;  %v257_v62 = vld [vmem:[%s615_s19 + $0x198] sm:$0xff]  ;;  %v299_v0 = vld [vmem:[%s615_s19 + $0x2e8] sm:$0xff]  ;;  %v256_v2 = vld [vmem:[%s615_s19 + $0x190] sm:$0xff] }
  0x26   : > { %338 = vmatpush.msra.mxu1 %v227_v34  ;;  %376 = vmatpush.msra.mxu3 %v261_v44  ;;  %v239_v1 = vld [vmem:[%s615_s19 + $0x108] sm:$0xff]  ;;  %v282_v3 = vld [vmem:[%s615_s19 + $0x260] sm:$0xff]  ;;  %v281_v7 = vld [vmem:[%s615_s19 + $0x258] sm:$0xff] }
  0x27   : > { %319 = vmatpush.msra.mxu0 %v210_v37  ;;  %357 = vmatpush.msra.mxu2 %v244_v43  ;;  %v298_v4 = vld [vmem:[%s615_s19 + $0x2e0] sm:$0xff]  ;;  %v255_v6 = vld [vmem:[%s615_s19 + $0x188] sm:$0xff]  ;;  %v297_v8 = vld [vmem:[%s615_s19 + $0x2d8] sm:$0xff] }
  0x28   : > { %339 = vmatpush.msra.mxu1 %v226_v38  ;;  %377 = vmatpush.msra.mxu3 %v260_v48  ;;  %v238_v5 = vld [vmem:[%s615_s19 + $0x100] sm:$0xff]  ;;  %v202_v9 = vld [vmem:[%s747_s0 + $0x10] sm:$0x7f]  ;;  %v203_v14 = vld [vmem:[%s747_s0 + $0x18] sm:$0x7f] }
  0x29   : > { %320 = vmatpush.msra.mxu0 %v209_v41  ;;  %358 = vmatpush.msra.mxu2 %v243_v47  ;;  %v254_v10 = vld [vmem:[%s615_s19 + $0x180] sm:$0xff]  ;;  %v280_v11 = vld [vmem:[%s615_s19 + $0x250] sm:$0xff]  ;;  %v279_v15 = vld [vmem:[%s615_s19 + $0x248] sm:$0xff] }
  0x2a   : > { %340 = vmatpush.msra.mxu1 %v225_v42  ;;  %378 = vmatpush.msra.mxu3 %v259_v52  ;;  %v296_v12 = vld [vmem:[%s615_s19 + $0x2d0] sm:$0xff]  ;;  %v200_v13 = vld [vmem:[%s747_s0] sm:$0x7f]  ;;  %v295_v16 = vld [vmem:[%s615_s19 + $0x2c8] sm:$0xff] }
  0x2b   : > { %321 = vmatpush.msra.mxu0 %v208_v45  ;;  %359 = vmatpush.msra.mxu2 %v242_v51  ;;  %v201_v17 = vld [vmem:[%s747_s0 + $0x8] sm:$0x7f]  ;;  %v278_v18 = vld [vmem:[%s615_s19 + $0x240] sm:$0xff]  ;;  %v277_v21 = vld [vmem:[%s615_s19 + $0x238] sm:$0xff] }
  0x2c   : > { %341 = vmatpush.msra.mxu1 %v224_v46  ;;  %379 = vmatpush.msra.mxu3 %v258_v58  ;;  %v294_v19 = vld [vmem:[%s615_s19 + $0x2c0] sm:$0xff]  ;;  %v293_v22 = vld [vmem:[%s615_s19 + $0x2b8] sm:$0xff]  ;;  %v276_v24 = vld [vmem:[%s615_s19 + $0x230] sm:$0xff] }
  0x2d   : > { %322 = vmatpush.msra.mxu0 %v207_v49  ;;  %360 = vmatpush.msra.mxu2 %v241_v57  ;;  %v302_v20 = vld [vmem:[%s749_s2] sm:$0x7f]  ;;  %v292_v25 = vld [vmem:[%s615_s19 + $0x2b0] sm:$0xff]  ;;  %v275_v26 = vld [vmem:[%s615_s19 + $0x228] sm:$0xff] }
  0x2e   : > { %342 = vmatpush.msra.mxu1 %v223_v50  ;;  %380 = vmatpush.msra.mxu3 %v257_v62  ;;  %v291_v27 = vld [vmem:[%s615_s19 + $0x2a8] sm:$0xff]  ;;  %v274_v28 = vld [vmem:[%s615_s19 + $0x220] sm:$0xff]  ;;  %v273_v30 = vld [vmem:[%s615_s19 + $0x218] sm:$0xff] }
  0x2f   : > { %323 = vmatpush.msra.mxu0 %v206_v53  ;;  %361 = vmatpush.msra.mxu2 %v240_v61  ;;  %v290_v29 = vld [vmem:[%s615_s19 + $0x2a0] sm:$0xff]  ;;  %v289_v31 = vld [vmem:[%s615_s19 + $0x298] sm:$0xff]  ;;  %v272_v32 = vld [vmem:[%s615_s19 + $0x210] sm:$0xff] }
  0x30   : > { %343 = vmatpush.msra.mxu1 %v222_v54  ;;  %381 = vmatpush.msra.mxu3 %v256_v2  ;;  %v288_v33 = vld [vmem:[%s615_s19 + $0x290] sm:$0xff]  ;;  %v271_v34 = vld [vmem:[%s615_s19 + $0x208] sm:$0xff]  ;;  %v270_v36 = vld [vmem:[%s615_s19 + $0x200] sm:$0xff] }
  0x31   : > { %388 = vmatpush.msrb.mxu0 %v285_v55  ;;  %362 = vmatpush.msra.mxu2 %v239_v1  ;;  %v287_v35 = vld [vmem:[%s615_s19 + $0x288] sm:$0xff]  ;;  %v286_v37 = vld [vmem:[%s615_s19 + $0x280] sm:$0xff] }
  0x32   : > { %408 = vmatpush.msrb.mxu1 %v301_v56  ;;  %382 = vmatpush.msra.mxu3 %v255_v6  ;;  %v204_v38 = vld [vmem:[%s747_s0 + $0x20] sm:$0x7f]  ;;  %v205_v39 = vld [vmem:[%s747_s0 + $0x28] sm:$0x7f] }
  0x33   : > { %389 = vmatpush.msrb.mxu0 %v284_v59  ;;  %363 = vmatpush.msra.mxu2 %v238_v5 }
  0x34   : > { %409 = vmatpush.msrb.mxu1 %v300_v60  ;;  %364 = vmatmul.f32.vlgmr.msra.gmra.mxu2 %v202_v9 }
  0x35   : > { %390 = vmatpush.msrb.mxu0 %v283_v63  ;;  %383 = vmatpush.msra.mxu3 %v254_v10 }
  0x36   : > { %410 = vmatpush.msrb.mxu1 %v299_v0  ;;  %324 = vmatmul.f32.vlgmr.msra.gmra.mxu0 %v200_v13 }
  0x37   : > { %391 = vmatpush.msrb.mxu0 %v282_v3  ;;  %384 = vmatmul.f32.vlgmr.msra.gmra.mxu3 %v203_v14 }
  0x38   : > { %411 = vmatpush.msrb.mxu1 %v298_v4  ;;  %543 = vset.pattern.permute.xlu0 %v570_v23 }
  0x39   : > { %392 = vmatpush.msrb.mxu0 %v281_v7  ;;  %344 = vmatmul.f32.vlgmr.msra.gmra.mxu1 %v201_v17 }
  0x3a   : > { %412 = vmatpush.msrb.mxu1 %v297_v8  ;;  %305 = vperm.xlu0 %543, %v302_v20  }
  0x3b   : > { %393 = vmatpush.msrb.mxu0 %v280_v11 }
  0x3c   : > { %413 = vmatpush.msrb.mxu1 %v296_v12 }
  0x3d   : > { %394 = vmatpush.msrb.mxu0 %v279_v15 }
  0x3e   : > { %414 = vmatpush.msrb.mxu1 %v295_v16 }
  0x3f   : > { %395 = vmatpush.msrb.mxu0 %v278_v18 }
  0x40   : > { %415 = vmatpush.msrb.mxu1 %v294_v19 }
  0x41   : > { %396 = vmatpush.msrb.mxu0 %v277_v21 }
  0x42   : > { %416 = vmatpush.msrb.mxu1 %v293_v22 }
  0x43   : > { %397 = vmatpush.msrb.mxu0 %v276_v24 }
  0x44   : > { %417 = vmatpush.msrb.mxu1 %v292_v25 }
  0x45   : > { %398 = vmatpush.msrb.mxu0 %v275_v26 }
  0x46   : > { %418 = vmatpush.msrb.mxu1 %v291_v27 }
  0x47   : > { %399 = vmatpush.msrb.mxu0 %v274_v28 }
  0x48   : > { %419 = vmatpush.msrb.mxu1 %v290_v29 }
  0x49   : > { %400 = vmatpush.msrb.mxu0 %v273_v30 }
  0x4a   : > { %420 = vmatpush.msrb.mxu1 %v289_v31 }
  0x4b   : > { %401 = vmatpush.msrb.mxu0 %v272_v32 }
  0x4c   : > { %421 = vmatpush.msrb.mxu1 %v288_v33 }
  0x4d   : > { %402 = vmatpush.msrb.mxu0 %v271_v34 }
  0x4e   : > { %422 = vmatpush.msrb.mxu1 %v287_v35 }
  0x4f   : > { %403 = vmatpush.msrb.mxu0 %v270_v36 }
  0x50   : > { %423 = vmatpush.msrb.mxu1 %v286_v37  ;;  %404 = vmatmul.f32.vlgmr.msrb.gmra.mxu0 %v204_v38 }
  0x51   : > { %424 = vmatmul.f32.vlgmr.msrb.gmra.mxu1 %v205_v39 }
  0xac   : > { %v306_v40 = vpop.permute.xlu0 %305 }
  0xb3   : > { %v325_v41 = vpop.f32.mrf.mxu0 }
  0xb4   : > { %v326_v42 = vadd.f32 %v325_v41, %v306_v40 }
  0xb6   : > { %v345_v43 = vpop.f32.mrf.mxu1 }
  0xb7   : > { %v346_v44 = vadd.f32 %v345_v43, %v326_v42  ;;  %v365_v45 = vpop.f32.mrf.mxu2 }
  0xb9   : > { %v366_v46 = vadd.f32 %v365_v45, %v346_v44 }
  0xba   : > { %v385_v47 = vpop.f32.mrf.mxu3 }
  0xbb   : > { %v386_v48 = vadd.f32 %v385_v47, %v366_v46 }
  0xcd   : > { %v405_v49 = vpop.f32.mrf.mxu0 }
  0xce   : > { %v425_v50 = vpop.f32.mrf.mxu1  ;;  %v406_v51 = vadd.f32 %v405_v49, %v386_v48 }
  0xd0   : > { %v426_v52 = vadd.f32 %v425_v50, %v406_v51 }
  0xd2   : > { %544 = vtanh.f32 %v426_v52 }
  0xd8   : > { %v545_v53 = vpop.eup %544 }
  0xd9   : > { %430 = vst.msk [vmem:[%s199_s10] sm:$0x7f] %vm429_vm0, %v545_v53 }
  0xda PF: > { %s13_s14 = sadd.s32 1, %s568_s14   ;;  %s751_s12 = smov %s564_s13 }
  0xdb   : > { %p10_p5 = scmp.ge.s32.totalorder %s13_s14, 4   ;;  %s752_s13 = smov %s754_s15 }
  0xdd   :  { %12 = sbr.rel (!%p10_p5) target bundleno = 2 (0x2), region = 62 }

// kernel: model_tanh_forward.4
= control target key start
LH: loop header
LB: loop body
LE: loop exit
PB: predicated region body
PF: predicated region fallthrough
CT: control target
= control target key end

     0   :  { %s591_s12 = smov 0   ;;  %s593_s13 = smov 0   ;;  %s716_s0 = inlined_call_operand.vmem [shape: f32[13,112], index: 0, kind: input, shape index: {}]   ;;  %s717_s1 = inlined_call_operand.vmem [shape: f32[2,112,484], index: 1, kind: input, shape index: {}]   ;;  %s718_s2 = inlined_call_operand.vmem [shape: f32[13,1], index: 2, kind: input, shape index: {}]   ;;  %s719_s3 = inlined_call_operand.vmem [shape: f32[2,13,484], index: 3, kind: output, shape index: {}]  }
   0x1   :  { %s595_s14 = smov 0  }
   0x2 LB: > { %s25_s15 = sadd.s32 1, %s564_s13  ;;  %p488_p0 = scmp.ge.s32.totalorder %s568_s14, 1  ;;  %s568_s14 = sphi %s595_s14, %s13_s14   ;;  %s564_s13 = sphi %s593_s13, %s721_s13   ;;  %s560_s12 = sphi %s591_s12, %s720_s12  }
   0x3   : > { %p27_p1 = scmp.ge.s32.totalorder %s25_s15, 2  ;;  %p158_p2 = scmp.lt.s32.totalorder %s568_s14, 3 }
   0x5   : > { %s723_s15 = smov (%p27_p1, %s25_s15), 0  ;;  %p159_p3 = pnand %p488_p0, %p158_p2 }
   0x6   : > { %p191_p4 = scmp.lt.s32.totalorder (!%p159_p3), %s560_s12, 1 }
   0x7   : > { %162 = sbr.rel (%p159_p3) target bundleno = 197 (0xc5), region = 32 }
   0xc   : > { %s725_s12 = smov (!%p191_p4, %s560_s12), 1  ;;  %v570_v0 = vmov 0   ;;  %v210_v57 = vld [vmem:[%s716_s0] sm:$0xff]  ;;  %vm280_vm0 = vcmask 916480   ;;  %v211_v59 = vld [vmem:[%s716_s0 + $0x8] sm:$0x1f] }
   0xd   : > { %s503_s16 = smul.u32 448, %s725_s12  ;;  %529 = vset.pattern.permute.xlu0 %v570_v0  ;;  %v268_v58 = vld [vmem:[%s718_s2] sm:$0xff]  ;;  %v269_v60 = vld [vmem:[%s718_s2 + $0x8] sm:$0x1f]  ;;  %s502_s28 = sshll.u32 %s725_s12, 6  ;;  %vm390_vm1 = vcmask 818176  }
   0xe   : > { %272 = vperm.xlu0 %529, %v268_v58   ;;  %s697_s4 = scalar_lea.vmem %s719_s3, %s502_s28  ;;  %vm395_vm2 = vcmask 815104  }
   0xf   : > { %s615_s19 = scalar_lea.vmem %s717_s1, %s503_s16 }
  0x10   : > { %v264_v1 = vld [vmem:[%s615_s19 + $0x1a0] sm:$0xff]  ;;  %v265_v2 = vld [vmem:[%s615_s19 + $0x1a8] sm:$0xff]  ;;  %v266_v3 = vld [vmem:[%s615_s19 + $0x1b0] sm:$0xff] }
  0x11   : > { %289 = vmatpush.msra.mxu0 %v264_v1  ;;  %312 = vmatpush.msra.mxu1 %v265_v2  ;;  %v267_v4 = vld [vmem:[%s615_s19 + $0x1b8] sm:$0xff]  ;;  %v260_v5 = vld [vmem:[%s615_s19 + $0x180] sm:$0xff]  ;;  %v261_v6 = vld [vmem:[%s615_s19 + $0x188] sm:$0xff] }
  0x12   : > { %335 = vmatpush.msra.mxu2 %v266_v3  ;;  %358 = vmatpush.msra.mxu3 %v267_v4  ;;  %v262_v7 = vld [vmem:[%s615_s19 + $0x190] sm:$0xff]  ;;  %v263_v8 = vld [vmem:[%s615_s19 + $0x198] sm:$0xff]  ;;  %v256_v9 = vld [vmem:[%s615_s19 + $0x160] sm:$0xff] }
  0x13   : > { %290 = vmatpush.msra.mxu0 %v260_v5  ;;  %313 = vmatpush.msra.mxu1 %v261_v6  ;;  %v257_v10 = vld [vmem:[%s615_s19 + $0x168] sm:$0xff]  ;;  %v258_v11 = vld [vmem:[%s615_s19 + $0x170] sm:$0xff]  ;;  %v259_v12 = vld [vmem:[%s615_s19 + $0x178] sm:$0xff] }
  0x14   : > { %336 = vmatpush.msra.mxu2 %v262_v7  ;;  %359 = vmatpush.msra.mxu3 %v263_v8  ;;  %v252_v13 = vld [vmem:[%s615_s19 + $0x140] sm:$0xff]  ;;  %v253_v14 = vld [vmem:[%s615_s19 + $0x148] sm:$0xff]  ;;  %v254_v15 = vld [vmem:[%s615_s19 + $0x150] sm:$0xff] }
  0x15   : > { %291 = vmatpush.msra.mxu0 %v256_v9  ;;  %314 = vmatpush.msra.mxu1 %v257_v10  ;;  %v255_v16 = vld [vmem:[%s615_s19 + $0x158] sm:$0xff]  ;;  %v248_v17 = vld [vmem:[%s615_s19 + $0x120] sm:$0xff]  ;;  %v249_v18 = vld [vmem:[%s615_s19 + $0x128] sm:$0xff] }
  0x16   : > { %337 = vmatpush.msra.mxu2 %v258_v11  ;;  %360 = vmatpush.msra.mxu3 %v259_v12  ;;  %v250_v19 = vld [vmem:[%s615_s19 + $0x130] sm:$0xff]  ;;  %v251_v20 = vld [vmem:[%s615_s19 + $0x138] sm:$0xff]  ;;  %v244_v21 = vld [vmem:[%s615_s19 + $0x100] sm:$0xff] }
  0x17   : > { %292 = vmatpush.msra.mxu0 %v252_v13  ;;  %315 = vmatpush.msra.mxu1 %v253_v14  ;;  %v245_v22 = vld [vmem:[%s615_s19 + $0x108] sm:$0xff]  ;;  %v246_v23 = vld [vmem:[%s615_s19 + $0x110] sm:$0xff]  ;;  %v247_v24 = vld [vmem:[%s615_s19 + $0x118] sm:$0xff] }
  0x18   : > { %338 = vmatpush.msra.mxu2 %v254_v15  ;;  %361 = vmatpush.msra.mxu3 %v255_v16  ;;  %v240_v25 = vld [vmem:[%s615_s19 + $0xe0] sm:$0xff]  ;;  %v241_v26 = vld [vmem:[%s615_s19 + $0xe8] sm:$0xff]  ;;  %v242_v27 = vld [vmem:[%s615_s19 + $0xf0] sm:$0xff] }
  0x19   : > { %293 = vmatpush.msra.mxu0 %v248_v17  ;;  %316 = vmatpush.msra.mxu1 %v249_v18  ;;  %v243_v28 = vld [vmem:[%s615_s19 + $0xf8] sm:$0xff]  ;;  %v236_v29 = vld [vmem:[%s615_s19 + $0xc0] sm:$0xff]  ;;  %v237_v30 = vld [vmem:[%s615_s19 + $0xc8] sm:$0xff] }
  0x1a   : > { %339 = vmatpush.msra.mxu2 %v250_v19  ;;  %362 = vmatpush.msra.mxu3 %v251_v20  ;;  %v238_v31 = vld [vmem:[%s615_s19 + $0xd0] sm:$0xff]  ;;  %v239_v32 = vld [vmem:[%s615_s19 + $0xd8] sm:$0xff]  ;;  %v232_v33 = vld [vmem:[%s615_s19 + $0xa0] sm:$0xff] }
  0x1b   : > { %294 = vmatpush.msra.mxu0 %v244_v21  ;;  %317 = vmatpush.msra.mxu1 %v245_v22  ;;  %v233_v34 = vld [vmem:[%s615_s19 + $0xa8] sm:$0xff]  ;;  %v234_v35 = vld [vmem:[%s615_s19 + $0xb0] sm:$0xff]  ;;  %v235_v36 = vld [vmem:[%s615_s19 + $0xb8] sm:$0xff] }
  0x1c   : > { %340 = vmatpush.msra.mxu2 %v246_v23  ;;  %363 = vmatpush.msra.mxu3 %v247_v24  ;;  %v228_v37 = vld [vmem:[%s615_s19 + $0x80] sm:$0xff]  ;;  %v229_v38 = vld [vmem:[%s615_s19 + $0x88] sm:$0xff]  ;;  %v230_v39 = vld [vmem:[%s615_s19 + $0x90] sm:$0xff] }
  0x1d   : > { %295 = vmatpush.msra.mxu0 %v240_v25  ;;  %318 = vmatpush.msra.mxu1 %v241_v26  ;;  %v231_v40 = vld [vmem:[%s615_s19 + $0x98] sm:$0xff]  ;;  %v224_v41 = vld [vmem:[%s615_s19 + $0x60] sm:$0xff]  ;;  %v225_v42 = vld [vmem:[%s615_s19 + $0x68] sm:$0xff] }
  0x1e   : > { %341 = vmatpush.msra.mxu2 %v242_v27  ;;  %364 = vmatpush.msra.mxu3 %v243_v28  ;;  %v226_v43 = vld [vmem:[%s615_s19 + $0x70] sm:$0xff]  ;;  %v227_v44 = vld [vmem:[%s615_s19 + $0x78] sm:$0xff]  ;;  %v220_v45 = vld [vmem:[%s615_s19 + $0x40] sm:$0xff] }
  0x1f   : > { %296 = vmatpush.msra.mxu0 %v236_v29  ;;  %319 = vmatpush.msra.mxu1 %v237_v30  ;;  %v221_v46 = vld [vmem:[%s615_s19 + $0x48] sm:$0xff]  ;;  %v222_v47 = vld [vmem:[%s615_s19 + $0x50] sm:$0xff]  ;;  %v223_v48 = vld [vmem:[%s615_s19 + $0x58] sm:$0xff] }
  0x20   : > { %342 = vmatpush.msra.mxu2 %v238_v31  ;;  %365 = vmatpush.msra.mxu3 %v239_v32  ;;  %v216_v49 = vld [vmem:[%s615_s19 + $0x20] sm:$0xff]  ;;  %v217_v50 = vld [vmem:[%s615_s19 + $0x28] sm:$0xff]  ;;  %v218_v51 = vld [vmem:[%s615_s19 + $0x30] sm:$0xff] }
  0x21   : > { %297 = vmatpush.msra.mxu0 %v232_v33  ;;  %320 = vmatpush.msra.mxu1 %v233_v34  ;;  %v219_v52 = vld [vmem:[%s615_s19 + $0x38] sm:$0xff]  ;;  %v212_v53 = vld [vmem:[%s615_s19] sm:$0xff]  ;;  %v213_v54 = vld [vmem:[%s615_s19 + $0x8] sm:$0xff] }
  0x22   : > { %343 = vmatpush.msra.mxu2 %v234_v35  ;;  %366 = vmatpush.msra.mxu3 %v235_v36  ;;  %v214_v55 = vld [vmem:[%s615_s19 + $0x10] sm:$0xff]  ;;  %v215_v56 = vld [vmem:[%s615_s19 + $0x18] sm:$0xff] }
  0x23   : > { %298 = vmatpush.msra.mxu0 %v228_v37  ;;  %321 = vmatpush.msra.mxu1 %v229_v38 }
  0x24   : > { %344 = vmatpush.msra.mxu2 %v230_v39  ;;  %367 = vmatpush.msra.mxu3 %v231_v40 }
  0x25   : > { %299 = vmatpush.msra.mxu0 %v224_v41  ;;  %322 = vmatpush.msra.mxu1 %v225_v42 }
  0x26   : > { %345 = vmatpush.msra.mxu2 %v226_v43  ;;  %368 = vmatpush.msra.mxu3 %v227_v44 }
  0x27   : > { %300 = vmatpush.msra.mxu0 %v220_v45  ;;  %323 = vmatpush.msra.mxu1 %v221_v46 }
  0x28   : > { %346 = vmatpush.msra.mxu2 %v222_v47  ;;  %369 = vmatpush.msra.mxu3 %v223_v48 }
  0x29   : > { %301 = vmatpush.msra.mxu0 %v216_v49  ;;  %324 = vmatpush.msra.mxu1 %v217_v50 }
  0x2a   : > { %347 = vmatpush.msra.mxu2 %v218_v51  ;;  %370 = vmatpush.msra.mxu3 %v219_v52 }
  0x2b   : > { %302 = vmatpush.msra.mxu0 %v212_v53  ;;  %325 = vmatpush.msra.mxu1 %v213_v54 }
  0x2c   : > { %348 = vmatpush.msra.mxu2 %v214_v55  ;;  %371 = vmatpush.msra.mxu3 %v215_v56 }
  0x2d   : > { %492 = vmatmul.msk.f32.vlgmr.msra.gmra.mxu0 %vm280_vm0, %v210_v57  ;;  %494 = vmatmul.msk.f32.vlgmr.msra.gmra.mxu1 %vm280_vm0, %v210_v57 }
  0x2e   : > { %496 = vmatmul.msk.f32.vlgmr.msra.gmra.mxu2 %vm280_vm0, %v210_v57  ;;  %498 = vmatmul.msk.f32.vlgmr.msra.gmra.mxu3 %vm280_vm0, %v210_v57 }
  0x2f   : > { %277 = vperm.xlu0 %529, %v269_v60  }
  0x35   : > { %493 = vmatmul.msk.f32.gmra.mxu0 %vm280_vm0, %v211_v59  ;;  %495 = vmatmul.msk.f32.gmra.mxu1 %vm280_vm0, %v211_v59 }
  0x36   : > { %497 = vmatmul.msk.f32.gmra.mxu2 %vm280_vm0, %v211_v59  ;;  %499 = vmatmul.msk.f32.gmra.mxu3 %vm280_vm0, %v211_v59 }
  0x80   : > { %v273_v61 = vpop.permute.xlu0 %272 }
  0xa1   : > { %v278_v2 = vpop.permute.xlu0 %277 }
  0xaa   : > { %v304_v62 = vpop.f32.mrf.mxu0  ;;  %v327_v63 = vpop.f32.mrf.mxu1 }
  0xab   : > { %v305_v0 = vadd.f32 %v304_v62, %v273_v61  ;;  %v328_v1 = vadd.f32 %v327_v63, %v273_v61 }
  0xad   : > { %530 = vtanh.f32 %v305_v0 }
  0xae   : > { %532 = vtanh.f32 %v328_v1 }
  0xb1   : > { %v350_v3 = vpop.f32.mrf.mxu2  ;;  %v373_v4 = vpop.f32.mrf.mxu3 }
  0xb2   : > { %v351_v5 = vadd.f32 %v350_v3, %v273_v61  ;;  %v374_v6 = vadd.f32 %v373_v4, %v273_v61  ;;  %v307_v7 = vpop.f32.mrf.mxu0  ;;  %v330_v8 = vpop.f32.mrf.mxu1 }
  0xb3   : > { %v531_v9 = vpop.eup %530  ;;  %v308_v10 = vadd.f32 %v307_v7, %v278_v2  ;;  %v331_v11 = vadd.f32 %v330_v8, %v278_v2 }
  0xb4   : > { %v533_v12 = vpop.eup %532  ;;  %387 = vst [vmem:[%s697_s4] sm:$0xff] %v531_v9  ;;  %534 = vtanh.f32 %v351_v5 }
  0xb5   : > { %388 = vst [vmem:[%s697_s4 + $0x8] sm:$0xff] %v533_v12  ;;  %536 = vtanh.f32 %v374_v6 }
  0xb6   : > { %538 = vtanh.f32 %v308_v10 }
  0xb7   : > { %540 = vtanh.f32 %v331_v11 }
  0xb9   : > { %v353_v13 = vpop.f32.mrf.mxu2  ;;  %v376_v14 = vpop.f32.mrf.mxu3 }
  0xba   : > { %v535_v15 = vpop.eup %534  ;;  %v354_v16 = vadd.f32 %v353_v13, %v278_v2  ;;  %v377_v17 = vadd.f32 %v376_v14, %v278_v2 }
  0xbb   : > { %v537_v18 = vpop.eup %536  ;;  %389 = vst [vmem:[%s697_s4 + $0x10] sm:$0xff] %v535_v15 }
  0xbc   : > { %v539_v19 = vpop.eup %538  ;;  %391 = vst.msk [vmem:[%s697_s4 + $0x18] sm:$0xff] %vm390_vm1, %v537_v18  ;;  %542 = vtanh.f32 %v354_v16 }
  0xbd   : > { %v541_v20 = vpop.eup %540  ;;  %392 = vst [vmem:[%s697_s4 + $0x20] sm:$0x1f] %v539_v19  ;;  %544 = vtanh.f32 %v377_v17 }
  0xbe   : > { %393 = vst [vmem:[%s697_s4 + $0x28] sm:$0x1f] %v541_v20 }
  0xc2   : > { %v543_v21 = vpop.eup %542 }
  0xc3   : > { %v545_v22 = vpop.eup %544  ;;  %394 = vst [vmem:[%s697_s4 + $0x30] sm:$0x1f] %v543_v21 }
  0xc4   : > { %396 = vst.msk [vmem:[%s697_s4 + $0x38] sm:$0x1f] %vm395_vm2, %v545_v22 }
  0xc5 PF: > { %s13_s14 = sadd.s32 1, %s568_s14   ;;  %s720_s12 = smov %s564_s13 }
  0xc6   : > { %p10_p5 = scmp.ge.s32.totalorder %s13_s14, 4   ;;  %s721_s13 = smov %s723_s15 }
  0xc8   :  { %12 = sbr.rel (!%p10_p5) target bundleno = 2 (0x2), region = 62 }

// kernel: model_tanh_forward.5
= control target key start
LH: loop header
LB: loop body
LE: loop exit
PB: predicated region body
PF: predicated region fallthrough
CT: control target
= control target key end

     0   :  { %s4215_s12 = smov 0   ;;  %s4217_s13 = smov 0   ;;  %s6295_s0 = inlined_call_operand.vmem [shape: f32[19,325], index: 0, kind: input, shape index: {}]   ;;  %s6296_s1 = inlined_call_operand.vmem [shape: f32[2,325,3600], index: 1, kind: input, shape index: {}]   ;;  %s6297_s2 = inlined_call_operand.vmem [shape: f32[19,1], index: 2, kind: input, shape index: {}]   ;;  %s6298_s3 = inlined_call_operand.vmem [shape: f32[2,19,3600], index: 3, kind: output, shape index: {}]  }
   0x1   :  { %s4219_s14 = smov 0  }
   0x2 LB: > { %s25_s15 = sadd.s32 1, %s4188_s13  ;;  %p3966_p0 = scmp.ge.s32.totalorder %s4192_s14, 1  ;;  %s4192_s14 = sphi %s4219_s14, %s13_s14   ;;  %s4188_s13 = sphi %s4217_s13, %s6300_s13   ;;  %s4184_s12 = sphi %s4215_s12, %s6299_s12  }
   0x3   : > { %p27_p1 = scmp.ge.s32.totalorder %s25_s15, 2  ;;  %p158_p2 = scmp.lt.s32.totalorder %s4192_s14, 3 }
   0x5   : > { %s6302_s15 = smov (%p27_p1, %s25_s15), 0  ;;  %p159_p3 = pnand %p3966_p0, %p158_p2 }
   0x6   : > { %p191_p4 = scmp.lt.s32.totalorder (!%p159_p3), %s4184_s12, 1 }
   0x7   : > { %162 = sbr.rel (%p159_p3) target bundleno = 894 (0x37e), region = 32 }
   0xc   : > { %s6304_s12 = smov (!%p191_p4, %s4184_s12), 1  ;;  %vm1436_vm0 = vcmask 1044480   ;;  %vm1426_vm1 = vcmask 564224   ;;  %vm3814_vm2 = vcmask 130048   ;;  %vm3873_vm3 = vcmask 124928  }
   0xd   : > { %s4096_s16 = smul.u32 9512, %s6304_s12 }
   0xe   : > { %s4097_s22 = smul.u32 696, %s6304_s12 }
   0xf   : > { %s4239_s19 = scalar_lea.vmem %s6296_s1, %s4096_s16 }
  0x10   : > { %v1118_v0 = vld [vmem:[%s4239_s19 + $0x1c18] sm:$0xff]  ;;  %v1379_v1 = vld [vmem:[%s4239_s19 + $0x2440] sm:$0x1f]  ;;  %v1089_v3 = vld [vmem:[%s4239_s19 + $0x1b30] sm:$0xff]  ;;  %s4684_s26 = scalar_lea.vmem %s6298_s3, %s4097_s22 }
  0x11   : > { %v654_v2 = vld [vmem:[%s4239_s19 + $0xd98] sm:$0xff]  ;;  %1550 = vmatpush.msra.mxu1 %v1118_v0  ;;  %3969 = vmatpush.msk.msra.mxu2 %vm1436_vm0, %v1379_v1  ;;  %v625_v5 = vld [vmem:[%s4239_s19 + $0xcb0] sm:$0xff]  ;;  %v1060_v6 = vld [vmem:[%s4239_s19 + $0x1a48] sm:$0xff] }
  0x12   : > { %v1350_v4 = vld [vmem:[%s4239_s19 + $0x2358] sm:$0xff]  ;;  %1524 = vmatpush.msra.mxu0 %v654_v2  ;;  %v1321_v7 = vld [vmem:[%s4239_s19 + $0x2270] sm:$0xff]  ;;  %v596_v8 = vld [vmem:[%s4239_s19 + $0xbc8] sm:$0xff] }
  0x13   : > { %1551 = vmatpush.msra.mxu1 %v1089_v3  ;;  %1584 = vmatpush.msra.mxu2 %v1350_v4  ;;  %v1031_v9 = vld [vmem:[%s4239_s19 + $0x1960] sm:$0xff]  ;;  %v1292_v10 = vld [vmem:[%s4239_s19 + $0x2188] sm:$0xff]  ;;  %v1002_v12 = vld [vmem:[%s4239_s19 + $0x1878] sm:$0xff] }
  0x14   : > { %1525 = vmatpush.msra.mxu0 %v625_v5  ;;  %v567_v11 = vld [vmem:[%s4239_s19 + $0xae0] sm:$0xff]  ;;  %v538_v15 = vld [vmem:[%s4239_s19 + $0x9f8] sm:$0xff]  ;;  %v973_v16 = vld [vmem:[%s4239_s19 + $0x1790] sm:$0xff] }
  0x15   : > { %1552 = vmatpush.msra.mxu1 %v1060_v6  ;;  %1585 = vmatpush.msra.mxu2 %v1321_v7  ;;  %v1263_v13 = vld [vmem:[%s4239_s19 + $0x20a0] sm:$0xff]  ;;  %v1234_v17 = vld [vmem:[%s4239_s19 + $0x1fb8] sm:$0xff]  ;;  %v509_v19 = vld [vmem:[%s4239_s19 + $0x910] sm:$0xff] }
  0x16   : > { %1526 = vmatpush.msra.mxu0 %v596_v8  ;;  %v655_v14 = vld [vmem:[%s4239_s19 + $0xda0] sm:$0xff]  ;;  %v626_v18 = vld [vmem:[%s4239_s19 + $0xcb8] sm:$0xff]  ;;  %v597_v20 = vld [vmem:[%s4239_s19 + $0xbd0] sm:$0xff] }
  0x17   : > { %1553 = vmatpush.msra.mxu1 %v1031_v9  ;;  %1586 = vmatpush.msra.mxu2 %v1292_v10  ;;  %v944_v21 = vld [vmem:[%s4239_s19 + $0x16a8] sm:$0xff]  ;;  %v1205_v22 = vld [vmem:[%s4239_s19 + $0x1ed0] sm:$0xff]  ;;  %v915_v25 = vld [vmem:[%s4239_s19 + $0x15c0] sm:$0xff] }
  0x18   : > { %1527 = vmatpush.msra.mxu0 %v567_v11  ;;  %1602 = vmatpush.msra.mxu3 %v655_v14  ;;  %v480_v23 = vld [vmem:[%s4239_s19 + $0x828] sm:$0xff]  ;;  %v451_v27 = vld [vmem:[%s4239_s19 + $0x740] sm:$0xff]  ;;  %v886_v29 = vld [vmem:[%s4239_s19 + $0x14d8] sm:$0xff] }
  0x19   : > { %1554 = vmatpush.msra.mxu1 %v1002_v12  ;;  %1587 = vmatpush.msra.mxu2 %v1263_v13  ;;  %v568_v24 = vld [vmem:[%s4239_s19 + $0xae8] sm:$0xff]  ;;  %v539_v28 = vld [vmem:[%s4239_s19 + $0xa00] sm:$0xff]  ;;  %v422_v31 = vld [vmem:[%s4239_s19 + $0x658] sm:$0xff] }
  0x1a   : > { %1528 = vmatpush.msra.mxu0 %v538_v15  ;;  %1603 = vmatpush.msra.mxu3 %v626_v18  ;;  %v1176_v26 = vld [vmem:[%s4239_s19 + $0x1de8] sm:$0xff]  ;;  %v1147_v30 = vld [vmem:[%s4239_s19 + $0x1d00] sm:$0xff]  ;;  %v857_v33 = vld [vmem:[%s4239_s19 + $0x13f0] sm:$0xff] }
  0x1b   : > { %1555 = vmatpush.msra.mxu1 %v973_v16  ;;  %1588 = vmatpush.msra.mxu2 %v1234_v17  ;;  %v1119_v32 = vld [vmem:[%s4239_s19 + $0x1c20] sm:$0xff]  ;;  %v510_v34 = vld [vmem:[%s4239_s19 + $0x918] sm:$0xff]  ;;  %v393_v35 = vld [vmem:[%s4239_s19 + $0x570] sm:$0xff] }
  0x1c   : > { %1529 = vmatpush.msra.mxu0 %v509_v19  ;;  %1604 = vmatpush.msra.mxu3 %v597_v20  ;;  %v1090_v36 = vld [vmem:[%s4239_s19 + $0x1b38] sm:$0xff]  ;;  %v828_v37 = vld [vmem:[%s4239_s19 + $0x1308] sm:$0xff]  ;;  %v481_v38 = vld [vmem:[%s4239_s19 + $0x830] sm:$0xff] }
  0x1d   : > { %1556 = vmatpush.msra.mxu1 %v944_v21  ;;  %1589 = vmatpush.msra.mxu2 %v1205_v22  ;;  %v364_v39 = vld [vmem:[%s4239_s19 + $0x488] sm:$0xff]  ;;  %v1061_v40 = vld [vmem:[%s4239_s19 + $0x1a50] sm:$0xff]  ;;  %v799_v41 = vld [vmem:[%s4239_s19 + $0x1220] sm:$0xff] }
  0x1e   : > { %1530 = vmatpush.msra.mxu0 %v480_v23  ;;  %1605 = vmatpush.msra.mxu3 %v568_v24  ;;  %v452_v42 = vld [vmem:[%s4239_s19 + $0x748] sm:$0xff]  ;;  %v335_v43 = vld [vmem:[%s4239_s19 + $0x3a0] sm:$0xff]  ;;  %v770_v45 = vld [vmem:[%s4239_s19 + $0x1138] sm:$0xff] }
  0x1f   : > { %1557 = vmatpush.msra.mxu1 %v915_v25  ;;  %1590 = vmatpush.msra.mxu2 %v1176_v26  ;;  %v1032_v44 = vld [vmem:[%s4239_s19 + $0x1968] sm:$0xff]  ;;  %v423_v46 = vld [vmem:[%s4239_s19 + $0x660] sm:$0xff]  ;;  %v306_v47 = vld [vmem:[%s4239_s19 + $0x2b8] sm:$0xff] }
  0x20   : > { %1531 = vmatpush.msra.mxu0 %v451_v27  ;;  %1606 = vmatpush.msra.mxu3 %v539_v28  ;;  %v1003_v48 = vld [vmem:[%s4239_s19 + $0x1880] sm:$0xff]  ;;  %v741_v49 = vld [vmem:[%s4239_s19 + $0x1050] sm:$0xff]  ;;  %v394_v50 = vld [vmem:[%s4239_s19 + $0x578] sm:$0xff] }
  0x21   : > { %1558 = vmatpush.msra.mxu1 %v886_v29  ;;  %1591 = vmatpush.msra.mxu2 %v1147_v30  ;;  %v277_v51 = vld [vmem:[%s4239_s19 + $0x1d0] sm:$0xff]  ;;  %v974_v52 = vld [vmem:[%s4239_s19 + $0x1798] sm:$0xff]  ;;  %v712_v53 = vld [vmem:[%s4239_s19 + $0xf68] sm:$0xff] }
  0x22   : > { %1532 = vmatpush.msra.mxu0 %v422_v31  ;;  %1607 = vmatpush.msra.mxu3 %v510_v34  ;;  %v365_v54 = vld [vmem:[%s4239_s19 + $0x490] sm:$0xff]  ;;  %v248_v55 = vld [vmem:[%s4239_s19 + $0xe8] sm:$0xff]  ;;  %v683_v57 = vld [vmem:[%s4239_s19 + $0xe80] sm:$0xff] }
  0x23   : > { %1628 = vmatpush.msrb.mxu2 %v1119_v32  ;;  %1559 = vmatpush.msra.mxu1 %v857_v33  ;;  %v945_v56 = vld [vmem:[%s4239_s19 + $0x16b0] sm:$0xff]  ;;  %v336_v58 = vld [vmem:[%s4239_s19 + $0x3a8] sm:$0xff]  ;;  %v219_v59 = vld [vmem:[%s4239_s19] sm:$0xff] }
  0x24   : > { %1533 = vmatpush.msra.mxu0 %v393_v35  ;;  %1608 = vmatpush.msra.mxu3 %v481_v38  ;;  %v916_v60 = vld [vmem:[%s4239_s19 + $0x15c8] sm:$0xff]  ;;  %v887_v63 = vld [vmem:[%s4239_s19 + $0x14e0] sm:$0xff]  ;;  %v858_v3 = vld [vmem:[%s4239_s19 + $0x13f8] sm:$0xff] }
  0x25   : > { %1629 = vmatpush.msrb.mxu2 %v1090_v36  ;;  %1560 = vmatpush.msra.mxu1 %v828_v37  ;;  %v656_v61 = vld [vmem:[%s4239_s19 + $0xda8] sm:$0xff]  ;;  %v307_v0 = vld [vmem:[%s4239_s19 + $0x2c0] sm:$0xff]  ;;  %v278_v4 = vld [vmem:[%s4239_s19 + $0x1d8] sm:$0xff] }
  0x26   : > { %1534 = vmatpush.msra.mxu0 %v364_v39  ;;  %1609 = vmatpush.msra.mxu3 %v452_v42  ;;  %v1380_v62 = vld [vmem:[%s4239_s19 + $0x2448] sm:$0x1f]  ;;  %v627_v1 = vld [vmem:[%s4239_s19 + $0xcc0] sm:$0xff]  ;;  %v598_v5 = vld [vmem:[%s4239_s19 + $0xbd8] sm:$0xff] }
  0x27   : > { %1630 = vmatpush.msrb.mxu2 %v1061_v40  ;;  %1561 = vmatpush.msra.mxu1 %v799_v41  ;;  %v1351_v2 = vld [vmem:[%s4239_s19 + $0x2360] sm:$0xff]  ;;  %v1322_v6 = vld [vmem:[%s4239_s19 + $0x2278] sm:$0xff]  ;;  %v829_v7 = vld [vmem:[%s4239_s19 + $0x1310] sm:$0xff] }
  0x28   : > { %1535 = vmatpush.msra.mxu0 %v335_v43  ;;  %1610 = vmatpush.msra.mxu3 %v423_v46  ;;  %v249_v8 = vld [vmem:[%s4239_s19 + $0xf0] sm:$0xff]  ;;  %v800_v12 = vld [vmem:[%s4239_s19 + $0x1228] sm:$0xff]  ;;  %v771_v16 = vld [vmem:[%s4239_s19 + $0x1140] sm:$0xff] }
  0x29   : > { %1631 = vmatpush.msrb.mxu2 %v1032_v44  ;;  %1562 = vmatpush.msra.mxu1 %v770_v45  ;;  %v569_v9 = vld [vmem:[%s4239_s19 + $0xaf0] sm:$0xff]  ;;  %v540_v13 = vld [vmem:[%s4239_s19 + $0xa08] sm:$0xff]  ;;  %v511_v17 = vld [vmem:[%s4239_s19 + $0x920] sm:$0xff] }
  0x2a   : > { %1536 = vmatpush.msra.mxu0 %v306_v47  ;;  %1611 = vmatpush.msra.mxu3 %v394_v50  ;;  %v4320_v10 = vld [vmem:[%s6295_s0 + $0x10] sm:$0xff]  ;;  %v220_v14 = vld [vmem:[%s4239_s19 + $0x8] sm:$0xff]  ;;  %v4334_v18 = vld [vmem:[%s6295_s0] sm:$0xff] }
  0x2b   : > { %1632 = vmatpush.msrb.mxu2 %v1003_v48  ;;  %1563 = vmatpush.msra.mxu1 %v741_v49  ;;  %v1293_v11 = vld [vmem:[%s4239_s19 + $0x2190] sm:$0xff]  ;;  %v1264_v15 = vld [vmem:[%s4239_s19 + $0x20a8] sm:$0xff]  ;;  %v1235_v19 = vld [vmem:[%s4239_s19 + $0x1fc0] sm:$0xff]  ;;  %v4194_v49 = vmov 0  }
  0x2c   : > { %1537 = vmatpush.msra.mxu0 %v277_v51  ;;  %1612 = vmatpush.msra.mxu3 %v365_v54  ;;  %v742_v20 = vld [vmem:[%s4239_s19 + $0x1058] sm:$0xff]  ;;  %v1120_v22 = vld [vmem:[%s4239_s19 + $0x1c28] sm:$0xff]  ;;  %v713_v25 = vld [vmem:[%s4239_s19 + $0xf70] sm:$0xff] }
  0x2d   : > { %1633 = vmatpush.msrb.mxu2 %v974_v52  ;;  %1564 = vmatpush.msra.mxu1 %v712_v53  ;;  %v482_v21 = vld [vmem:[%s4239_s19 + $0x838] sm:$0xff]  ;;  %v4345_v24 = vld [vmem:[%s6295_s0 + $0x8] sm:$0xff]  ;;  %v453_v26 = vld [vmem:[%s4239_s19 + $0x750] sm:$0xff] }
  0x2e   : > { %1538 = vmatpush.msra.mxu0 %v248_v55  ;;  %1613 = vmatpush.msra.mxu3 %v336_v58  ;;  %v1206_v23 = vld [vmem:[%s4239_s19 + $0x1ed8] sm:$0xff]  ;;  %v1091_v27 = vld [vmem:[%s4239_s19 + $0x1b40] sm:$0xff]  ;;  %v4353_v28 = vld [vmem:[%s6295_s0 + $0x28] sm:$0xff] }
  0x2f   : > { %1634 = vmatpush.msrb.mxu2 %v945_v56  ;;  %1565 = vmatpush.msra.mxu1 %v683_v57  ;;  %v1177_v29 = vld [vmem:[%s4239_s19 + $0x1df0] sm:$0xff]  ;;  %v684_v30 = vld [vmem:[%s4239_s19 + $0xe88] sm:$0xff]  ;;  %v1062_v32 = vld [vmem:[%s4239_s19 + $0x1a58] sm:$0xff] }
  0x30   : > { %1539 = vmatpush.msra.mxu0 %v219_v59  ;;  %1614 = vmatpush.msra.mxu3 %v307_v0  ;;  %v424_v31 = vld [vmem:[%s4239_s19 + $0x668] sm:$0xff]  ;;  %v1381_v34 = vld [vmem:[%s4239_s19 + $0x2450] sm:$0x1f]  ;;  %v395_v35 = vld [vmem:[%s4239_s19 + $0x580] sm:$0xff] }
  0x31   : > { %1635 = vmatpush.msrb.mxu2 %v916_v60  ;;  %1680 = vmatpush.msrb.mxu1 %v656_v61  ;;  %v1148_v33 = vld [vmem:[%s4239_s19 + $0x1d08] sm:$0xff]  ;;  %v1033_v36 = vld [vmem:[%s4239_s19 + $0x1970] sm:$0xff]  ;;  %v4372_v39 = vld [vmem:[%s6295_s0 + $0x18] sm:$0xff] }
  0x32   : > { %3973 = vmatpush.msk.msrb.mxu0 %vm1436_vm0, %v1380_v62  ;;  %1615 = vmatpush.msra.mxu3 %v278_v4  ;;  %v657_v37 = vld [vmem:[%s4239_s19 + $0xdb0] sm:$0xff]  ;;  %v1352_v38 = vld [vmem:[%s4239_s19 + $0x2368] sm:$0xff]  ;;  %v366_v40 = vld [vmem:[%s4239_s19 + $0x498] sm:$0xff] }
  0x33   : > { %1636 = vmatpush.msrb.mxu2 %v887_v63  ;;  %1681 = vmatpush.msrb.mxu1 %v627_v1  ;;  %v1004_v41 = vld [vmem:[%s4239_s19 + $0x1888] sm:$0xff]  ;;  %v1323_v43 = vld [vmem:[%s4239_s19 + $0x2280] sm:$0xff]  ;;  %v337_v45 = vld [vmem:[%s4239_s19 + $0x3b0] sm:$0xff] }
  0x34   : > { %1662 = vmatpush.msrb.mxu0 %v1351_v2  ;;  %1616 = vmatpush.msra.mxu3 %v249_v8  ;;  %v628_v42 = vld [vmem:[%s4239_s19 + $0xcc8] sm:$0xff]  ;;  %v4383_v44 = vld [vmem:[%s6295_s0 + $0x20] sm:$0xff]  ;;  %v1294_v52 = vld [vmem:[%s4239_s19 + $0x2198] sm:$0xff] }
  0x35   : > { %1637 = vmatpush.msrb.mxu2 %v858_v3  ;;  %1682 = vmatpush.msrb.mxu1 %v598_v5  ;;  %v975_v46 = vld [vmem:[%s4239_s19 + $0x17a0] sm:$0xff]  ;;  %v308_v51 = vld [vmem:[%s4239_s19 + $0x2c8] sm:$0xff]  ;;  %v946_v53 = vld [vmem:[%s4239_s19 + $0x16b8] sm:$0xff] }
  0x36   : > { %1663 = vmatpush.msrb.mxu0 %v1322_v6  ;;  %3970 = vmatmul.msk.f32.vlgmr.msra.gmra.mxu2 %vm1426_vm1, %v4320_v10  ;;  %v599_v47 = vld [vmem:[%s4239_s19 + $0xbe0] sm:$0xff]  ;;  %v570_v54 = vld [vmem:[%s4239_s19 + $0xaf8] sm:$0xff]  ;;  %v1265_v56 = vld [vmem:[%s4239_s19 + $0x20b0] sm:$0xff] }
  0x37   : > { %1638 = vmatpush.msrb.mxu2 %v829_v7  ;;  %1683 = vmatpush.msrb.mxu1 %v569_v9  ;;  %v1408_v48 = vld [vmem:[%s6297_s2] sm:$0xff]  ;;  %v917_v57 = vld [vmem:[%s4239_s19 + $0x15d0] sm:$0xff]  ;;  %v1236_v59 = vld [vmem:[%s4239_s19 + $0x1fc8] sm:$0xff] }
  0x38   : > { %1664 = vmatpush.msrb.mxu0 %v1293_v11  ;;  %1617 = vmatpush.msra.mxu3 %v220_v14  ;;  %v4396_v50 = vld [vmem:[%s6295_s0 + $0x40] sm:$0x7]  ;;  %v541_v58 = vld [vmem:[%s4239_s19 + $0xa10] sm:$0xff]  ;;  %v250_v61 = vld [vmem:[%s4239_s19 + $0xf8] sm:$0xff] }
  0x39   : > { %1639 = vmatpush.msrb.mxu2 %v800_v12  ;;  %1684 = vmatpush.msrb.mxu1 %v540_v13  ;;  %v279_v55 = vld [vmem:[%s4239_s19 + $0x1e0] sm:$0xff]  ;;  %v4412_v60 = vld [vmem:[%s6295_s0 + $0x30] sm:$0x7]  ;;  %v888_v62 = vld [vmem:[%s4239_s19 + $0x14e8] sm:$0xff] }
  0x3a   : > { %1665 = vmatpush.msrb.mxu0 %v1264_v15  ;;  %1706 = vmatpush.msrb.mxu3 %v1120_v22  ;;  %v512_v63 = vld [vmem:[%s4239_s19 + $0x928] sm:$0xff]  ;;  %v1207_v0 = vld [vmem:[%s4239_s19 + $0x1ee0] sm:$0xff]  ;;  %v4423_v1 = vld [vmem:[%s6295_s0 + $0x38] sm:$0x7] }
  0x3b   : > { %1640 = vmatpush.msrb.mxu2 %v771_v16  ;;  %1685 = vmatpush.msrb.mxu1 %v511_v17  ;;  %v859_v2 = vld [vmem:[%s4239_s19 + $0x1400] sm:$0xff]  ;;  %v221_v3 = vld [vmem:[%s4239_s19 + $0x10] sm:$0xff]  ;;  %v1409_v5 = vld [vmem:[%s6297_s2 + $0x8] sm:$0xff] }
  0x3c   : > { %1540 = vmatmul.f32.vlgmr.msra.gmra.mxu0 %v4334_v18  ;;  %1566 = vmatmul.f32.vlgmr.msra.gmra.mxu1 %v4345_v24  ;;  %v483_v4 = vld [vmem:[%s4239_s19 + $0x840] sm:$0xff]  ;;  %v1178_v6 = vld [vmem:[%s4239_s19 + $0x1df8] sm:$0xff]  ;;  %v1121_v7 = vld [vmem:[%s4239_s19 + $0x1c30] sm:$0xff] }
  0x3d   : > { %1666 = vmatpush.msrb.mxu0 %v1235_v19  ;;  %1641 = vmatpush.msrb.mxu2 %v742_v20  ;;  %v830_v8 = vld [vmem:[%s4239_s19 + $0x1318] sm:$0xff]  ;;  %v1149_v11 = vld [vmem:[%s4239_s19 + $0x1d10] sm:$0xff]  ;;  %v1092_v12 = vld [vmem:[%s4239_s19 + $0x1b48] sm:$0xff] }
  0x3e   : > { %1686 = vmatpush.msrb.mxu1 %v482_v21  ;;  %1707 = vmatpush.msrb.mxu3 %v1091_v27  ;;  %v454_v9 = vld [vmem:[%s4239_s19 + $0x758] sm:$0xff]  ;;  %v801_v13 = vld [vmem:[%s4239_s19 + $0x1230] sm:$0xff]  ;;  %v1063_v16 = vld [vmem:[%s4239_s19 + $0x1a60] sm:$0xff] }
  0x3f   : > { %1667 = vmatpush.msrb.mxu0 %v1206_v23  ;;  %1642 = vmatpush.msrb.mxu2 %v713_v25  ;;  %v425_v14 = vld [vmem:[%s4239_s19 + $0x670] sm:$0xff]  ;;  %v658_v15 = vld [vmem:[%s4239_s19 + $0xdb8] sm:$0xff]  ;;  %v772_v17 = vld [vmem:[%s4239_s19 + $0x1148] sm:$0xff] }
  0x40   : > { %1687 = vmatpush.msrb.mxu1 %v453_v26  ;;  %3971 = vmatmul.msk.f32.gmra.mxu2 %vm1426_vm1, %v4353_v28  ;;  %v396_v19 = vld [vmem:[%s4239_s19 + $0x588] sm:$0xff]  ;;  %v629_v20 = vld [vmem:[%s4239_s19 + $0xcd0] sm:$0xff]  ;;  %v1034_v21 = vld [vmem:[%s4239_s19 + $0x1978] sm:$0xff] }
  0x41   : > { %1668 = vmatpush.msrb.mxu0 %v1177_v29  ;;  %1643 = vmatpush.msrb.mxu2 %v684_v30  ;;  %v743_v22 = vld [vmem:[%s4239_s19 + $0x1060] sm:$0xff]  ;;  %v600_v25 = vld [vmem:[%s4239_s19 + $0xbe8] sm:$0xff]  ;;  %v1410_v26 = vld [vmem:[%s6297_s2 + $0x10] sm:$0x7] }
  0x42   : > { %1688 = vmatpush.msrb.mxu1 %v424_v31  ;;  %1708 = vmatpush.msrb.mxu3 %v1062_v32  ;;  %v367_v23 = vld [vmem:[%s4239_s19 + $0x4a0] sm:$0xff]  ;;  %v1005_v27 = vld [vmem:[%s4239_s19 + $0x1890] sm:$0xff]  ;;  %v714_v29 = vld [vmem:[%s4239_s19 + $0xf78] sm:$0xff] }
  0x43   : > { %1669 = vmatpush.msrb.mxu0 %v1148_v33  ;;  %3977 = vmatpush.msk.msra.mxu2 %vm1436_vm0, %v1381_v34  ;;  %v338_v30 = vld [vmem:[%s4239_s19 + $0x3b8] sm:$0xff]  ;;  %v571_v31 = vld [vmem:[%s4239_s19 + $0xb00] sm:$0xff]  ;;  %v976_v32 = vld [vmem:[%s4239_s19 + $0x17a8] sm:$0xff] }
  0x44   : > { %1689 = vmatpush.msrb.mxu1 %v395_v35  ;;  %1709 = vmatpush.msrb.mxu3 %v1033_v36  ;;  %v685_v33 = vld [vmem:[%s4239_s19 + $0xe90] sm:$0xff]  ;;  %v542_v35 = vld [vmem:[%s4239_s19 + $0xa18] sm:$0xff]  ;;  %v947_v36 = vld [vmem:[%s4239_s19 + $0x16c0] sm:$0xff] }
  0x45   : > { %1758 = vmatpush.msra.mxu0 %v657_v37  ;;  %1618 = vmatmul.f32.vlgmr.msra.gmra.mxu3 %v4334_v18  ;;  %v309_v34 = vld [vmem:[%s4239_s19 + $0x2d0] sm:$0xff]  ;;  %v280_v37 = vld [vmem:[%s4239_s19 + $0x1e8] sm:$0xff] }
  0x46   : > { %1740 = vmatpush.msra.mxu2 %v1352_v38  ;;  %1543 = vmatmul.f32.gmra.mxu0 %v4372_v39  ;;  %v513_v38 = vld [vmem:[%s4239_s19 + $0x930] sm:$0xff] }
  0x47   : > { %1690 = vmatpush.msrb.mxu1 %v366_v40  ;;  %1710 = vmatpush.msrb.mxu3 %v1004_v41  ;;  %v918_v40 = vld [vmem:[%s4239_s19 + $0x15d8] sm:$0xff] }
  0x48   : > { %1759 = vmatpush.msra.mxu0 %v628_v42  ;;  %1741 = vmatpush.msra.mxu2 %v1323_v43  ;;  %v1382_v41 = vld [vmem:[%s4239_s19 + $0x2458] sm:$0x1f]  ;;  %v251_v42 = vld [vmem:[%s4239_s19 + $0x100] sm:$0xff]  ;;  %v484_v43 = vld [vmem:[%s4239_s19 + $0x848] sm:$0xff] }
  0x49   : > { %4123 = vset.pattern.permute.xlu0 %v4194_v49  ;;  %1569 = vmatmul.f32.gmra.mxu1 %v4383_v44 }
  0x4a   : > { %1691 = vmatpush.msrb.mxu1 %v337_v45  ;;  %1711 = vmatpush.msrb.mxu3 %v975_v46  ;;  %v889_v45 = vld [vmem:[%s4239_s19 + $0x14f0] sm:$0xff]  ;;  %v222_v46 = vld [vmem:[%s4239_s19 + $0x18] sm:$0xff] }
  0x4b   : > { %1760 = vmatpush.msra.mxu0 %v599_v47  ;;  %1413 = vperm.xlu0 %4123, %v1408_v48   ;;  %v455_v47 = vld [vmem:[%s4239_s19 + $0x760] sm:$0xff]  ;;  %v1353_v48 = vld [vmem:[%s4239_s19 + $0x2370] sm:$0xff] }
  0x4c   : > { %3972 = vmatmul.msk.f32.gmra.mxu2 %vm1426_vm1, %v4396_v50  ;;  %1692 = vmatpush.msrb.mxu1 %v308_v51  ;;  %v1122_v51 = vld [vmem:[%s4239_s19 + $0x1c38] sm:$0xff] }
  0x4d   : > { %1742 = vmatpush.msra.mxu2 %v1294_v52  ;;  %1712 = vmatpush.msrb.mxu3 %v946_v53  ;;  %v426_v52 = vld [vmem:[%s4239_s19 + $0x678] sm:$0xff]  ;;  %v831_v53 = vld [vmem:[%s4239_s19 + $0x1320] sm:$0xff] }
  0x4e   : > { %1761 = vmatpush.msra.mxu0 %v570_v54  ;;  %1693 = vmatpush.msrb.mxu1 %v279_v55  ;;  %v1324_v54 = vld [vmem:[%s4239_s19 + $0x2288] sm:$0xff]  ;;  %v1093_v55 = vld [vmem:[%s4239_s19 + $0x1b50] sm:$0xff] }
  0x4f   : > { %1743 = vmatpush.msra.mxu2 %v1265_v56  ;;  %1713 = vmatpush.msrb.mxu3 %v917_v57  ;;  %v397_v56 = vld [vmem:[%s4239_s19 + $0x590] sm:$0xff]  ;;  %v802_v57 = vld [vmem:[%s4239_s19 + $0x1238] sm:$0xff] }
  0x50   : > { %1762 = vmatpush.msra.mxu0 %v541_v58  ;;  %1621 = vmatmul.f32.gmra.mxu3 %v4372_v39  ;;  %v1295_v58 = vld [vmem:[%s4239_s19 + $0x21a0] sm:$0xff] }
  0x51   : > { %1744 = vmatpush.msra.mxu2 %v1236_v59  ;;  %1546 = vmatmul.f32.gmra.mxu0 %v4412_v60  ;;  %v1064_v59 = vld [vmem:[%s4239_s19 + $0x1a68] sm:$0xff] }
  0x52   : > { %1694 = vmatpush.msrb.mxu1 %v250_v61  ;;  %1714 = vmatpush.msrb.mxu3 %v888_v62  ;;  %v368_v61 = vld [vmem:[%s4239_s19 + $0x4a8] sm:$0xff]  ;;  %v773_v62 = vld [vmem:[%s4239_s19 + $0x1150] sm:$0xff] }
  0x53   : > { %1763 = vmatpush.msra.mxu0 %v512_v63  ;;  %1745 = vmatpush.msra.mxu2 %v1207_v0  ;;  %v1266_v63 = vld [vmem:[%s4239_s19 + $0x20b8] sm:$0xff]  ;;  %v1035_v0 = vld [vmem:[%s4239_s19 + $0x1980] sm:$0xff] }
  0x54   : > { %1572 = vmatmul.f32.gmra.mxu1 %v4423_v1  ;;  %1715 = vmatpush.msrb.mxu3 %v859_v2  ;;  %v339_v2 = vld [vmem:[%s4239_s19 + $0x3c0] sm:$0xff] }
  0x55   : > { %1695 = vmatpush.msrb.mxu1 %v221_v3  ;;  %1764 = vmatpush.msra.mxu0 %v483_v4  ;;  %v1237_v3 = vld [vmem:[%s4239_s19 + $0x1fd0] sm:$0xff]  ;;  %v744_v4 = vld [vmem:[%s4239_s19 + $0x1068] sm:$0xff] }
  0x56   : > { %1418 = vperm.xlu0 %4123, %v1409_v5   ;;  %1644 = vmatmul.f32.vlgmr.msrb.gmra.mxu2 %v4345_v24  ;;  %v1006_v5 = vld [vmem:[%s4239_s19 + $0x1898] sm:$0xff] }
  0x57   : > { %1746 = vmatpush.msra.mxu2 %v1178_v6  ;;  %1784 = vmatpush.msra.mxu1 %v1121_v7  ;;  %v310_v6 = vld [vmem:[%s4239_s19 + $0x2d8] sm:$0xff]  ;;  %v715_v7 = vld [vmem:[%s4239_s19 + $0xf80] sm:$0xff] }
  0x58   : > { %1716 = vmatpush.msrb.mxu3 %v830_v8  ;;  %1765 = vmatpush.msra.mxu0 %v454_v9  ;;  %v1208_v8 = vld [vmem:[%s4239_s19 + $0x1ee8] sm:$0xff]  ;;  %v977_v9 = vld [vmem:[%s4239_s19 + $0x17b0] sm:$0xff] }
  0x59   : > { %1747 = vmatpush.msra.mxu2 %v1149_v11  ;;  %1785 = vmatpush.msra.mxu1 %v1092_v12  ;;  %v281_v11 = vld [vmem:[%s4239_s19 + $0x1f0] sm:$0xff]  ;;  %v686_v12 = vld [vmem:[%s4239_s19 + $0xe98] sm:$0xff] }
  0x5a   : > { %1717 = vmatpush.msrb.mxu3 %v801_v13  ;;  %1766 = vmatpush.msra.mxu0 %v425_v14  ;;  %v1179_v13 = vld [vmem:[%s4239_s19 + $0x1e00] sm:$0xff]  ;;  %v948_v14 = vld [vmem:[%s4239_s19 + $0x16c8] sm:$0xff] }
  0x5b   : > { %1836 = vmatpush.msrb.mxu2 %v658_v15  ;;  %1624 = vmatmul.f32.gmra.mxu3 %v4412_v60  ;;  %v252_v15 = vld [vmem:[%s4239_s19 + $0x108] sm:$0xff] }
  0x5c   : > { %1786 = vmatpush.msra.mxu1 %v1063_v16  ;;  %1718 = vmatpush.msrb.mxu3 %v772_v17  ;;  %v659_v16 = vld [vmem:[%s4239_s19 + $0xdc0] sm:$0xff]  ;;  %v1150_v17 = vld [vmem:[%s4239_s19 + $0x1d18] sm:$0xff] }
  0x5d   : > { %1767 = vmatpush.msra.mxu0 %v396_v19  ;;  %1837 = vmatpush.msrb.mxu2 %v629_v20  ;;  %v919_v19 = vld [vmem:[%s4239_s19 + $0x15e0] sm:$0xff] }
  0x5e   : > { %1787 = vmatpush.msra.mxu1 %v1034_v21  ;;  %4124 = vset.pattern.permute.xlu1 %v4194_v49  ;;  %v860_v49 = vld [vmem:[%s4239_s19 + $0x1408] sm:$0xff]  ;;  %v223_v20 = vld [vmem:[%s4239_s19 + $0x20] sm:$0xff] }
  0x5f   : > { %1719 = vmatpush.msrb.mxu3 %v743_v22  ;;  %1768 = vmatpush.msra.mxu0 %v367_v23  ;;  %v1383_v21 = vld [vmem:[%s4239_s19 + $0x2460] sm:$0x1f]  ;;  %v630_v22 = vld [vmem:[%s4239_s19 + $0xcd8] sm:$0xff] }
  0x60   : > { %1838 = vmatpush.msrb.mxu2 %v600_v25  ;;  %1423 = vperm.xlu1 %4124, %v1410_v26   ;;  %v890_v23 = vld [vmem:[%s4239_s19 + $0x14f8] sm:$0xff]  ;;  %v1123_v25 = vld [vmem:[%s4239_s19 + $0x1c40] sm:$0xff] }
  0x61   : > { %1647 = vmatmul.f32.gmra.mxu2 %v4383_v44  ;;  %3974 = vmatmul.msk.f32.vlgmr.msrb.gmra.mxu0 %vm1426_vm1, %v4320_v10  ;;  %v1354_v26 = vld [vmem:[%s4239_s19 + $0x2378] sm:$0xff] }
  0x62   : > { %1788 = vmatpush.msra.mxu1 %v1005_v27  ;;  %1720 = vmatpush.msrb.mxu3 %v714_v29  ;;  %v601_v27 = vld [vmem:[%s4239_s19 + $0xbf0] sm:$0xff] }
  0x63   : > { %1769 = vmatpush.msra.mxu0 %v338_v30  ;;  %1839 = vmatpush.msrb.mxu2 %v571_v31  ;;  %v861_v29 = vld [vmem:[%s4239_s19 + $0x1410] sm:$0xff]  ;;  %v1094_v30 = vld [vmem:[%s4239_s19 + $0x1b58] sm:$0xff] }
  0x64   : > { %1789 = vmatpush.msra.mxu1 %v976_v32  ;;  %1721 = vmatpush.msrb.mxu3 %v685_v33  ;;  %v1325_v31 = vld [vmem:[%s4239_s19 + $0x2290] sm:$0xff]  ;;  %v572_v32 = vld [vmem:[%s4239_s19 + $0xb08] sm:$0xff] }
  0x65   : > { %1770 = vmatpush.msra.mxu0 %v309_v34  ;;  %1840 = vmatpush.msrb.mxu2 %v542_v35  ;;  %v832_v33 = vld [vmem:[%s4239_s19 + $0x1328] sm:$0xff]  ;;  %v1065_v34 = vld [vmem:[%s4239_s19 + $0x1a70] sm:$0xff] }
  0x66   : > { %1722 = vmatmul.f32.vlgmr.msrb.gmra.mxu3 %v4345_v24  ;;  %1790 = vmatpush.msra.mxu1 %v947_v36  ;;  %v1296_v35 = vld [vmem:[%s4239_s19 + $0x21a8] sm:$0xff]  ;;  %v543_v36 = vld [vmem:[%s4239_s19 + $0xa20] sm:$0xff] }
  0x67   : > { %1771 = vmatpush.msra.mxu0 %v280_v37  ;;  %1841 = vmatpush.msrb.mxu2 %v513_v38  ;;  %v803_v37 = vld [vmem:[%s4239_s19 + $0x1240] sm:$0xff]  ;;  %v1036_v38 = vld [vmem:[%s4239_s19 + $0x1988] sm:$0xff] }
  0x68   : > { %1791 = vmatpush.msra.mxu1 %v918_v40  ;;  %3981 = vmatpush.msk.msra.mxu3 %vm1436_vm0, %v1382_v41  ;;  %v1267_v40 = vld [vmem:[%s4239_s19 + $0x20c0] sm:$0xff]  ;;  %v514_v41 = vld [vmem:[%s4239_s19 + $0x938] sm:$0xff] }
  0x69   : > { %1772 = vmatpush.msra.mxu0 %v251_v42  ;;  %1842 = vmatpush.msrb.mxu2 %v484_v43  ;;  %v774_v42 = vld [vmem:[%s4239_s19 + $0x1158] sm:$0xff]  ;;  %v1007_v43 = vld [vmem:[%s4239_s19 + $0x18a0] sm:$0xff] }
  0x6a   : > { %1650 = vmatmul.f32.gmra.mxu2 %v4423_v1  ;;  %3975 = vmatmul.msk.f32.gmra.mxu0 %vm1426_vm1, %v4353_v28 }
  0x6b   : > { %1792 = vmatpush.msra.mxu1 %v889_v45  ;;  %1773 = vmatpush.msra.mxu0 %v222_v46  ;;  %v1238_v45 = vld [vmem:[%s4239_s19 + $0x1fd8] sm:$0xff]  ;;  %v485_v46 = vld [vmem:[%s4239_s19 + $0x850] sm:$0xff] }
  0x6c   : > { %1843 = vmatpush.msrb.mxu2 %v455_v47  ;;  %1818 = vmatpush.msra.mxu3 %v1353_v48  ;;  %v745_v47 = vld [vmem:[%s4239_s19 + $0x1070] sm:$0xff]  ;;  %v978_v48 = vld [vmem:[%s4239_s19 + $0x17b8] sm:$0xff] }
  0x6d   : > { %1793 = vmatpush.msra.mxu1 %v860_v49  ;;  %1862 = vmatpush.msrb.mxu0 %v1122_v51  ;;  %v1209_v49 = vld [vmem:[%s4239_s19 + $0x1ef0] sm:$0xff]  ;;  %v456_v51 = vld [vmem:[%s4239_s19 + $0x768] sm:$0xff] }
  0x6e   : > { %1844 = vmatpush.msrb.mxu2 %v426_v52  ;;  %1725 = vmatmul.f32.gmra.mxu3 %v4383_v44  ;;  %v716_v52 = vld [vmem:[%s4239_s19 + $0xf88] sm:$0xff] }
  0x6f   : > { %1794 = vmatpush.msra.mxu1 %v831_v53  ;;  %1819 = vmatpush.msra.mxu3 %v1324_v54  ;;  %v949_v53 = vld [vmem:[%s4239_s19 + $0x16d0] sm:$0xff]  ;;  %v1180_v54 = vld [vmem:[%s4239_s19 + $0x1e08] sm:$0xff] }
  0x70   : > { %1863 = vmatpush.msrb.mxu0 %v1093_v55  ;;  %1845 = vmatpush.msrb.mxu2 %v397_v56  ;;  %v427_v55 = vld [vmem:[%s4239_s19 + $0x680] sm:$0xff]  ;;  %v920_v56 = vld [vmem:[%s4239_s19 + $0x15e8] sm:$0xff] }
  0x71   : > { %1795 = vmatpush.msra.mxu1 %v802_v57  ;;  %1820 = vmatpush.msra.mxu3 %v1295_v58  ;;  %v687_v57 = vld [vmem:[%s4239_s19 + $0xea0] sm:$0xff] }
  0x72   : > { %1864 = vmatpush.msrb.mxu0 %v1064_v59  ;;  %1846 = vmatpush.msrb.mxu2 %v368_v61  ;;  %v1151_v58 = vld [vmem:[%s4239_s19 + $0x1d20] sm:$0xff]  ;;  %v398_v59 = vld [vmem:[%s4239_s19 + $0x598] sm:$0xff]  ;;  %v660_v61 = vld [vmem:[%s4239_s19 + $0xdc8] sm:$0xff] }
  0x73   : > { %3976 = vmatmul.msk.f32.gmra.mxu0 %vm1426_vm1, %v4396_v50  ;;  %3978 = vmatmul.msk.f32.vlgmr.msra.gmra.mxu2 %vm1426_vm1, %v4320_v10 }
  0x74   : > { %1796 = vmatpush.msra.mxu1 %v773_v62  ;;  %1821 = vmatpush.msra.mxu3 %v1266_v63  ;;  %v891_v62 = vld [vmem:[%s4239_s19 + $0x1500] sm:$0xff]  ;;  %v1384_v63 = vld [vmem:[%s4239_s19 + $0x2468] sm:$0x1f] }
  0x75   : > { %1865 = vmatpush.msrb.mxu0 %v1035_v0  ;;  %1847 = vmatpush.msrb.mxu2 %v339_v2  ;;  %v369_v0 = vld [vmem:[%s4239_s19 + $0x4b0] sm:$0xff]  ;;  %v631_v2 = vld [vmem:[%s4239_s19 + $0xce0] sm:$0xff] }
  0x76   : > { %1696 = vmatmul.f32.vlgmr.msrb.gmra.mxu1 %v4334_v18  ;;  %1822 = vmatpush.msra.mxu3 %v1237_v3  ;;  %v862_v3 = vld [vmem:[%s4239_s19 + $0x1418] sm:$0xff] }
  0x77   : > { %1797 = vmatpush.msra.mxu1 %v744_v4  ;;  %1866 = vmatpush.msrb.mxu0 %v1006_v5  ;;  %v1355_v4 = vld [vmem:[%s4239_s19 + $0x2380] sm:$0xff]  ;;  %v340_v5 = vld [vmem:[%s4239_s19 + $0x3c8] sm:$0xff] }
  0x78   : > { %1848 = vmatpush.msrb.mxu2 %v310_v6  ;;  %1728 = vmatmul.f32.gmra.mxu3 %v4423_v1  ;;  %v602_v6 = vld [vmem:[%s4239_s19 + $0xbf8] sm:$0xff] }
  0x79   : > { %1798 = vmatpush.msra.mxu1 %v715_v7  ;;  %1823 = vmatpush.msra.mxu3 %v1208_v8  ;;  %v833_v7 = vld [vmem:[%s4239_s19 + $0x1330] sm:$0xff]  ;;  %v1326_v8 = vld [vmem:[%s4239_s19 + $0x2298] sm:$0xff] }
  0x7a   : > { %1867 = vmatpush.msrb.mxu0 %v977_v9  ;;  %1849 = vmatpush.msrb.mxu2 %v281_v11  ;;  %v311_v9 = vld [vmem:[%s4239_s19 + $0x2e0] sm:$0xff]  ;;  %v573_v11 = vld [vmem:[%s4239_s19 + $0xb10] sm:$0xff] }
  0x7b   : > { %1799 = vmatpush.msra.mxu1 %v686_v12  ;;  %1824 = vmatpush.msra.mxu3 %v1179_v13  ;;  %v804_v12 = vld [vmem:[%s4239_s19 + $0x1248] sm:$0xff]  ;;  %v1297_v13 = vld [vmem:[%s4239_s19 + $0x21b0] sm:$0xff] }
  0x7c   : > { %1868 = vmatpush.msrb.mxu0 %v948_v14  ;;  %1850 = vmatpush.msrb.mxu2 %v252_v15  ;;  %v282_v14 = vld [vmem:[%s4239_s19 + $0x1f8] sm:$0xff]  ;;  %v544_v15 = vld [vmem:[%s4239_s19 + $0xa28] sm:$0xff] }
  0x7d   : > { %1914 = vmatpush.msrb.mxu1 %v659_v16  ;;  %3979 = vmatmul.msk.f32.gmra.mxu2 %vm1426_vm1, %v4353_v28  ;;  %v775_v16 = vld [vmem:[%s4239_s19 + $0x1160] sm:$0xff] }
  0x7e   : > { %1825 = vmatpush.msra.mxu3 %v1150_v17  ;;  %1869 = vmatpush.msrb.mxu0 %v919_v19  ;;  %v1268_v17 = vld [vmem:[%s4239_s19 + $0x20c8] sm:$0xff]  ;;  %v253_v19 = vld [vmem:[%s4239_s19 + $0x110] sm:$0xff] }
  0x7f   : > { %1851 = vmatpush.msrb.mxu2 %v223_v20  ;;  %1915 = vmatpush.msrb.mxu1 %v630_v22  ;;  %v515_v20 = vld [vmem:[%s4239_s19 + $0x940] sm:$0xff] }
  0x80   : > { %3985 = vmatpush.msk.msrb.mxu3 %vm1436_vm0, %v1383_v21  ;;  %1870 = vmatpush.msrb.mxu0 %v890_v23  ;;  %v746_v21 = vld [vmem:[%s4239_s19 + $0x1078] sm:$0xff]  ;;  %v1239_v22 = vld [vmem:[%s4239_s19 + $0x1fe0] sm:$0xff]  ;;  %v224_v23 = vld [vmem:[%s4239_s19 + $0x28] sm:$0xff] }
  0x81   : > { %1699 = vmatmul.f32.gmra.mxu1 %v4372_v39  ;;  %1940 = vmatpush.msra.mxu2 %v1123_v25  ;;  %v486_v25 = vld [vmem:[%s4239_s19 + $0x858] sm:$0xff] }
  0x82   : > { %1896 = vmatpush.msrb.mxu3 %v1354_v26  ;;  %1916 = vmatpush.msrb.mxu1 %v601_v27  ;;  %v717_v26 = vld [vmem:[%s4239_s19 + $0xf90] sm:$0xff]  ;;  %v1210_v27 = vld [vmem:[%s4239_s19 + $0x1ef8] sm:$0xff] }
  0x83   : > { %3982 = vmatmul.msk.f32.vlgmr.msra.gmra.mxu3 %vm1426_vm1, %v4320_v10  ;;  %1871 = vmatpush.msrb.mxu0 %v861_v29  ;;  %v1124_v29 = vld [vmem:[%s4239_s19 + $0x1c48] sm:$0xff] }
  0x84   : > { %1941 = vmatpush.msra.mxu2 %v1094_v30  ;;  %1897 = vmatpush.msrb.mxu3 %v1325_v31  ;;  %v457_v30 = vld [vmem:[%s4239_s19 + $0x770] sm:$0xff]  ;;  %v688_v31 = vld [vmem:[%s4239_s19 + $0xea8] sm:$0xff] }
  0x85   : > { %1917 = vmatpush.msrb.mxu1 %v572_v32  ;;  %1872 = vmatpush.msrb.mxu0 %v832_v33  ;;  %v1181_v32 = vld [vmem:[%s4239_s19 + $0x1e10] sm:$0xff]  ;;  %v428_v33 = vld [vmem:[%s4239_s19 + $0x688] sm:$0xff] }
  0x86   : > { %1942 = vmatpush.msra.mxu2 %v1065_v34  ;;  %1898 = vmatpush.msrb.mxu3 %v1296_v35  ;;  %v661_v34 = vld [vmem:[%s4239_s19 + $0xdd0] sm:$0xff]  ;;  %v1152_v35 = vld [vmem:[%s4239_s19 + $0x1d28] sm:$0xff] }
  0x87   : > { %1918 = vmatpush.msrb.mxu1 %v543_v36  ;;  %3980 = vmatmul.msk.f32.gmra.mxu2 %vm1426_vm1, %v4396_v50  ;;  %v1066_v36 = vld [vmem:[%s4239_s19 + $0x1a78] sm:$0xff] }
  0x88   : > { %1873 = vmatpush.msrb.mxu0 %v803_v37  ;;  %1943 = vmatpush.msra.mxu2 %v1036_v38  ;;  %v399_v37 = vld [vmem:[%s4239_s19 + $0x5a0] sm:$0xff]  ;;  %v1385_v38 = vld [vmem:[%s4239_s19 + $0x2470] sm:$0x1f] }
  0x89   : > { %1899 = vmatpush.msrb.mxu3 %v1267_v40  ;;  %1919 = vmatpush.msrb.mxu1 %v514_v41  ;;  %v632_v40 = vld [vmem:[%s4239_s19 + $0xce8] sm:$0xff]  ;;  %v1037_v41 = vld [vmem:[%s4239_s19 + $0x1990] sm:$0xff] }
  0x8a   : > { %1702 = vmatmul.f32.gmra.mxu1 %v4412_v60  ;;  %1874 = vmatpush.msrb.mxu0 %v774_v42  ;;  %v370_v42 = vld [vmem:[%s4239_s19 + $0x4b8] sm:$0xff] }
  0x8b   : > { %1944 = vmatpush.msra.mxu2 %v1007_v43  ;;  %1900 = vmatpush.msrb.mxu3 %v1238_v45  ;;  %v1356_v43 = vld [vmem:[%s4239_s19 + $0x2388] sm:$0xff]  ;;  %v603_v45 = vld [vmem:[%s4239_s19 + $0xc00] sm:$0xff] }
  0x8c   : > { %1920 = vmatpush.msrb.mxu1 %v485_v46  ;;  %3983 = vmatmul.msk.f32.gmra.mxu3 %vm1426_vm1, %v4353_v28  ;;  %v1008_v46 = vld [vmem:[%s4239_s19 + $0x18a8] sm:$0xff] }
  0x8d   : > { %1875 = vmatpush.msrb.mxu0 %v745_v47  ;;  %1945 = vmatpush.msra.mxu2 %v978_v48  ;;  %v341_v47 = vld [vmem:[%s4239_s19 + $0x3d0] sm:$0xff]  ;;  %v1327_v48 = vld [vmem:[%s4239_s19 + $0x22a0] sm:$0xff] }
  0x8e   : > { %1901 = vmatpush.msrb.mxu3 %v1209_v49  ;;  %1921 = vmatpush.msrb.mxu1 %v456_v51  ;;  %v574_v49 = vld [vmem:[%s4239_s19 + $0xb18] sm:$0xff]  ;;  %v979_v51 = vld [vmem:[%s4239_s19 + $0x17c0] sm:$0xff] }
  0x8f   : > { %1876 = vmatpush.msrb.mxu0 %v716_v52  ;;  %1946 = vmatpush.msra.mxu2 %v949_v53  ;;  %v312_v52 = vld [vmem:[%s4239_s19 + $0x2e8] sm:$0xff]  ;;  %v1298_v53 = vld [vmem:[%s4239_s19 + $0x21b8] sm:$0xff] }
  0x90   : > { %1902 = vmatpush.msrb.mxu3 %v1180_v54  ;;  %1922 = vmatpush.msrb.mxu1 %v427_v55  ;;  %v950_v54 = vld [vmem:[%s4239_s19 + $0x16d8] sm:$0xff]  ;;  %v283_v55 = vld [vmem:[%s4239_s19 + $0x200] sm:$0xff] }
  0x91   : > { %1774 = vmatmul.f32.vlgmr.msra.gmra.mxu0 %v4334_v18  ;;  %1947 = vmatpush.msra.mxu2 %v920_v56  ;;  %v1269_v56 = vld [vmem:[%s4239_s19 + $0x20d0] sm:$0xff] }
  0x92   : > { %1877 = vmatpush.msrb.mxu0 %v687_v57  ;;  %1903 = vmatpush.msrb.mxu3 %v1151_v58  ;;  %v516_v57 = vld [vmem:[%s4239_s19 + $0x948] sm:$0xff]  ;;  %v921_v58 = vld [vmem:[%s4239_s19 + $0x15f0] sm:$0xff] }
  0x93   : > { %1923 = vmatpush.msrb.mxu1 %v398_v59  ;;  %1948 = vmatpush.msra.mxu2 %v891_v62  ;;  %v254_v59 = vld [vmem:[%s4239_s19 + $0x118] sm:$0xff]  ;;  %v487_v62 = vld [vmem:[%s4239_s19 + $0x860] sm:$0xff] }
  0x94   : > { %1992 = vmatpush.msra.mxu0 %v660_v61  ;;  %1800 = vmatmul.f32.vlgmr.msra.gmra.mxu1 %v4345_v24  ;;  %v1240_v61 = vld [vmem:[%s4239_s19 + $0x1fe8] sm:$0xff] }
  0x95   : > { %3989 = vmatpush.msk.msra.mxu3 %vm1436_vm0, %v1384_v63  ;;  %1924 = vmatpush.msrb.mxu1 %v369_v0  ;;  %v892_v63 = vld [vmem:[%s4239_s19 + $0x1508] sm:$0xff]  ;;  %v225_v0 = vld [vmem:[%s4239_s19 + $0x30] sm:$0xff] }
  0x96   : > { %1993 = vmatpush.msra.mxu0 %v631_v2  ;;  %3984 = vmatmul.msk.f32.gmra.mxu3 %vm1426_vm1, %v4396_v50  ;;  %v1211_v2 = vld [vmem:[%s4239_s19 + $0x1f00] sm:$0xff] }
  0x97   : > { %1949 = vmatpush.msra.mxu2 %v862_v3  ;;  %1974 = vmatpush.msra.mxu3 %v1355_v4  ;;  %v458_v3 = vld [vmem:[%s4239_s19 + $0x778] sm:$0xff]  ;;  %v863_v4 = vld [vmem:[%s4239_s19 + $0x1420] sm:$0xff] }
  0x98   : > { %1925 = vmatpush.msrb.mxu1 %v340_v5  ;;  %1994 = vmatpush.msra.mxu0 %v602_v6  ;;  %v1125_v5 = vld [vmem:[%s4239_s19 + $0x1c50] sm:$0xff] }
  0x99   : > { %1950 = vmatpush.msra.mxu2 %v833_v7  ;;  %1975 = vmatpush.msra.mxu3 %v1326_v8  ;;  %v429_v6 = vld [vmem:[%s4239_s19 + $0x690] sm:$0xff]  ;;  %v1096_v7 = vld [vmem:[%s4239_s19 + $0x1b68] sm:$0xff]  ;;  %v834_v8 = vld [vmem:[%s4239_s19 + $0x1338] sm:$0xff] }
  0x9a   : > { %1926 = vmatpush.msrb.mxu1 %v311_v9  ;;  %1995 = vmatpush.msra.mxu0 %v573_v11  ;;  %v1153_v9 = vld [vmem:[%s4239_s19 + $0x1d30] sm:$0xff]  ;;  %v400_v11 = vld [vmem:[%s4239_s19 + $0x5a8] sm:$0xff] }
  0x9b   : > { %1777 = vmatmul.f32.gmra.mxu0 %v4372_v39  ;;  %1951 = vmatpush.msra.mxu2 %v804_v12 }
  0x9c   : > { %1976 = vmatpush.msra.mxu3 %v1297_v13  ;;  %1927 = vmatpush.msrb.mxu1 %v282_v14  ;;  %v805_v14 = vld [vmem:[%s4239_s19 + $0x1250] sm:$0xff] }
  0x9d   : > { %1996 = vmatpush.msra.mxu0 %v544_v15  ;;  %1803 = vmatmul.f32.gmra.mxu1 %v4383_v44  ;;  %v1067_v15 = vld [vmem:[%s4239_s19 + $0x1a80] sm:$0xff] }
  0x9e   : > { %1952 = vmatpush.msra.mxu2 %v775_v16  ;;  %1977 = vmatpush.msra.mxu3 %v1268_v17  ;;  %v662_v16 = vld [vmem:[%s4239_s19 + $0xdd8] sm:$0xff] }
  0x9f   : > { %1928 = vmatpush.msrb.mxu1 %v253_v19  ;;  %1997 = vmatpush.msra.mxu0 %v515_v20  ;;  %v4667_v20 = vld [vmem:[%s6295_s0 + $0x10] sm:$0xff] }
  0xa0   : > { %1852 = vmatmul.f32.vlgmr.msrb.gmra.mxu2 %v4334_v18  ;;  %3986 = vmatmul.msk.f32.vlgmr.msrb.gmra.mxu3 %vm1426_vm1, %v4320_v10  ;;  %v1095_v10 = vld [vmem:[%s4239_s19 + $0x1b60] sm:$0xff] }
  0xa1   : > { %1953 = vmatpush.msra.mxu2 %v746_v21  ;;  %1978 = vmatpush.msra.mxu3 %v1239_v22  ;;  %v776_v21 = vld [vmem:[%s4239_s19 + $0x1168] sm:$0xff] }
  0xa2   : > { %1929 = vmatpush.msrb.mxu1 %v224_v23  ;;  %1998 = vmatpush.msra.mxu0 %v486_v25  ;;  %v1038_v23 = vld [vmem:[%s4239_s19 + $0x1998] sm:$0xff]  ;;  %v633_v25 = vld [vmem:[%s4239_s19 + $0xcf0] sm:$0xff] }
  0xa3   : > { %1954 = vmatpush.msra.mxu2 %v717_v26  ;;  %1979 = vmatpush.msra.mxu3 %v1210_v27  ;;  %v342_v26 = vld [vmem:[%s4239_s19 + $0x3d8] sm:$0xff]  ;;  %v747_v27 = vld [vmem:[%s4239_s19 + $0x1080] sm:$0xff] }
  0xa4   : > { %2018 = vmatpush.msra.mxu1 %v1124_v29  ;;  %1999 = vmatpush.msra.mxu0 %v457_v30  ;;  %v1009_v30 = vld [vmem:[%s4239_s19 + $0x18b0] sm:$0xff] }
  0xa5   : > { %1780 = vmatmul.f32.gmra.mxu0 %v4412_v60  ;;  %1955 = vmatpush.msra.mxu2 %v688_v31  ;;  %v604_v31 = vld [vmem:[%s4239_s19 + $0xc08] sm:$0xff] }
  0xa6   : > { %1980 = vmatpush.msra.mxu3 %v1181_v32  ;;  %2019 = vmatpush.msra.mxu1 %v1095_v10  ;;  %v980_v10 = vld [vmem:[%s4239_s19 + $0x17c8] sm:$0xff] }
  0xa7   : > { %2000 = vmatpush.msra.mxu0 %v428_v33  ;;  %2070 = vmatpush.msrb.mxu2 %v661_v34  ;;  %v718_v33 = vld [vmem:[%s4239_s19 + $0xf98] sm:$0xff]  ;;  %v575_v34 = vld [vmem:[%s4239_s19 + $0xb20] sm:$0xff] }
  0xa8   : > { %1806 = vmatmul.f32.gmra.mxu1 %v4423_v1  ;;  %1981 = vmatpush.msra.mxu3 %v1152_v35  ;;  %v284_v35 = vld [vmem:[%s4239_s19 + $0x208] sm:$0xff] }
  0xa9   : > { %2020 = vmatpush.msra.mxu1 %v1066_v36  ;;  %2001 = vmatpush.msra.mxu0 %v399_v37  ;;  %v689_v37 = vld [vmem:[%s4239_s19 + $0xeb0] sm:$0xff] }
  0xaa   : > { %3993 = vmatpush.msk.msrb.mxu3 %vm1436_vm0, %v1385_v38  ;;  %2071 = vmatpush.msrb.mxu2 %v632_v40  ;;  %v951_v40 = vld [vmem:[%s4239_s19 + $0x16e0] sm:$0xff] }
  0xab   : > { %1855 = vmatmul.f32.gmra.mxu2 %v4372_v39  ;;  %3987 = vmatmul.msk.f32.gmra.mxu3 %vm1426_vm1, %v4353_v28  ;;  %v545_v28 = vld [vmem:[%s4239_s19 + $0xa30] sm:$0xff] }
  0xac   : > { %2021 = vmatpush.msra.mxu1 %v1037_v41  ;;  %2002 = vmatpush.msra.mxu0 %v370_v42  ;;  %v546_v41 = vld [vmem:[%s4239_s19 + $0xa38] sm:$0xff]  ;;  %v4700_v42 = vld [vmem:[%s6295_s0 + $0x28] sm:$0xff] }
  0xad   : > { %2052 = vmatpush.msrb.mxu3 %v1356_v43  ;;  %2072 = vmatpush.msrb.mxu2 %v603_v45  ;;  %v1386_v43 = vld [vmem:[%s4239_s19 + $0x2478] sm:$0x1f] }
  0xae   : > { %2022 = vmatpush.msra.mxu1 %v1008_v46  ;;  %2003 = vmatpush.msra.mxu0 %v341_v47  ;;  %v922_v47 = vld [vmem:[%s4239_s19 + $0x15f8] sm:$0xff] }
  0xaf   : > { %2053 = vmatpush.msrb.mxu3 %v1327_v48  ;;  %2073 = vmatpush.msrb.mxu2 %v574_v49  ;;  %v517_v48 = vld [vmem:[%s4239_s19 + $0x950] sm:$0xff] }
  0xb0   : > { %2023 = vmatpush.msra.mxu1 %v979_v51  ;;  %1878 = vmatmul.f32.vlgmr.msrb.gmra.mxu0 %v4345_v24  ;;  %v226_v51 = vld [vmem:[%s4239_s19 + $0x38] sm:$0xff] }
  0xb1   : > { %2004 = vmatpush.msra.mxu0 %v312_v52  ;;  %2054 = vmatpush.msrb.mxu3 %v1298_v53  ;;  %v1357_v52 = vld [vmem:[%s4239_s19 + $0x2390] sm:$0xff] }
  0xb2   : > { %2074 = vmatpush.msrb.mxu2 %v545_v28  ;;  %2024 = vmatpush.msra.mxu1 %v950_v54  ;;  %v893_v53 = vld [vmem:[%s4239_s19 + $0x1510] sm:$0xff]  ;;  %v488_v28 = vld [vmem:[%s4239_s19 + $0x868] sm:$0xff]  ;;  %v1126_v54 = vld [vmem:[%s4239_s19 + $0x1c58] sm:$0xff] }
  0xb3   : > { %2005 = vmatpush.msra.mxu0 %v283_v55  ;;  %2055 = vmatpush.msrb.mxu3 %v1269_v56  ;;  %v1328_v55 = vld [vmem:[%s4239_s19 + $0x22a8] sm:$0xff] }
  0xb4   : > { %2075 = vmatpush.msrb.mxu2 %v516_v57  ;;  %3988 = vmatmul.msk.f32.gmra.mxu3 %vm1426_vm1, %v4396_v50  ;;  %v1182_v50 = vld [vmem:[%s4239_s19 + $0x1e18] sm:$0xff]  ;;  %v864_v56 = vld [vmem:[%s4239_s19 + $0x1428] sm:$0xff] }
  0xb5   : > { %1858 = vmatmul.f32.gmra.mxu2 %v4412_v60  ;;  %2025 = vmatpush.msra.mxu1 %v921_v58 }
  0xb6   : > { %2006 = vmatpush.msra.mxu0 %v254_v59  ;;  %2056 = vmatpush.msrb.mxu3 %v1240_v61  ;;  %v459_v59 = vld [vmem:[%s4239_s19 + $0x780] sm:$0xff]  ;;  %v1097_v61 = vld [vmem:[%s4239_s19 + $0x1b70] sm:$0xff] }
  0xb7   : > { %2076 = vmatpush.msrb.mxu2 %v487_v62  ;;  %2026 = vmatpush.msra.mxu1 %v892_v63  ;;  %v1299_v62 = vld [vmem:[%s4239_s19 + $0x21c0] sm:$0xff] }
  0xb8   : > { %2007 = vmatpush.msra.mxu0 %v225_v0  ;;  %2057 = vmatpush.msrb.mxu3 %v1211_v2  ;;  %v835_v0 = vld [vmem:[%s4239_s19 + $0x1340] sm:$0xff] }
  0xb9   : > { %2077 = vmatpush.msrb.mxu2 %v458_v3  ;;  %2027 = vmatpush.msra.mxu1 %v863_v4  ;;  %v1541_v12 = vpop.f32.mrf.mxu0  ;;  %v1593_v13 = vpop.f32.mrf.mxu2  ;;  %v430_v3 = vld [vmem:[%s4239_s19 + $0x698] sm:$0xff]  ;;  %v1068_v4 = vld [vmem:[%s4239_s19 + $0x1a88] sm:$0xff] }
  0xba   : > { %2096 = vmatpush.msrb.mxu0 %v1125_v5  ;;  %2058 = vmatpush.msrb.mxu3 %v1182_v50  ;;  %v1567_v19 = vpop.f32.mrf.mxu1  ;;  %v1270_v5 = vld [vmem:[%s4239_s19 + $0x20d8] sm:$0xff] }
  0xbb   : > { %2078 = vmatpush.msrb.mxu2 %v429_v6  ;;  %1881 = vmatmul.f32.gmra.mxu0 %v4383_v44  ;;  %v806_v50 = vld [vmem:[%s4239_s19 + $0x1258] sm:$0xff] }
  0xbc   : > { %1930 = vmatmul.f32.vlgmr.msrb.gmra.mxu1 %v4334_v18  ;;  %2097 = vmatpush.msrb.mxu0 %v1096_v7  ;;  %v371_v18 = vld [vmem:[%s4239_s19 + $0x4c0] sm:$0xff] }
  0xbd   : > { %2028 = vmatpush.msra.mxu1 %v834_v8  ;;  %2059 = vmatpush.msrb.mxu3 %v1153_v9  ;;  %v4661_v17 = vpop.permute.xlu0 %1413  ;;  %v4736_v7 = vld [vmem:[%s6295_s0 + $0x40] sm:$0x7]  ;;  %v401_v8 = vld [vmem:[%s4239_s19 + $0x5b0] sm:$0xff] }
  0xbe   : > { %2079 = vmatpush.msrb.mxu2 %v400_v11  ;;  %3990 = vmatmul.msk.f32.vlgmr.msra.gmra.mxu3 %vm1426_vm1, %v4667_v20  ;;  %v1542_v22 = vadd.f32 %v1541_v12, %v4661_v17  ;;  %v1241_v11 = vld [vmem:[%s4239_s19 + $0x1ff0] sm:$0xff] }
  0xbf   : > { %1956 = vmatmul.f32.vlgmr.msra.gmra.mxu2 %v4345_v24  ;;  %2029 = vmatpush.msra.mxu1 %v805_v14  ;;  %v313_v24 = vld [vmem:[%s4239_s19 + $0x2f0] sm:$0xff] }
  0xc0   : > { %2098 = vmatpush.msrb.mxu0 %v1067_v15  ;;  %2148 = vmatpush.msra.mxu3 %v662_v16  ;;  %v1568_v29 = vadd.f32 %v1567_v19, %v1542_v22  ;;  %v777_v12 = vld [vmem:[%s4239_s19 + $0x1170] sm:$0xff]  ;;  %v1010_v15 = vld [vmem:[%s4239_s19 + $0x18b8] sm:$0xff]  ;;  %v1212_v16 = vld [vmem:[%s4239_s19 + $0x1f08] sm:$0xff] }
  0xc1   : > { %2080 = vmatpush.msrb.mxu2 %v371_v18  ;;  %2030 = vmatpush.msra.mxu1 %v776_v21  ;;  %v4751_v19 = vld [vmem:[%s6295_s0] sm:$0xff]  ;;  %v748_v18 = vld [vmem:[%s4239_s19 + $0x1088] sm:$0xff] }
  0xc2   : > { %2099 = vmatpush.msrb.mxu0 %v1038_v23  ;;  %2149 = vmatpush.msra.mxu3 %v633_v25  ;;  %v1594_v32 = vadd.f32 %v1593_v13, %v1568_v29  ;;  %v372_v13 = vld [vmem:[%s4239_s19 + $0x4c8] sm:$0xff]  ;;  %v343_v25 = vld [vmem:[%s4239_s19 + $0x3e0] sm:$0xff] }
  0xc3   : > { %2081 = vmatpush.msrb.mxu2 %v342_v26  ;;  %2031 = vmatpush.msra.mxu1 %v747_v27  ;;  %v1596_v36 = vpop.f32.mrf.mxu2  ;;  %v1544_v38 = vpop.f32.mrf.mxu0  ;;  %v981_v26 = vld [vmem:[%s4239_s19 + $0x17d0] sm:$0xff]  ;;  %v1183_v27 = vld [vmem:[%s4239_s19 + $0x1e20] sm:$0xff] }
  0xc4   : > { %2100 = vmatpush.msrb.mxu0 %v1009_v30  ;;  %2150 = vmatpush.msra.mxu3 %v604_v31  ;;  %3786 = vst [vmem:[%s4684_s26] sm:$0xff] %v1594_v32  ;;  %v4763_v30 = vld [vmem:[%s6295_s0 + $0x8] sm:$0xff]  ;;  %v719_v31 = vld [vmem:[%s4239_s19 + $0xfa0] sm:$0xff] }
  0xc5   : > { %2082 = vmatpush.msrb.mxu2 %v313_v24  ;;  %1884 = vmatmul.f32.gmra.mxu0 %v4423_v1  ;;  %v314_v24 = vld [vmem:[%s4239_s19 + $0x2f8] sm:$0xff]  ;;  %v952_v32 = vld [vmem:[%s4239_s19 + $0x16e8] sm:$0xff] }
  0xc6   : > { %1933 = vmatmul.f32.gmra.mxu1 %v4372_v39  ;;  %2101 = vmatpush.msrb.mxu0 %v980_v10  ;;  %v255_v39 = vld [vmem:[%s4239_s19 + $0x120] sm:$0xff]  ;;  %v1570_v46 = vpop.f32.mrf.mxu1  ;;  %v1154_v10 = vld [vmem:[%s4239_s19 + $0x1d38] sm:$0xff] }
  0xc7   : > { %2032 = vmatpush.msra.mxu1 %v718_v33  ;;  %2151 = vmatpush.msra.mxu3 %v575_v34  ;;  %v690_v34 = vld [vmem:[%s4239_s19 + $0xeb8] sm:$0xff] }
  0xc8   : > { %2083 = vmatpush.msrb.mxu2 %v284_v35  ;;  %3991 = vmatmul.msk.f32.gmra.mxu3 %vm1426_vm1, %v4700_v42  ;;  %v4706_v45 = vpop.permute.xlu0 %1418  ;;  %v1619_v58 = vpop.f32.mrf.mxu3  ;;  %v285_v35 = vld [vmem:[%s4239_s19 + $0x210] sm:$0xff] }
  0xc9   : > { %1959 = vmatmul.f32.gmra.mxu2 %v4383_v44  ;;  %2033 = vmatpush.msra.mxu1 %v689_v37  ;;  %v1545_v49 = vadd.f32 %v1544_v38, %v4706_v45  ;;  %v1620_v21 = vadd.f32 %v1619_v58, %v4661_v17  ;;  %v663_v37 = vld [vmem:[%s4239_s19 + $0xde0] sm:$0xff] }
  0xca   : > { %2102 = vmatpush.msrb.mxu0 %v951_v40  ;;  %2152 = vmatpush.msra.mxu3 %v546_v41  ;;  %v1387_v38 = vld [vmem:[%s4239_s19 + $0x2480] sm:$0x1f]  ;;  %v256_v40 = vld [vmem:[%s4239_s19 + $0x128] sm:$0xff] }
  0xcb   : > { %2084 = vmatpush.msrb.mxu2 %v255_v39  ;;  %3997 = vmatpush.msk.msrb.mxu1 %vm1436_vm0, %v1386_v43  ;;  %v1571_v44 = vadd.f32 %v1570_v46, %v1545_v49  ;;  %v894_v39 = vld [vmem:[%s4239_s19 + $0x1518] sm:$0xff] }
  0xcc   : > { %2103 = vmatpush.msrb.mxu0 %v922_v47  ;;  %2153 = vmatpush.msra.mxu3 %v517_v48  ;;  %v634_v46 = vld [vmem:[%s4239_s19 + $0xcf8] sm:$0xff]  ;;  %v227_v48 = vld [vmem:[%s4239_s19 + $0x40] sm:$0xff] }
  0xcd   : > { %2085 = vmatpush.msrb.mxu2 %v226_v51  ;;  %2130 = vmatpush.msrb.mxu1 %v1357_v52  ;;  %v1597_v57 = vadd.f32 %v1596_v36, %v1571_v44  ;;  %v923_v36 = vld [vmem:[%s4239_s19 + $0x1600] sm:$0xff]  ;;  %v1358_v47 = vld [vmem:[%s4239_s19 + $0x2398] sm:$0xff]  ;;  %v1329_v44 = vld [vmem:[%s4239_s19 + $0x22b0] sm:$0xff] }
  0xce   : > { %2104 = vmatpush.msrb.mxu0 %v893_v53  ;;  %2154 = vmatpush.msra.mxu3 %v488_v28  ;;  %v1547_v2 = vpop.f32.mrf.mxu0  ;;  %v4788_v52 = vld [vmem:[%s6295_s0 + $0x18] sm:$0xff]  ;;  %v865_v53 = vld [vmem:[%s4239_s19 + $0x1430] sm:$0xff] }
  0xcf   : > { %2174 = vmatpush.msra.mxu2 %v1126_v54  ;;  %2131 = vmatpush.msrb.mxu1 %v1328_v55  ;;  %3816 = vst [vmem:[%s4684_s26 + $0xe8] sm:$0xff] %v1597_v57  ;;  %v1599_v63 = vpop.f32.mrf.mxu2  ;;  %v605_v28 = vld [vmem:[%s4239_s19 + $0xc10] sm:$0xff]  ;;  %v1127_v54 = vld [vmem:[%s4239_s19 + $0x1c60] sm:$0xff]  ;;  %v576_v57 = vld [vmem:[%s4239_s19 + $0xb28] sm:$0xff] }
  0xd0   : > { %1936 = vmatmul.f32.gmra.mxu1 %v4412_v60  ;;  %2105 = vmatpush.msrb.mxu0 %v864_v56  ;;  %v4798_v55 = vld [vmem:[%s6295_s0 + $0x20] sm:$0xff]  ;;  %v836_v56 = vld [vmem:[%s4239_s19 + $0x1348] sm:$0xff] }
  0xd1   : > { %2155 = vmatpush.msra.mxu3 %v459_v59  ;;  %2175 = vmatpush.msra.mxu2 %v1097_v61  ;;  %v1573_v60 = vpop.f32.mrf.mxu1  ;;  %v1300_v59 = vld [vmem:[%s4239_s19 + $0x21c8] sm:$0xff] }
  0xd2   : > { %2132 = vmatpush.msrb.mxu1 %v1299_v62  ;;  %1962 = vmatmul.f32.gmra.mxu2 %v4423_v1  ;;  %v4731_v6 = vpop.permute.xlu1 %1423  ;;  %v1039_v1 = vld [vmem:[%s4239_s19 + $0x19a0] sm:$0xff]  ;;  %v1098_v62 = vld [vmem:[%s4239_s19 + $0x1b78] sm:$0xff] }
  0xd3   : > { %3992 = vmatmul.msk.f32.gmra.mxu3 %vm1426_vm1, %v4736_v7  ;;  %2106 = vmatpush.msrb.mxu0 %v835_v0  ;;  %v1548_v9 = vadd.f32 %v1547_v2, %v4731_v6  ;;  %v1622_v23 = vpop.f32.mrf.mxu3  ;;  %v547_v0 = vld [vmem:[%s4239_s19 + $0xa40] sm:$0xff] }
  0xd4   : > { %2156 = vmatpush.msra.mxu3 %v430_v3  ;;  %2176 = vmatpush.msra.mxu2 %v1068_v4  ;;  %v1623_v49 = vadd.f32 %v1622_v23, %v4706_v45  ;;  %v1271_v2 = vld [vmem:[%s4239_s19 + $0x20e0] sm:$0xff]  ;;  %v1069_v4 = vld [vmem:[%s4239_s19 + $0x1a90] sm:$0xff] }
  0xd5   : > { %2133 = vmatpush.msrb.mxu1 %v1270_v5  ;;  %2107 = vmatpush.msrb.mxu0 %v806_v50  ;;  %v1574_v14 = vadd.f32 %v1573_v60, %v1548_v9  ;;  %v778_v50 = vld [vmem:[%s4239_s19 + $0x1178] sm:$0xff]  ;;  %v4818_v9 = vld [vmem:[%s6295_s0 + $0x30] sm:$0x7] }
  0xd6   : > { %2157 = vmatpush.msra.mxu3 %v401_v8  ;;  %2177 = vmatpush.msra.mxu2 %v1039_v1  ;;  %v518_v60 = vld [vmem:[%s4239_s19 + $0x958] sm:$0xff]  ;;  %v1040_v1 = vld [vmem:[%s4239_s19 + $0x19a8] sm:$0xff] }
  0xd7   : > { %2134 = vmatpush.msrb.mxu1 %v1241_v11  ;;  %2008 = vmatmul.f32.vlgmr.msra.gmra.mxu0 %v4751_v19  ;;  %v1600_v22 = vadd.f32 %v1599_v63, %v1574_v14  ;;  %v807_v63 = vld [vmem:[%s4239_s19 + $0x1260] sm:$0xff]  ;;  %v1242_v8 = vld [vmem:[%s4239_s19 + $0x1ff8] sm:$0xff]  ;;  %v749_v11 = vld [vmem:[%s4239_s19 + $0x1090] sm:$0xff] }
  0xd8   : > { %2108 = vmatpush.msrb.mxu0 %v777_v12  ;;  %2158 = vmatpush.msra.mxu3 %v372_v13  ;;  %v489_v14 = vld [vmem:[%s4239_s19 + $0x870] sm:$0xff] }
  0xd9   : > { %2178 = vmatpush.msra.mxu2 %v1010_v15  ;;  %2135 = vmatpush.msrb.mxu1 %v1212_v16  ;;  %3845 = vst [vmem:[%s4684_s26 + $0x1d0] sm:$0x7] %v1600_v22  ;;  %v1645_v29 = vpop.f32.mrf.mxu2  ;;  %v1213_v15 = vld [vmem:[%s4239_s19 + $0x1f10] sm:$0xff]  ;;  %v1011_v16 = vld [vmem:[%s4239_s19 + $0x18c0] sm:$0xff]  ;;  %v460_v22 = vld [vmem:[%s4239_s19 + $0x788] sm:$0xff] }
  0xda   : > { %2034 = vmatmul.f32.vlgmr.msra.gmra.mxu1 %v4763_v30  ;;  %2109 = vmatpush.msrb.mxu0 %v748_v18  ;;  %v1646_v33 = vadd.f32 %v1645_v29, %v1620_v21  ;;  %v4829_v18 = vld [vmem:[%s6295_s0 + $0x38] sm:$0x7]  ;;  %v720_v21 = vld [vmem:[%s4239_s19 + $0xfa8] sm:$0xff]  ;;  %v691_v29 = vld [vmem:[%s4239_s19 + $0xec0] sm:$0xff] }
  0xdb   : > { %2159 = vmatpush.msra.mxu3 %v343_v25  ;;  %2179 = vmatpush.msra.mxu2 %v981_v26  ;;  %v1184_v25 = vld [vmem:[%s4239_s19 + $0x1e28] sm:$0xff] }
  0xdc   : > { %2136 = vmatpush.msrb.mxu1 %v1183_v27  ;;  %3994 = vmatmul.msk.f32.vlgmr.msrb.gmra.mxu3 %vm1426_vm1, %v4667_v20  ;;  %v982_v27 = vld [vmem:[%s4239_s19 + $0x17d8] sm:$0xff] }
  0xdd   : > { %2110 = vmatpush.msrb.mxu0 %v719_v31  ;;  %2160 = vmatpush.msra.mxu3 %v314_v24  ;;  %v431_v31 = vld [vmem:[%s4239_s19 + $0x6a0] sm:$0xff] }
  0xde   : > { %2180 = vmatpush.msra.mxu2 %v952_v32  ;;  %2137 = vmatpush.msrb.mxu1 %v1154_v10  ;;  %v1671_v41 = vpop.f32.mrf.mxu0  ;;  %v1625_v51 = vpop.f32.mrf.mxu3  ;;  %v1155_v24 = vld [vmem:[%s4239_s19 + $0x1d40] sm:$0xff]  ;;  %v953_v10 = vld [vmem:[%s4239_s19 + $0x16f0] sm:$0xff] }
  0xdf   : > { %2111 = vmatpush.msrb.mxu0 %v690_v34  ;;  %2161 = vmatpush.msra.mxu3 %v285_v35  ;;  %v1672_v43 = vadd.f32 %v1671_v41, %v1646_v33  ;;  %v1626_v12 = vadd.f32 %v1625_v51, %v4731_v6  ;;  %v1388_v33 = vld [vmem:[%s4239_s19 + $0x2488] sm:$0x1f]  ;;  %v402_v35 = vld [vmem:[%s4239_s19 + $0x5b8] sm:$0xff]  ;;  %v1359_v41 = vld [vmem:[%s4239_s19 + $0x23a0] sm:$0xff] }
  0xe0   : > { %2181 = vmatpush.msra.mxu2 %v923_v36  ;;  %2226 = vmatpush.msra.mxu1 %v663_v37  ;;  %v664_v37 = vld [vmem:[%s4239_s19 + $0xde8] sm:$0xff] }
  0xe1   : > { %4001 = vmatpush.msk.msra.mxu0 %vm1436_vm0, %v1387_v38  ;;  %2162 = vmatpush.msra.mxu3 %v256_v40  ;;  %3787 = vst [vmem:[%s4684_s26 + $0x8] sm:$0xff] %v1672_v43  ;;  %v924_v38 = vld [vmem:[%s4239_s19 + $0x1608] sm:$0xff]  ;;  %v373_v43 = vld [vmem:[%s4239_s19 + $0x4d0] sm:$0xff] }
  0xe2   : > { %2011 = vmatmul.f32.gmra.mxu0 %v4788_v52  ;;  %2182 = vmatpush.msra.mxu2 %v894_v39 }
  0xe3   : > { %2227 = vmatpush.msra.mxu1 %v634_v46  ;;  %2208 = vmatpush.msra.mxu0 %v1358_v47  ;;  %v635_v46 = vld [vmem:[%s4239_s19 + $0xd00] sm:$0xff]  ;;  %v1330_v47 = vld [vmem:[%s4239_s19 + $0x22b8] sm:$0xff] }
  0xe4   : > { %2037 = vmatmul.f32.gmra.mxu1 %v4798_v55  ;;  %2163 = vmatpush.msra.mxu3 %v227_v48  ;;  %v1648_v58 = vpop.f32.mrf.mxu2  ;;  %v895_v48 = vld [vmem:[%s4239_s19 + $0x1520] sm:$0xff] }
  0xe5   : > { %2183 = vmatpush.msra.mxu2 %v865_v53  ;;  %2228 = vmatpush.msra.mxu1 %v605_v28  ;;  %v1649_v61 = vadd.f32 %v1648_v58, %v1623_v49  ;;  %v344_v49 = vld [vmem:[%s4239_s19 + $0x3e8] sm:$0xff]  ;;  %v606_v28 = vld [vmem:[%s4239_s19 + $0xc18] sm:$0xff]  ;;  %v577_v58 = vld [vmem:[%s4239_s19 + $0xb30] sm:$0xff] }
  0xe6   : > { %2209 = vmatpush.msra.mxu0 %v1329_v44  ;;  %2252 = vmatpush.msrb.mxu3 %v1127_v54  ;;  %v866_v44 = vld [vmem:[%s4239_s19 + $0x1438] sm:$0xff]  ;;  %v1301_v54 = vld [vmem:[%s4239_s19 + $0x21d0] sm:$0xff] }
  0xe7   : > { %2184 = vmatpush.msra.mxu2 %v836_v56  ;;  %2229 = vmatpush.msra.mxu1 %v576_v57  ;;  %v1674_v3 = vpop.f32.mrf.mxu0  ;;  %v315_v57 = vld [vmem:[%s4239_s19 + $0x300] sm:$0xff] }
  0xe8   : > { %2086 = vmatmul.f32.vlgmr.msrb.gmra.mxu2 %v4751_v19  ;;  %2210 = vmatpush.msra.mxu0 %v1300_v59  ;;  %v1675_v5 = vadd.f32 %v1674_v3, %v1649_v61  ;;  %v837_v59 = vld [vmem:[%s4239_s19 + $0x1350] sm:$0xff]  ;;  %v1272_v61 = vld [vmem:[%s4239_s19 + $0x20e8] sm:$0xff]  ;;  %v1243_v3 = vld [vmem:[%s4239_s19 + $0x2000] sm:$0xff] }
  0xe9   : > { %2253 = vmatpush.msrb.mxu3 %v1098_v62  ;;  %2185 = vmatpush.msra.mxu2 %v807_v63  ;;  %v1723_v13 = vpop.f32.mrf.mxu3  ;;  %v286_v62 = vld [vmem:[%s4239_s19 + $0x218] sm:$0xff]  ;;  %v548_v63 = vld [vmem:[%s4239_s19 + $0xa48] sm:$0xff] }
  0xea   : > { %2230 = vmatpush.msra.mxu1 %v547_v0  ;;  %2211 = vmatpush.msra.mxu0 %v1271_v2  ;;  %3817 = vst [vmem:[%s4684_s26 + $0xf0] sm:$0xff] %v1675_v5  ;;  %v808_v0 = vld [vmem:[%s4239_s19 + $0x1268] sm:$0xff] }
  0xeb   : > { %2254 = vmatpush.msrb.mxu3 %v1069_v4  ;;  %2014 = vmatmul.f32.gmra.mxu0 %v4818_v9 }
  0xec   : > { %2186 = vmatpush.msra.mxu2 %v778_v50  ;;  %2231 = vmatpush.msra.mxu1 %v518_v60  ;;  %v257_v50 = vld [vmem:[%s4239_s19 + $0x130] sm:$0xff]  ;;  %v519_v60 = vld [vmem:[%s4239_s19 + $0x960] sm:$0xff] }
  0xed   : > { %2212 = vmatpush.msra.mxu0 %v1242_v8  ;;  %2255 = vmatpush.msrb.mxu3 %v1040_v1  ;;  %v1651_v23 = vpop.f32.mrf.mxu2  ;;  %v1214_v8 = vld [vmem:[%s4239_s19 + $0x1f18] sm:$0xff] }
  0xee   : > { %2040 = vmatmul.f32.gmra.mxu1 %v4829_v18  ;;  %2187 = vmatpush.msra.mxu2 %v749_v11  ;;  %v1652_v26 = vadd.f32 %v1651_v23, %v1626_v12  ;;  %v779_v12 = vld [vmem:[%s4239_s19 + $0x1180] sm:$0xff]  ;;  %v461_v23 = vld [vmem:[%s4239_s19 + $0x790] sm:$0xff] }
  0xef   : > { %2232 = vmatpush.msra.mxu1 %v489_v14  ;;  %3995 = vmatmul.msk.f32.gmra.mxu3 %vm1426_vm1, %v4700_v42  ;;  %v490_v14 = vld [vmem:[%s4239_s19 + $0x878] sm:$0xff] }
  0xf0   : > { %2213 = vmatpush.msra.mxu0 %v1213_v15  ;;  %2256 = vmatpush.msrb.mxu3 %v1011_v16  ;;  %v1677_v32 = vpop.f32.mrf.mxu0  ;;  %v750_v16 = vld [vmem:[%s4239_s19 + $0x1098] sm:$0xff] }
  0xf1   : > { %2188 = vmatpush.msra.mxu2 %v720_v21  ;;  %2233 = vmatpush.msra.mxu1 %v460_v22  ;;  %v1678_v34 = vadd.f32 %v1677_v32, %v1652_v26  ;;  %v1726_v39 = vpop.f32.mrf.mxu3  ;;  %v1185_v21 = vld [vmem:[%s4239_s19 + $0x1e30] sm:$0xff]  ;;  %v1128_v22 = vld [vmem:[%s4239_s19 + $0x1c68] sm:$0xff] }
  0xf2   : > { %2089 = vmatmul.f32.gmra.mxu2 %v4788_v52  ;;  %2214 = vmatpush.msra.mxu0 %v1184_v25  ;;  %v721_v25 = vld [vmem:[%s4239_s19 + $0xfb0] sm:$0xff]  ;;  %v1156_v26 = vld [vmem:[%s4239_s19 + $0x1d48] sm:$0xff] }
  0xf3   : > { %2257 = vmatpush.msrb.mxu3 %v982_v27  ;;  %2189 = vmatpush.msra.mxu2 %v691_v29  ;;  %v1697_v36 = vpop.f32.mrf.mxu1  ;;  %3846 = vst [vmem:[%s4684_s26 + $0x1d8] sm:$0x7] %v1678_v34  ;;  %v1099_v27 = vld [vmem:[%s4239_s19 + $0x1b80] sm:$0xff] }
  0xf4   : > { %2234 = vmatpush.msra.mxu1 %v431_v31  ;;  %2215 = vmatpush.msra.mxu0 %v1155_v24  ;;  %v1698_v40 = vadd.f32 %v1697_v36, %v4661_v17  ;;  %v432_v31 = vld [vmem:[%s4239_s19 + $0x6a8] sm:$0xff]  ;;  %v665_v24 = vld [vmem:[%s4239_s19 + $0xdf0] sm:$0xff] }
  0xf5   : > { %2258 = vmatpush.msrb.mxu3 %v953_v10  ;;  %4005 = vmatpush.msk.msrb.mxu2 %vm1436_vm0, %v1388_v33  ;;  %v692_v10 = vld [vmem:[%s4239_s19 + $0xec8] sm:$0xff]  ;;  %v1070_v33 = vld [vmem:[%s4239_s19 + $0x1a98] sm:$0xff]  ;;  %v1389_v36 = vld [vmem:[%s4239_s19 + $0x2490] sm:$0x1f] }
  0xf6   : > { %2112 = vmatmul.f32.vlgmr.msrb.gmra.mxu0 %v4763_v30  ;;  %2235 = vmatpush.msra.mxu1 %v402_v35  ;;  %v1724_v51 = vadd.f32 %v1723_v13, %v1698_v40  ;;  %v1749_v53 = vpop.f32.mrf.mxu2  ;;  %v228_v13 = vld [vmem:[%s4239_s19 + $0x48] sm:$0xff]  ;;  %v403_v35 = vld [vmem:[%s4239_s19 + $0x5c0] sm:$0xff] }
  0xf7   : > { %2304 = vmatpush.msrb.mxu0 %v664_v37  ;;  %2259 = vmatpush.msrb.mxu3 %v924_v38  ;;  %v636_v37 = vld [vmem:[%s4239_s19 + $0xd08] sm:$0xff] }
  0xf8   : > { %2286 = vmatpush.msrb.mxu2 %v1359_v41  ;;  %3998 = vmatmul.msk.f32.vlgmr.msrb.gmra.mxu1 %vm1426_vm1, %v4667_v20  ;;  %v1750_v56 = vadd.f32 %v1749_v53, %v1724_v51  ;;  %v1041_v41 = vld [vmem:[%s4239_s19 + $0x19b0] sm:$0xff] }
  0xf9   : > { %2236 = vmatpush.msra.mxu1 %v373_v43  ;;  %2305 = vmatpush.msrb.mxu0 %v635_v46  ;;  %v1360_v43 = vld [vmem:[%s4239_s19 + $0x23a8] sm:$0xff]  ;;  %v345_v51 = vld [vmem:[%s4239_s19 + $0x3f0] sm:$0xff] }
  0xfa   : > { %3996 = vmatmul.msk.f32.gmra.mxu3 %vm1426_vm1, %v4736_v7  ;;  %2287 = vmatpush.msrb.mxu2 %v1330_v47  ;;  %3788 = vst [vmem:[%s4684_s26 + $0x10] sm:$0xff] %v1750_v56  ;;  %v607_v47 = vld [vmem:[%s4239_s19 + $0xc20] sm:$0xff] }
  0xfb   : > { %2260 = vmatpush.msrb.mxu3 %v895_v48  ;;  %2237 = vmatpush.msra.mxu1 %v344_v49  ;;  %v1729_v5 = vpop.f32.mrf.mxu3  ;;  %v1012_v48 = vld [vmem:[%s4239_s19 + $0x18c8] sm:$0xff] }
  0xfc   : > { %2306 = vmatpush.msrb.mxu0 %v606_v28  ;;  %2092 = vmatmul.f32.gmra.mxu2 %v4818_v9  ;;  %v1331_v28 = vld [vmem:[%s4239_s19 + $0x22c0] sm:$0xff] }
  0xfd   : > { %2261 = vmatpush.msrb.mxu3 %v866_v44  ;;  %2288 = vmatpush.msrb.mxu2 %v1301_v54  ;;  %v578_v44 = vld [vmem:[%s4239_s19 + $0xb38] sm:$0xff]  ;;  %v983_v54 = vld [vmem:[%s4239_s19 + $0x17e0] sm:$0xff] }
  0xfe   : > { %2238 = vmatpush.msra.mxu1 %v315_v57  ;;  %2307 = vmatpush.msrb.mxu0 %v577_v58  ;;  %v1700_v2 = vpop.f32.mrf.mxu1  ;;  %v316_v57 = vld [vmem:[%s4239_s19 + $0x308] sm:$0xff]  ;;  %v1302_v58 = vld [vmem:[%s4239_s19 + $0x21d8] sm:$0xff] }
  0xff   : > { %2262 = vmatpush.msrb.mxu3 %v837_v59  ;;  %2289 = vmatpush.msrb.mxu2 %v1272_v61  ;;  %v1701_v4 = vadd.f32 %v1700_v2, %v4706_v45  ;;  %v549_v61 = vld [vmem:[%s4239_s19 + $0xa50] sm:$0xff] }
 0x100   : > { %2115 = vmatmul.f32.gmra.mxu0 %v4798_v55  ;;  %2239 = vmatpush.msra.mxu1 %v286_v62  ;;  %v1752_v11 = vpop.f32.mrf.mxu2  ;;  %v954_v62 = vld [vmem:[%s4239_s19 + $0x16f8] sm:$0xff]  ;;  %v1273_v2 = vld [vmem:[%s4239_s19 + $0x20f0] sm:$0xff] }
 0x101   : > { %2308 = vmatpush.msrb.mxu0 %v548_v63  ;;  %2263 = vmatpush.msrb.mxu3 %v808_v0  ;;  %v1727_v1 = vadd.f32 %v1726_v39, %v1701_v4  ;;  %v374_v39 = vld [vmem:[%s4239_s19 + $0x4d8] sm:$0xff]  ;;  %v287_v0 = vld [vmem:[%s4239_s19 + $0x220] sm:$0xff]  ;;  %v520_v4 = vld [vmem:[%s4239_s19 + $0x968] sm:$0xff] }
 0x102   : > { %2290 = vmatpush.msrb.mxu2 %v1243_v3  ;;  %3999 = vmatmul.msk.f32.gmra.mxu1 %vm1426_vm1, %v4700_v42 }
 0x103   : > { %2240 = vmatpush.msra.mxu1 %v257_v50  ;;  %2309 = vmatpush.msrb.mxu0 %v519_v60  ;;  %v1753_v15 = vadd.f32 %v1752_v11, %v1727_v1  ;;  %v258_v50 = vld [vmem:[%s4239_s19 + $0x138] sm:$0xff]  ;;  %v1244_v60 = vld [vmem:[%s4239_s19 + $0x2008] sm:$0xff] }
 0x104   : > { %2164 = vmatmul.f32.vlgmr.msra.gmra.mxu3 %v4751_v19  ;;  %2291 = vmatpush.msrb.mxu2 %v1214_v8  ;;  %v491_v8 = vld [vmem:[%s4239_s19 + $0x880] sm:$0xff]  ;;  %v896_v1 = vld [vmem:[%s4239_s19 + $0x1528] sm:$0xff] }
 0x105   : > { %2264 = vmatpush.msrb.mxu3 %v779_v12  ;;  %2241 = vmatpush.msra.mxu1 %v228_v13  ;;  %3818 = vst [vmem:[%s4684_s26 + $0xf8] sm:$0xff] %v1753_v15  ;;  %v229_v12 = vld [vmem:[%s4239_s19 + $0x50] sm:$0xff]  ;;  %v1215_v13 = vld [vmem:[%s4239_s19 + $0x1f20] sm:$0xff]  ;;  %v462_v15 = vld [vmem:[%s4239_s19 + $0x798] sm:$0xff] }
 0x106   : > { %2310 = vmatpush.msrb.mxu0 %v490_v14  ;;  %2190 = vmatmul.f32.vlgmr.msra.gmra.mxu2 %v4763_v30  ;;  %v1827_v34 = vpop.f32.mrf.mxu3 }
 0x107   : > { %2265 = vmatpush.msrb.mxu3 %v750_v16  ;;  %2292 = vmatpush.msrb.mxu2 %v1185_v21  ;;  %v1703_v29 = vpop.f32.mrf.mxu1  ;;  %v867_v16 = vld [vmem:[%s4239_s19 + $0x1440] sm:$0xff]  ;;  %v1129_v21 = vld [vmem:[%s4239_s19 + $0x1c70] sm:$0xff] }
 0x108   : > { %2330 = vmatpush.msrb.mxu1 %v1128_v22  ;;  %2311 = vmatpush.msrb.mxu0 %v461_v23  ;;  %v1704_v32 = vadd.f32 %v1703_v29, %v4731_v6  ;;  %v1186_v22 = vld [vmem:[%s4239_s19 + $0x1e38] sm:$0xff]  ;;  %v1100_v29 = vld [vmem:[%s4239_s19 + $0x1b88] sm:$0xff] }
 0x109   : > { %2266 = vmatpush.msrb.mxu3 %v721_v25  ;;  %2293 = vmatpush.msrb.mxu2 %v1156_v26  ;;  %v433_v25 = vld [vmem:[%s4239_s19 + $0x6b0] sm:$0xff] }
 0x10a   : > { %2331 = vmatpush.msrb.mxu1 %v1099_v27  ;;  %2118 = vmatmul.f32.gmra.mxu0 %v4829_v18  ;;  %v1730_v38 = vadd.f32 %v1729_v5, %v1704_v32  ;;  %v1755_v40 = vpop.f32.mrf.mxu2  ;;  %v925_v5 = vld [vmem:[%s4239_s19 + $0x1610] sm:$0xff]  ;;  %v838_v27 = vld [vmem:[%s4239_s19 + $0x1358] sm:$0xff]  ;;  %v404_v32 = vld [vmem:[%s4239_s19 + $0x5c8] sm:$0xff] }
 0x10b   : > { %2312 = vmatpush.msrb.mxu0 %v432_v31  ;;  %2382 = vmatpush.msra.mxu2 %v665_v24  ;;  %v1157_v24 = vld [vmem:[%s4239_s19 + $0x1d50] sm:$0xff] }
 0x10c   : > { %2267 = vmatpush.msrb.mxu3 %v692_v10  ;;  %2332 = vmatpush.msrb.mxu1 %v1070_v33  ;;  %v1756_v46 = vadd.f32 %v1755_v40, %v1730_v38  ;;  %v809_v33 = vld [vmem:[%s4239_s19 + $0x1270] sm:$0xff]  ;;  %v1042_v38 = vld [vmem:[%s4239_s19 + $0x19b8] sm:$0xff] }
 0x10d   : > { %4000 = vmatmul.msk.f32.gmra.mxu1 %vm1426_vm1, %v4736_v7  ;;  %2313 = vmatpush.msrb.mxu0 %v403_v35  ;;  %v666_v35 = vld [vmem:[%s4239_s19 + $0xdf8] sm:$0xff] }
 0x10e   : > { %4009 = vmatpush.msk.msra.mxu3 %vm1436_vm0, %v1389_v36  ;;  %2383 = vmatpush.msra.mxu2 %v636_v37  ;;  %v1775_v49 = vpop.f32.mrf.mxu0  ;;  %3847 = vst [vmem:[%s4684_s26 + $0x1e0] sm:$0x7] %v1756_v46  ;;  %v375_v36 = vld [vmem:[%s4239_s19 + $0x4e0] sm:$0xff]  ;;  %v780_v37 = vld [vmem:[%s4239_s19 + $0x1188] sm:$0xff] }
 0x10f   : > { %2167 = vmatmul.f32.gmra.mxu3 %v4788_v52  ;;  %2333 = vmatpush.msrb.mxu1 %v1041_v41  ;;  %v1776_v53 = vadd.f32 %v1775_v49, %v4661_v17  ;;  %v1830_v63 = vpop.f32.mrf.mxu3  ;;  %v637_v41 = vld [vmem:[%s4239_s19 + $0xd10] sm:$0xff]  ;;  %v751_v46 = vld [vmem:[%s4239_s19 + $0x10a0] sm:$0xff] }
 0x110   : > { %2314 = vmatpush.msrb.mxu0 %v374_v39  ;;  %2364 = vmatpush.msra.mxu3 %v1360_v43  ;;  %v346_v39 = vld [vmem:[%s4239_s19 + $0x3f8] sm:$0xff] }
 0x111   : > { %2384 = vmatpush.msra.mxu2 %v607_v47  ;;  %2334 = vmatpush.msrb.mxu1 %v1012_v48  ;;  %v1801_v56 = vpop.f32.mrf.mxu1  ;;  %v1013_v47 = vld [vmem:[%s4239_s19 + $0x18d0] sm:$0xff]  ;;  %v608_v48 = vld [vmem:[%s4239_s19 + $0xc28] sm:$0xff] }
 0x112   : > { %2193 = vmatmul.f32.gmra.mxu2 %v4798_v55  ;;  %2315 = vmatpush.msrb.mxu0 %v345_v51  ;;  %v1802_v59 = vadd.f32 %v1801_v56, %v1776_v53  ;;  %v317_v51 = vld [vmem:[%s4239_s19 + $0x310] sm:$0xff]  ;;  %v579_v56 = vld [vmem:[%s4239_s19 + $0xb40] sm:$0xff] }
 0x113   : > { %2365 = vmatpush.msra.mxu3 %v1331_v28  ;;  %2385 = vmatpush.msra.mxu2 %v578_v44  ;;  %v984_v44 = vld [vmem:[%s4239_s19 + $0x17e8] sm:$0xff] }
 0x114   : > { %2335 = vmatpush.msrb.mxu1 %v983_v54  ;;  %4002 = vmatmul.msk.f32.vlgmr.msra.gmra.mxu0 %vm1426_vm1, %v4667_v20  ;;  %v1828_v3 = vadd.f32 %v1827_v34, %v1802_v59  ;;  %v1071_v34 = vld [vmem:[%s4239_s19 + $0x1aa0] sm:$0xff]  ;;  %v693_v59 = vld [vmem:[%s4239_s19 + $0xed0] sm:$0xff] }
 0x115   : > { %2316 = vmatpush.msrb.mxu0 %v316_v57  ;;  %2366 = vmatpush.msra.mxu3 %v1302_v58  ;;  %v288_v57 = vld [vmem:[%s4239_s19 + $0x228] sm:$0xff] }
 0x116   : > { %2386 = vmatpush.msra.mxu2 %v549_v61  ;;  %2336 = vmatpush.msrb.mxu1 %v954_v62  ;;  %3789 = vst [vmem:[%s4684_s26 + $0x18] sm:$0xff] %v1828_v3  ;;  %v955_v61 = vld [vmem:[%s4239_s19 + $0x1700] sm:$0xff]  ;;  %v550_v62 = vld [vmem:[%s4239_s19 + $0xa58] sm:$0xff] }
 0x117   : > { %2317 = vmatpush.msrb.mxu0 %v287_v0  ;;  %2367 = vmatpush.msra.mxu3 %v1273_v2  ;;  %v1390_v0 = vld [vmem:[%s4239_s19 + $0x2498] sm:$0x1f] }
 0x118   : > { %2387 = vmatpush.msra.mxu2 %v520_v4  ;;  %2170 = vmatmul.f32.gmra.mxu3 %v4818_v9  ;;  %v1778_v11 = vpop.f32.mrf.mxu0  ;;  %v926_v3 = vld [vmem:[%s4239_s19 + $0x1618] sm:$0xff]  ;;  %v521_v4 = vld [vmem:[%s4239_s19 + $0x970] sm:$0xff] }
 0x119   : > { %2337 = vmatpush.msrb.mxu1 %v925_v5  ;;  %2318 = vmatpush.msrb.mxu0 %v258_v50  ;;  %v1779_v14 = vadd.f32 %v1778_v11, %v4706_v45  ;;  %v1833_v31 = vpop.f32.mrf.mxu3  ;;  %v230_v5 = vld [vmem:[%s4239_s19 + $0x58] sm:$0xff]  ;;  %v1361_v50 = vld [vmem:[%s4239_s19 + $0x23b0] sm:$0xff] }
 0x11a   : > { %2368 = vmatpush.msra.mxu3 %v1244_v60  ;;  %2388 = vmatpush.msra.mxu2 %v491_v8  ;;  %v1804_v23 = vpop.f32.mrf.mxu1  ;;  %v897_v8 = vld [vmem:[%s4239_s19 + $0x1530] sm:$0xff] }
 0x11b   : > { %2196 = vmatmul.f32.gmra.mxu2 %v4829_v18  ;;  %2338 = vmatpush.msrb.mxu1 %v896_v1  ;;  %v1805_v26 = vadd.f32 %v1804_v23, %v1779_v14  ;;  %v492_v1 = vld [vmem:[%s4239_s19 + $0x888] sm:$0xff]  ;;  %v1303_v23 = vld [vmem:[%s4239_s19 + $0x21e0] sm:$0xff] }
 0x11c   : > { %2319 = vmatpush.msrb.mxu0 %v229_v12  ;;  %2369 = vmatpush.msra.mxu3 %v1215_v13  ;;  %v1130_v12 = vld [vmem:[%s4239_s19 + $0x1c78] sm:$0xff]  ;;  %v1332_v13 = vld [vmem:[%s4239_s19 + $0x22c8] sm:$0xff] }
 0x11d   : > { %2389 = vmatpush.msra.mxu2 %v462_v15  ;;  %2339 = vmatpush.msrb.mxu1 %v867_v16  ;;  %v1831_v10 = vadd.f32 %v1830_v63, %v1805_v26  ;;  %v259_v63 = vld [vmem:[%s4239_s19 + $0x140] sm:$0xff]  ;;  %v434_v26 = vld [vmem:[%s4239_s19 + $0x6b8] sm:$0xff] }
 0x11e   : > { %2408 = vmatpush.msra.mxu0 %v1129_v21  ;;  %2370 = vmatpush.msra.mxu3 %v1186_v22  ;;  %v463_v21 = vld [vmem:[%s4239_s19 + $0x7a0] sm:$0xff]  ;;  %v1101_v22 = vld [vmem:[%s4239_s19 + $0x1b90] sm:$0xff] }
 0x11f   : > { %2390 = vmatpush.msra.mxu2 %v433_v25  ;;  %2242 = vmatmul.f32.vlgmr.msra.gmra.mxu1 %v4751_v19  ;;  %3819 = vst [vmem:[%s4684_s26 + $0x100] sm:$0xff] %v1831_v10  ;;  %v839_v25 = vld [vmem:[%s4239_s19 + $0x1360] sm:$0xff] }
 0x120   : > { %2340 = vmatpush.msrb.mxu1 %v838_v27  ;;  %2409 = vmatpush.msra.mxu0 %v1100_v29  ;;  %v1072_v27 = vld [vmem:[%s4239_s19 + $0x1aa8] sm:$0xff]  ;;  %v1274_v29 = vld [vmem:[%s4239_s19 + $0x20f8] sm:$0xff]  ;;  %v1043_v10 = vld [vmem:[%s4239_s19 + $0x19c0] sm:$0xff] }
 0x121   : > { %2371 = vmatpush.msra.mxu3 %v1157_v24  ;;  %2391 = vmatpush.msra.mxu2 %v404_v32  ;;  %v405_v32 = vld [vmem:[%s4239_s19 + $0x5d0] sm:$0xff] }
 0x122   : > { %2268 = vmatmul.f32.vlgmr.msrb.gmra.mxu3 %v4763_v30  ;;  %2341 = vmatpush.msrb.mxu1 %v809_v33  ;;  %v1781_v40 = vpop.f32.mrf.mxu0  ;;  %v1245_v33 = vld [vmem:[%s4239_s19 + $0x2010] sm:$0xff] }
 0x123   : > { %2410 = vmatpush.msra.mxu0 %v1071_v34  ;;  %2460 = vmatpush.msrb.mxu3 %v666_v35  ;;  %v1782_v43 = vadd.f32 %v1781_v40, %v4731_v6  ;;  %v1853_v28 = vpop.f32.mrf.mxu2  ;;  %v1905_v54 = vpop.f32.mrf.mxu3  ;;  %v781_v34 = vld [vmem:[%s4239_s19 + $0x1190] sm:$0xff]  ;;  %v376_v35 = vld [vmem:[%s4239_s19 + $0x4e8] sm:$0xff] }
 0x124   : > { %2392 = vmatpush.msra.mxu2 %v375_v36  ;;  %2342 = vmatpush.msrb.mxu1 %v780_v37  ;;  %v1854_v2 = vadd.f32 %v1853_v28, %v4661_v17  ;;  %v1014_v37 = vld [vmem:[%s4239_s19 + $0x18d8] sm:$0xff] }
 0x125   : > { %4006 = vmatmul.msk.f32.vlgmr.msrb.gmra.mxu2 %vm1426_vm1, %v4667_v20  ;;  %2411 = vmatpush.msra.mxu0 %v1042_v38  ;;  %v1807_v49 = vpop.f32.mrf.mxu1  ;;  %v722_v20 = vld [vmem:[%s4239_s19 + $0xfb8] sm:$0xff]  ;;  %v1216_v38 = vld [vmem:[%s4239_s19 + $0x1f28] sm:$0xff] }
 0x126   : > { %2461 = vmatpush.msrb.mxu3 %v637_v41  ;;  %2393 = vmatpush.msra.mxu2 %v346_v39  ;;  %v1808_v53 = vadd.f32 %v1807_v49, %v1782_v43  ;;  %v1187_v49 = vld [vmem:[%s4239_s19 + $0x1e40] sm:$0xff]  ;;  %v1158_v28 = vld [vmem:[%s4239_s19 + $0x1d58] sm:$0xff] }
 0x127   : > { %4003 = vmatmul.msk.f32.gmra.mxu0 %vm1426_vm1, %v4700_v42  ;;  %2343 = vmatpush.msrb.mxu1 %v751_v46  ;;  %v347_v46 = vld [vmem:[%s4239_s19 + $0x400] sm:$0xff] }
 0x128   : > { %2412 = vmatpush.msra.mxu0 %v1013_v47  ;;  %2462 = vmatpush.msrb.mxu3 %v608_v48  ;;  %v1834_v58 = vadd.f32 %v1833_v31, %v1808_v53  ;;  %v810_v31 = vld [vmem:[%s4239_s19 + $0x1278] sm:$0xff]  ;;  %v985_v47 = vld [vmem:[%s4239_s19 + $0x17f0] sm:$0xff]  ;;  %v956_v53 = vld [vmem:[%s4239_s19 + $0x1708] sm:$0xff] }
 0x129   : > { %2394 = vmatpush.msra.mxu2 %v317_v51  ;;  %2245 = vmatmul.f32.gmra.mxu1 %v4788_v52  ;;  %v318_v51 = vld [vmem:[%s4239_s19 + $0x318] sm:$0xff] }
 0x12a   : > { %2344 = vmatpush.msrb.mxu1 %v722_v20  ;;  %2413 = vmatpush.msra.mxu0 %v984_v44  ;;  %3848 = vst [vmem:[%s4684_s26 + $0x1e8] sm:$0x7] %v1834_v58  ;;  %v5030_v20 = vld [vmem:[%s6295_s0 + $0x10] sm:$0xff] }
 0x12b   : > { %2463 = vmatpush.msrb.mxu3 %v579_v56  ;;  %2395 = vmatpush.msra.mxu2 %v288_v57  ;;  %v289_v44 = vld [vmem:[%s4239_s19 + $0x230] sm:$0xff]  ;;  %v927_v56 = vld [vmem:[%s4239_s19 + $0x1620] sm:$0xff] }
 0x12c   : > { %2271 = vmatmul.f32.gmra.mxu3 %v4798_v55  ;;  %2345 = vmatpush.msrb.mxu1 %v693_v59  ;;  %v667_v57 = vld [vmem:[%s4239_s19 + $0xe00] sm:$0xff] }
 0x12d   : > { %2414 = vmatpush.msra.mxu0 %v955_v61  ;;  %2464 = vmatpush.msrb.mxu3 %v550_v62  ;;  %v1879_v60 = vpop.f32.mrf.mxu0  ;;  %v1391_v59 = vld [vmem:[%s4239_s19 + $0x24a0] sm:$0x1f]  ;;  %v260_v61 = vld [vmem:[%s4239_s19 + $0x148] sm:$0xff]  ;;  %v898_v62 = vld [vmem:[%s4239_s19 + $0x1538] sm:$0xff] }
 0x12e   : > { %2396 = vmatpush.msra.mxu2 %v259_v63  ;;  %4013 = vmatpush.msk.msra.mxu1 %vm1436_vm0, %v1390_v0  ;;  %v1880_v11 = vadd.f32 %v1879_v60, %v1854_v2  ;;  %v1856_v14 = vpop.f32.mrf.mxu2  ;;  %v1908_v16 = vpop.f32.mrf.mxu3  ;;  %v638_v0 = vld [vmem:[%s4239_s19 + $0xd18] sm:$0xff] }
 0x12f   : > { %4007 = vmatmul.msk.f32.gmra.mxu2 %vm1426_vm1, %v4700_v42  ;;  %2415 = vmatpush.msra.mxu0 %v926_v3  ;;  %v868_v42 = vld [vmem:[%s4239_s19 + $0x1448] sm:$0xff]  ;;  %v1857_v24 = vadd.f32 %v1856_v14, %v4706_v45  ;;  %v1362_v2 = vld [vmem:[%s4239_s19 + $0x23b8] sm:$0xff]  ;;  %v1131_v14 = vld [vmem:[%s4239_s19 + $0x1c80] sm:$0xff] }
 0x130   : > { %2465 = vmatpush.msrb.mxu3 %v521_v4  ;;  %2397 = vmatpush.msra.mxu2 %v230_v5  ;;  %v1906_v15 = vadd.f32 %v1905_v54, %v1880_v11  ;;  %v231_v5 = vld [vmem:[%s4239_s19 + $0x60] sm:$0xff]  ;;  %v609_v11 = vld [vmem:[%s4239_s19 + $0xc30] sm:$0xff] }
 0x131   : > { %2442 = vmatpush.msra.mxu1 %v1361_v50  ;;  %4004 = vmatmul.msk.f32.gmra.mxu0 %vm1426_vm1, %v4736_v7 }
 0x132   : > { %2416 = vmatpush.msra.mxu0 %v897_v8  ;;  %2466 = vmatpush.msrb.mxu3 %v492_v1  ;;  %3790 = vst [vmem:[%s4684_s26 + $0x20] sm:$0xff] %v1906_v15  ;;  %v869_v1 = vld [vmem:[%s4239_s19 + $0x1450] sm:$0xff]  ;;  %v840_v15 = vld [vmem:[%s4239_s19 + $0x1368] sm:$0xff] }
 0x133   : > { %2486 = vmatpush.msrb.mxu2 %v1130_v12  ;;  %2443 = vmatpush.msra.mxu1 %v1332_v13  ;;  %v1333_v13 = vld [vmem:[%s4239_s19 + $0x22d0] sm:$0xff] }
 0x134   : > { %2248 = vmatmul.f32.gmra.mxu1 %v4818_v9  ;;  %2417 = vmatpush.msra.mxu0 %v868_v42 }
 0x135   : > { %2467 = vmatpush.msrb.mxu3 %v463_v21  ;;  %2487 = vmatpush.msrb.mxu2 %v1101_v22  ;;  %v1102_v21 = vld [vmem:[%s4239_s19 + $0x1b98] sm:$0xff]  ;;  %v811_v22 = vld [vmem:[%s4239_s19 + $0x1280] sm:$0xff] }
 0x136   : > { %2444 = vmatpush.msra.mxu1 %v1303_v23  ;;  %2274 = vmatmul.f32.gmra.mxu3 %v4829_v18  ;;  %v1275_v23 = vld [vmem:[%s4239_s19 + $0x2100] sm:$0xff] }
 0x137   : > { %2418 = vmatpush.msra.mxu0 %v839_v25  ;;  %2468 = vmatpush.msrb.mxu3 %v434_v26  ;;  %v1911_v39 = vpop.f32.mrf.mxu3  ;;  %v5066_v26 = vld [vmem:[%s6295_s0] sm:$0xff] }
 0x138   : > { %2488 = vmatpush.msrb.mxu2 %v1072_v27  ;;  %2445 = vmatpush.msra.mxu1 %v1274_v29  ;;  %v1882_v36 = vpop.f32.mrf.mxu0  ;;  %v1859_v40 = vpop.f32.mrf.mxu2  ;;  %v1073_v27 = vld [vmem:[%s4239_s19 + $0x1ab0] sm:$0xff]  ;;  %v782_v29 = vld [vmem:[%s4239_s19 + $0x1198] sm:$0xff] }
 0x139   : > { %4008 = vmatmul.msk.f32.gmra.mxu2 %vm1426_vm1, %v4736_v7  ;;  %2419 = vmatpush.msra.mxu0 %v810_v31  ;;  %v1883_v41 = vadd.f32 %v1882_v36, %v1857_v24  ;;  %v752_v7 = vld [vmem:[%s4239_s19 + $0x10a8] sm:$0xff]  ;;  %v1931_v43 = vpop.f32.mrf.mxu1  ;;  %v1860_v54 = vadd.f32 %v1859_v40, %v4731_v6  ;;  %v522_v31 = vld [vmem:[%s4239_s19 + $0x978] sm:$0xff]  ;;  %v1015_v40 = vld [vmem:[%s4239_s19 + $0x18e0] sm:$0xff] }
 0x13a   : > { %2469 = vmatpush.msrb.mxu3 %v405_v32  ;;  %2489 = vmatpush.msrb.mxu2 %v1043_v10  ;;  %v1932_v58 = vadd.f32 %v1931_v43, %v4661_v17  ;;  %v1246_v24 = vld [vmem:[%s4239_s19 + $0x2018] sm:$0xff]  ;;  %v1044_v32 = vld [vmem:[%s4239_s19 + $0x19c8] sm:$0xff] }
 0x13b   : > { %2446 = vmatpush.msra.mxu1 %v1245_v33  ;;  %2320 = vmatmul.f32.vlgmr.msrb.gmra.mxu0 %v4751_v19  ;;  %v1909_v48 = vadd.f32 %v1908_v16, %v1883_v41  ;;  %v723_v19 = vld [vmem:[%s4239_s19 + $0xfc0] sm:$0xff]  ;;  %v1304_v16 = vld [vmem:[%s4239_s19 + $0x21e8] sm:$0xff]  ;;  %v753_v33 = vld [vmem:[%s4239_s19 + $0x10b0] sm:$0xff] }
 0x13c   : > { %2420 = vmatpush.msra.mxu0 %v781_v34  ;;  %2470 = vmatpush.msrb.mxu3 %v376_v35  ;;  %v1188_v43 = vld [vmem:[%s4239_s19 + $0x1e48] sm:$0xff] }
 0x13d   : > { %2490 = vmatpush.msrb.mxu2 %v1014_v37  ;;  %2447 = vmatpush.msra.mxu1 %v1216_v38  ;;  %3820 = vst [vmem:[%s4684_s26 + $0x108] sm:$0xff] %v1909_v48  ;;  %v493_v37 = vld [vmem:[%s4239_s19 + $0x890] sm:$0xff]  ;;  %v1159_v48 = vld [vmem:[%s4239_s19 + $0x1d60] sm:$0xff] }
 0x13e   : > { %2346 = vmatmul.f32.vlgmr.msrb.gmra.mxu1 %v4763_v30  ;;  %2421 = vmatpush.msra.mxu0 %v752_v7  ;;  %v694_v30 = vld [vmem:[%s4239_s19 + $0xed8] sm:$0xff]  ;;  %v1217_v38 = vld [vmem:[%s4239_s19 + $0x1f30] sm:$0xff]  ;;  %v464_v7 = vld [vmem:[%s4239_s19 + $0x7a8] sm:$0xff] }
 0x13f   : > { %2471 = vmatpush.msrb.mxu3 %v347_v46  ;;  %2491 = vmatpush.msrb.mxu2 %v985_v47  ;;  %v695_v46 = vld [vmem:[%s4239_s19 + $0xee0] sm:$0xff] }
 0x140   : > { %2448 = vmatpush.msra.mxu1 %v1187_v49  ;;  %4010 = vmatmul.msk.f32.vlgmr.msra.gmra.mxu3 %vm1426_vm1, %v5030_v20  ;;  %v435_v47 = vld [vmem:[%s4239_s19 + $0x6c0] sm:$0xff] }
 0x141   : > { %2422 = vmatpush.msra.mxu0 %v723_v19  ;;  %2472 = vmatpush.msrb.mxu3 %v318_v51  ;;  %v1983_v8 = vpop.f32.mrf.mxu3  ;;  %v5099_v19 = vld [vmem:[%s6295_s0 + $0x18] sm:$0xff]  ;;  %v957_v51 = vld [vmem:[%s4239_s19 + $0x1710] sm:$0xff] }
 0x142   : > { %2492 = vmatpush.msrb.mxu2 %v956_v53  ;;  %2449 = vmatpush.msra.mxu1 %v1158_v28  ;;  %v1885_v63 = vpop.f32.mrf.mxu0  ;;  %v1957_v4 = vpop.f32.mrf.mxu2  ;;  %v1392_v53 = vld [vmem:[%s4239_s19 + $0x24a8] sm:$0x1f] }
 0x143   : > { %2423 = vmatpush.msra.mxu0 %v694_v30  ;;  %2473 = vmatpush.msrb.mxu3 %v289_v44  ;;  %v1886_v3 = vadd.f32 %v1885_v63, %v1860_v54  ;;  %v1934_v50 = vpop.f32.mrf.mxu1  ;;  %v1958_v60 = vadd.f32 %v1957_v4, %v1932_v58  ;;  %v406_v30 = vld [vmem:[%s4239_s19 + $0x5d8] sm:$0xff]  ;;  %v668_v44 = vld [vmem:[%s4239_s19 + $0xe08] sm:$0xff]  ;;  %v1363_v58 = vld [vmem:[%s4239_s19 + $0x23c0] sm:$0xff] }
 0x144   : > { %2493 = vmatpush.msrb.mxu2 %v927_v56  ;;  %2538 = vmatpush.msrb.mxu1 %v667_v57  ;;  %v1935_v25 = vadd.f32 %v1934_v50, %v4706_v45  ;;  %v928_v54 = vld [vmem:[%s4239_s19 + $0x1628] sm:$0xff]  ;;  %v377_v63 = vld [vmem:[%s4239_s19 + $0x4f0] sm:$0xff] }
 0x145   : > { %4017 = vmatpush.msk.msrb.mxu0 %vm1436_vm0, %v1391_v59  ;;  %2474 = vmatpush.msrb.mxu3 %v260_v61  ;;  %v1912_v12 = vadd.f32 %v1911_v39, %v1886_v3  ;;  %v1984_v42 = vadd.f32 %v1983_v8, %v1958_v60  ;;  %v5085_v39 = vld [vmem:[%s6295_s0 + $0x28] sm:$0xff]  ;;  %v610_v60 = vld [vmem:[%s4239_s19 + $0xc38] sm:$0xff]  ;;  %v5128_v8 = vld [vmem:[%s6295_s0 + $0x40] sm:$0x7] }
 0x146   : > { %2323 = vmatmul.f32.gmra.mxu0 %v4788_v52  ;;  %2494 = vmatpush.msrb.mxu2 %v898_v62  ;;  %v580_v52 = vld [vmem:[%s4239_s19 + $0xb48] sm:$0xff] }
 0x147   : > { %2539 = vmatpush.msrb.mxu1 %v638_v0  ;;  %2520 = vmatpush.msrb.mxu0 %v1362_v2  ;;  %3849 = vst [vmem:[%s4684_s26 + $0x1f0] sm:$0x7] %v1912_v12  ;;  %v5112_v62 = vld [vmem:[%s6295_s0 + $0x8] sm:$0xff]  ;;  %v639_v0 = vld [vmem:[%s4239_s19 + $0xd20] sm:$0xff]  ;;  %v1334_v2 = vld [vmem:[%s4239_s19 + $0x22d8] sm:$0xff] }
 0x148   : > { %2349 = vmatmul.f32.gmra.mxu1 %v4798_v55  ;;  %2475 = vmatpush.msrb.mxu3 %v231_v5  ;;  %3791 = vst [vmem:[%s4684_s26 + $0x28] sm:$0xff] %v1984_v42  ;;  %v551_v55 = vld [vmem:[%s4239_s19 + $0xa60] sm:$0xff]  ;;  %v348_v50 = vld [vmem:[%s4239_s19 + $0x408] sm:$0xff]  ;;  %v5139_v42 = vld [vmem:[%s6295_s0 + $0x30] sm:$0x7] }
 0x149   : > { %2495 = vmatpush.msrb.mxu2 %v869_v1  ;;  %2540 = vmatpush.msrb.mxu1 %v609_v11  ;;  %v899_v5 = vld [vmem:[%s4239_s19 + $0x1540] sm:$0xff]  ;;  %v870_v1 = vld [vmem:[%s4239_s19 + $0x1458] sm:$0xff]  ;;  %v1305_v11 = vld [vmem:[%s4239_s19 + $0x21f0] sm:$0xff] }
 0x14a   : > { %2521 = vmatpush.msrb.mxu0 %v1333_v13  ;;  %2564 = vmatpush.msra.mxu3 %v1131_v14  ;;  %v319_v12 = vld [vmem:[%s4239_s19 + $0x320] sm:$0xff]  ;;  %v581_v13 = vld [vmem:[%s4239_s19 + $0xb50] sm:$0xff] }
 0x14b   : > { %2496 = vmatpush.msrb.mxu2 %v840_v15  ;;  %2541 = vmatpush.msrb.mxu1 %v580_v52  ;;  %v1986_v36 = vpop.f32.mrf.mxu3  ;;  %v841_v15 = vld [vmem:[%s4239_s19 + $0x1370] sm:$0xff]  ;;  %v1276_v52 = vld [vmem:[%s4239_s19 + $0x2108] sm:$0xff] }
 0x14c   : > { %2398 = vmatmul.f32.vlgmr.msra.gmra.mxu2 %v5066_v26  ;;  %2522 = vmatpush.msrb.mxu0 %v1304_v16  ;;  %v1960_v10 = vpop.f32.mrf.mxu2 }
 0x14d   : > { %2565 = vmatpush.msra.mxu3 %v1102_v21  ;;  %2497 = vmatpush.msrb.mxu2 %v811_v22  ;;  %v1937_v34 = vpop.f32.mrf.mxu1  ;;  %v1961_v35 = vadd.f32 %v1960_v10, %v1935_v25  ;;  %v290_v21 = vld [vmem:[%s4239_s19 + $0x238] sm:$0xff]  ;;  %v552_v22 = vld [vmem:[%s4239_s19 + $0xa68] sm:$0xff]  ;;  %v1247_v25 = vld [vmem:[%s4239_s19 + $0x2020] sm:$0xff] }
 0x14e   : > { %2542 = vmatpush.msrb.mxu1 %v551_v55  ;;  %2523 = vmatpush.msrb.mxu0 %v1275_v23  ;;  %v1938_v49 = vadd.f32 %v1937_v34, %v4731_v6  ;;  %v812_v55 = vld [vmem:[%s4239_s19 + $0x1288] sm:$0xff]  ;;  %v1218_v10 = vld [vmem:[%s4239_s19 + $0x1f38] sm:$0xff] }
 0x14f   : > { %2566 = vmatpush.msra.mxu3 %v1073_v27  ;;  %2326 = vmatmul.f32.gmra.mxu0 %v4818_v9  ;;  %v1987_v41 = vadd.f32 %v1986_v36, %v1961_v35  ;;  %v724_v9 = vld [vmem:[%s4239_s19 + $0xfc8] sm:$0xff]  ;;  %v494_v35 = vld [vmem:[%s4239_s19 + $0x898] sm:$0xff] }
 0x150   : > { %2498 = vmatpush.msrb.mxu2 %v782_v29  ;;  %2543 = vmatpush.msrb.mxu1 %v522_v31  ;;  %v5153_v31 = vld [vmem:[%s6295_s0 + $0x20] sm:$0xff]  ;;  %v232_v34 = vld [vmem:[%s4239_s19 + $0x68] sm:$0xff]  ;;  %v754_v36 = vld [vmem:[%s4239_s19 + $0x10b8] sm:$0xff] }
 0x151   : > { %2524 = vmatpush.msrb.mxu0 %v1246_v24  ;;  %2567 = vmatpush.msra.mxu3 %v1044_v32  ;;  %3821 = vst [vmem:[%s4684_s26 + $0x110] sm:$0xff] %v1987_v41  ;;  %v261_v24 = vld [vmem:[%s4239_s19 + $0x150] sm:$0xff]  ;;  %v523_v32 = vld [vmem:[%s4239_s19 + $0x980] sm:$0xff] }
 0x152   : > { %2352 = vmatmul.f32.gmra.mxu1 %v4829_v18  ;;  %2499 = vmatpush.msrb.mxu2 %v753_v33  ;;  %v986_v18 = vld [vmem:[%s4239_s19 + $0x17f8] sm:$0xff]  ;;  %v783_v33 = vld [vmem:[%s4239_s19 + $0x11a0] sm:$0xff]  ;;  %v725_v41 = vld [vmem:[%s4239_s19 + $0xfd0] sm:$0xff] }
 0x153   : > { %2544 = vmatpush.msrb.mxu1 %v493_v37  ;;  %4011 = vmatmul.msk.f32.gmra.mxu3 %vm1426_vm1, %v5085_v39  ;;  %v1189_v37 = vld [vmem:[%s4239_s19 + $0x1e50] sm:$0xff] }
 0x154   : > { %2525 = vmatpush.msrb.mxu0 %v1217_v38  ;;  %2568 = vmatpush.msra.mxu3 %v1015_v40  ;;  %v2009_v28 = vpop.f32.mrf.mxu0  ;;  %v1132_v38 = vld [vmem:[%s4239_s19 + $0x1c88] sm:$0xff]  ;;  %v465_v40 = vld [vmem:[%s4239_s19 + $0x7b0] sm:$0xff] }
 0x155   : > { %2500 = vmatpush.msrb.mxu2 %v724_v9  ;;  %2545 = vmatpush.msrb.mxu1 %v464_v7  ;;  %v1963_v56 = vpop.f32.mrf.mxu2  ;;  %v2010_v3 = vadd.f32 %v2009_v28, %v4661_v17  ;;  %v1160_v9 = vld [vmem:[%s4239_s19 + $0x1d68] sm:$0xff] }
 0x156   : > { %2401 = vmatmul.f32.gmra.mxu2 %v5099_v19  ;;  %2526 = vmatpush.msrb.mxu0 %v1188_v43  ;;  %v1989_v57 = vpop.f32.mrf.mxu3  ;;  %v1964_v59 = vadd.f32 %v1963_v56, %v1938_v49  ;;  %v1103_v43 = vld [vmem:[%s4239_s19 + $0x1ba0] sm:$0xff]  ;;  %v1045_v56 = vld [vmem:[%s4239_s19 + $0x19d0] sm:$0xff] }
 0x157   : > { %2569 = vmatpush.msra.mxu3 %v986_v18  ;;  %2501 = vmatpush.msrb.mxu2 %v695_v46  ;;  %v2035_v61 = vpop.f32.mrf.mxu1  ;;  %v436_v18 = vld [vmem:[%s4239_s19 + $0x6c8] sm:$0xff]  ;;  %v669_v46 = vld [vmem:[%s4239_s19 + $0xe10] sm:$0xff] }
 0x158   : > { %2546 = vmatpush.msrb.mxu1 %v435_v47  ;;  %2527 = vmatpush.msrb.mxu0 %v1159_v48  ;;  %v1990_v4 = vadd.f32 %v1989_v57, %v1964_v59  ;;  %v2036_v14 = vadd.f32 %v2035_v61, %v2010_v3  ;;  %v696_v47 = vld [vmem:[%s4239_s19 + $0xee8] sm:$0xff]  ;;  %v1074_v48 = vld [vmem:[%s4239_s19 + $0x1ab8] sm:$0xff]  ;;  %v611_v61 = vld [vmem:[%s4239_s19 + $0xc40] sm:$0xff] }
 0x159   : > { %2570 = vmatpush.msra.mxu3 %v957_v51  ;;  %4021 = vmatpush.msk.msra.mxu2 %vm1436_vm0, %v1392_v53  ;;  %v5185_v51 = vld [vmem:[%s6295_s0 + $0x38] sm:$0x7]  ;;  %v407_v53 = vld [vmem:[%s4239_s19 + $0x5e0] sm:$0xff] }
 0x15a   : > { %2424 = vmatmul.f32.vlgmr.msra.gmra.mxu0 %v5112_v62  ;;  %2547 = vmatpush.msrb.mxu1 %v406_v30  ;;  %3850 = vst [vmem:[%s4684_s26 + $0x1f8] sm:$0x7] %v1990_v4  ;;  %v378_v57 = vld [vmem:[%s4239_s19 + $0x4f8] sm:$0xff]  ;;  %v1335_v3 = vld [vmem:[%s4239_s19 + $0x22e0] sm:$0xff] }
 0x15b   : > { %2616 = vmatpush.msra.mxu0 %v668_v44  ;;  %2571 = vmatpush.msra.mxu3 %v928_v54  ;;  %v1393_v44 = vld [vmem:[%s4239_s19 + $0x24b0] sm:$0x1f]  ;;  %v640_v54 = vld [vmem:[%s4239_s19 + $0xd28] sm:$0xff]  ;;  %v582_v4 = vld [vmem:[%s4239_s19 + $0xb58] sm:$0xff] }
 0x15c   : > { %2598 = vmatpush.msra.mxu2 %v1363_v58  ;;  %4014 = vmatmul.msk.f32.vlgmr.msra.gmra.mxu1 %vm1426_vm1, %v5030_v20  ;;  %v1364_v58 = vld [vmem:[%s4239_s19 + $0x23c8] sm:$0xff] }
 0x15d   : > { %2548 = vmatpush.msrb.mxu1 %v377_v63  ;;  %2617 = vmatpush.msra.mxu0 %v639_v0  ;;  %v1016_v63 = vld [vmem:[%s4239_s19 + $0x18e8] sm:$0xff] }
 0x15e   : > { %4012 = vmatmul.msk.f32.gmra.mxu3 %vm1426_vm1, %v5128_v8  ;;  %2599 = vmatpush.msra.mxu2 %v1334_v2  ;;  %v349_v2 = vld [vmem:[%s4239_s19 + $0x410] sm:$0xff] }
 0x15f   : > { %2572 = vmatpush.msra.mxu3 %v899_v5  ;;  %2549 = vmatpush.msrb.mxu1 %v348_v50  ;;  %v2012_v16 = vpop.f32.mrf.mxu0  ;;  %v2061_v23 = vpop.f32.mrf.mxu3  ;;  %v987_v50 = vld [vmem:[%s4239_s19 + $0x1800] sm:$0xff] }
 0x160   : > { %2618 = vmatpush.msra.mxu0 %v610_v60  ;;  %2404 = vmatmul.f32.gmra.mxu2 %v5139_v42  ;;  %v2062_v29 = vadd.f32 %v2061_v23, %v2036_v14  ;;  %v2013_v28 = vadd.f32 %v2012_v16, %v4706_v45  ;;  %v553_v14 = vld [vmem:[%s4239_s19 + $0xa70] sm:$0xff]  ;;  %v291_v16 = vld [vmem:[%s4239_s19 + $0x240] sm:$0xff] }
 0x161   : > { %2573 = vmatpush.msra.mxu3 %v870_v1  ;;  %2600 = vmatpush.msra.mxu2 %v1305_v11  ;;  %v5148_v27 = vpop.f32.mrf.mxu1  ;;  %v320_v11 = vld [vmem:[%s4239_s19 + $0x328] sm:$0xff] }
 0x162   : > { %2550 = vmatpush.msrb.mxu1 %v319_v12  ;;  %2619 = vmatpush.msra.mxu0 %v581_v13  ;;  %3792 = vst [vmem:[%s4684_s26 + $0x30] sm:$0xff] %v2062_v29  ;;  %v2039_v0 = vadd.f32 %v5148_v27, %v2013_v28  ;;  %v1306_v12 = vld [vmem:[%s4239_s19 + $0x21f8] sm:$0xff]  ;;  %v929_v27 = vld [vmem:[%s4239_s19 + $0x1630] sm:$0xff]  ;;  %v408_v28 = vld [vmem:[%s4239_s19 + $0x5e8] sm:$0xff] }
 0x163   : > { %2574 = vmatpush.msra.mxu3 %v841_v15  ;;  %2601 = vmatpush.msra.mxu2 %v1276_v52  ;;  %v958_v15 = vld [vmem:[%s4239_s19 + $0x1718] sm:$0xff] }
 0x164   : > { %2427 = vmatmul.f32.gmra.mxu0 %v5153_v31  ;;  %2551 = vmatpush.msrb.mxu1 %v290_v21  ;;  %v1277_v21 = vld [vmem:[%s4239_s19 + $0x2110] sm:$0xff]  ;;  %v262_v29 = vld [vmem:[%s4239_s19 + $0x158] sm:$0xff] }
 0x165   : > { %2620 = vmatpush.msra.mxu0 %v552_v22  ;;  %2575 = vmatpush.msra.mxu3 %v812_v55 }
 0x166   : > { %2602 = vmatpush.msra.mxu2 %v1247_v25  ;;  %4015 = vmatmul.msk.f32.gmra.mxu1 %vm1426_vm1, %v5085_v39  ;;  %v524_v25 = vld [vmem:[%s4239_s19 + $0x988] sm:$0xff] }
 0x167   : > { %2552 = vmatpush.msrb.mxu1 %v261_v24  ;;  %2621 = vmatpush.msra.mxu0 %v523_v32  ;;  %v1248_v24 = vld [vmem:[%s4239_s19 + $0x2028] sm:$0xff]  ;;  %v495_v32 = vld [vmem:[%s4239_s19 + $0x8a0] sm:$0xff] }
 0x168   : > { %2476 = vmatmul.f32.vlgmr.msrb.gmra.mxu3 %v5066_v26  ;;  %2603 = vmatpush.msra.mxu2 %v1218_v10  ;;  %v5173_v7 = vpop.f32.mrf.mxu0 }
 0x169   : > { %2576 = vmatpush.msra.mxu3 %v783_v33  ;;  %2553 = vmatpush.msrb.mxu1 %v232_v34  ;;  %v2016_v22 = vadd.f32 %v5173_v7, %v4731_v6  ;;  %v900_v33 = vld [vmem:[%s4239_s19 + $0x1548] sm:$0xff] }
 0x16a   : > { %2622 = vmatpush.msra.mxu0 %v494_v35  ;;  %2502 = vmatmul.f32.vlgmr.msrb.gmra.mxu2 %v5112_v62  ;;  %v233_v35 = vld [vmem:[%s4239_s19 + $0x70] sm:$0xff] }
 0x16b   : > { %2577 = vmatpush.msra.mxu3 %v754_v36  ;;  %2604 = vmatpush.msra.mxu2 %v1189_v37  ;;  %v5180_v49 = vpop.f32.mrf.mxu1  ;;  %v2087_v30 = vpop.f32.mrf.mxu2  ;;  %v1219_v36 = vld [vmem:[%s4239_s19 + $0x1f40] sm:$0xff]  ;;  %v466_v37 = vld [vmem:[%s4239_s19 + $0x7b8] sm:$0xff] }
 0x16c   : > { %2642 = vmatpush.msra.mxu1 %v1132_v38  ;;  %2623 = vmatpush.msra.mxu0 %v465_v40  ;;  %v2088_v59 = vadd.f32 %v2087_v30, %v4661_v17  ;;  %v2042_v34 = vadd.f32 %v5180_v49, %v2016_v22  ;;  %v871_v38 = vld [vmem:[%s4239_s19 + $0x1460] sm:$0xff] }
 0x16d   : > { %2578 = vmatpush.msra.mxu3 %v725_v41  ;;  %2605 = vmatpush.msra.mxu2 %v1160_v9  ;;  %v1133_v41 = vld [vmem:[%s4239_s19 + $0x1c90] sm:$0xff]  ;;  %v1190_v9 = vld [vmem:[%s4239_s19 + $0x1e58] sm:$0xff] }
 0x16e   : > { %2643 = vmatpush.msra.mxu1 %v1103_v43  ;;  %2430 = vmatmul.f32.gmra.mxu0 %v5185_v51 }
 0x16f   : > { %2624 = vmatpush.msra.mxu0 %v436_v18  ;;  %2694 = vmatpush.msrb.mxu2 %v669_v46  ;;  %v437_v18 = vld [vmem:[%s4239_s19 + $0x6d0] sm:$0xff] }
 0x170   : > { %2579 = vmatpush.msra.mxu3 %v696_v47  ;;  %2644 = vmatpush.msra.mxu1 %v1074_v48  ;;  %v842_v47 = vld [vmem:[%s4239_s19 + $0x1378] sm:$0xff]  ;;  %v1104_v48 = vld [vmem:[%s4239_s19 + $0x1ba8] sm:$0xff] }
 0x171   : > { %4016 = vmatmul.msk.f32.gmra.mxu1 %vm1426_vm1, %v5128_v8  ;;  %2625 = vmatpush.msra.mxu0 %v407_v53  ;;  %v1161_v53 = vld [vmem:[%s4239_s19 + $0x1d70] sm:$0xff] }
 0x172   : > { %4025 = vmatpush.msk.msrb.mxu3 %vm1436_vm0, %v1393_v44  ;;  %2695 = vmatpush.msrb.mxu2 %v640_v54  ;;  %v2064_v1 = vpop.f32.mrf.mxu3  ;;  %v813_v54 = vld [vmem:[%s4239_s19 + $0x1290] sm:$0xff] }
 0x173   : > { %2479 = vmatmul.f32.gmra.mxu3 %v5099_v19  ;;  %2645 = vmatpush.msra.mxu1 %v1045_v56  ;;  %v2113_v5 = vpop.f32.mrf.mxu0  ;;  %v2065_v13 = vadd.f32 %v2064_v1, %v2039_v0  ;;  %v1075_v56 = vld [vmem:[%s4239_s19 + $0x1ac0] sm:$0xff]  ;;  %v641_v0 = vld [vmem:[%s4239_s19 + $0xd30] sm:$0xff] }
 0x174   : > { %2626 = vmatpush.msra.mxu0 %v378_v57  ;;  %2676 = vmatpush.msrb.mxu3 %v1364_v58  ;;  %v2114_v60 = vadd.f32 %v2113_v5, %v2088_v59  ;;  %v670_v57 = vld [vmem:[%s4239_s19 + $0xe18] sm:$0xff]  ;;  %v379_v58 = vld [vmem:[%s4239_s19 + $0x500] sm:$0xff]  ;;  %v784_v59 = vld [vmem:[%s4239_s19 + $0x11a8] sm:$0xff] }
 0x175   : > { %2696 = vmatpush.msrb.mxu2 %v611_v61  ;;  %2646 = vmatpush.msra.mxu1 %v1016_v63  ;;  %v2139_v52 = vpop.f32.mrf.mxu1  ;;  %3822 = vst [vmem:[%s4684_s26 + $0x118] sm:$0xff] %v2065_v13  ;;  %v2090_v23 = vpop.f32.mrf.mxu2  ;;  %v1046_v63 = vld [vmem:[%s4239_s19 + $0x19d8] sm:$0xff]  ;;  %v1017_v5 = vld [vmem:[%s4239_s19 + $0x18f0] sm:$0xff]  ;;  %v988_v13 = vld [vmem:[%s4239_s19 + $0x1808] sm:$0xff] }
 0x176   : > { %2505 = vmatmul.f32.gmra.mxu2 %v5153_v31  ;;  %2627 = vmatpush.msra.mxu0 %v349_v2  ;;  %v2140_v55 = vadd.f32 %v2139_v52, %v2114_v60  ;;  %v2091_v10 = vadd.f32 %v2090_v23, %v4706_v45  ;;  %v350_v2 = vld [vmem:[%s4239_s19 + $0x418] sm:$0xff]  ;;  %v583_v52 = vld [vmem:[%s4239_s19 + $0xb60] sm:$0xff] }
 0x177   : > { %2677 = vmatpush.msrb.mxu3 %v1335_v3  ;;  %2697 = vmatpush.msrb.mxu2 %v582_v4  ;;  %v755_v3 = vld [vmem:[%s4239_s19 + $0x10c0] sm:$0xff] }
 0x178   : > { %2647 = vmatpush.msra.mxu1 %v987_v50  ;;  %4018 = vmatmul.msk.f32.vlgmr.msrb.gmra.mxu0 %vm1426_vm1, %v5030_v20  ;;  %3793 = vst [vmem:[%s4684_s26 + $0x38] sm:$0xff] %v2140_v55  ;;  %v612_v50 = vld [vmem:[%s4239_s19 + $0xc48] sm:$0xff]  ;;  %v697_v55 = vld [vmem:[%s4239_s19 + $0xef0] sm:$0xff]  ;;  %v959_v23 = vld [vmem:[%s4239_s19 + $0x1720] sm:$0xff] }
 0x179   : > { %2628 = vmatpush.msra.mxu0 %v320_v11  ;;  %2678 = vmatpush.msrb.mxu3 %v1306_v12  ;;  %v321_v11 = vld [vmem:[%s4239_s19 + $0x330] sm:$0xff]  ;;  %v726_v12 = vld [vmem:[%s4239_s19 + $0xfd8] sm:$0xff] }
 0x17a   : > { %2698 = vmatpush.msrb.mxu2 %v553_v14  ;;  %2648 = vmatpush.msra.mxu1 %v958_v15 }
 0x17b   : > { %2629 = vmatpush.msra.mxu0 %v291_v16  ;;  %2679 = vmatpush.msrb.mxu3 %v1277_v21  ;;  %v292_v16 = vld [vmem:[%s4239_s19 + $0x248] sm:$0xff] }
 0x17c   : > { %2699 = vmatpush.msrb.mxu2 %v524_v25  ;;  %2482 = vmatmul.f32.gmra.mxu3 %v5139_v42  ;;  %v554_v25 = vld [vmem:[%s4239_s19 + $0xa78] sm:$0xff] }
 0x17d   : > { %2649 = vmatpush.msra.mxu1 %v929_v27  ;;  %2630 = vmatpush.msra.mxu0 %v262_v29  ;;  %v2116_v40 = vpop.f32.mrf.mxu0  ;;  %v2067_v43 = vpop.f32.mrf.mxu3  ;;  %v263_v27 = vld [vmem:[%s4239_s19 + $0x160] sm:$0xff]  ;;  %v1394_v29 = vld [vmem:[%s4239_s19 + $0x24b8] sm:$0x1f] }
 0x17e   : > { %2680 = vmatpush.msrb.mxu3 %v1248_v24  ;;  %2700 = vmatpush.msrb.mxu2 %v495_v32  ;;  %v2117_v7 = vadd.f32 %v2116_v40, %v2091_v10  ;;  %v2068_v46 = vadd.f32 %v2067_v43, %v2042_v34  ;;  %v930_v32 = vld [vmem:[%s4239_s19 + $0x1638] sm:$0xff]  ;;  %v525_v10 = vld [vmem:[%s4239_s19 + $0x990] sm:$0xff]  ;;  %v467_v43 = vld [vmem:[%s4239_s19 + $0x7c0] sm:$0xff] }
 0x17f   : > { %2508 = vmatmul.f32.gmra.mxu2 %v5185_v51  ;;  %2650 = vmatpush.msra.mxu1 %v900_v33  ;;  %v2142_v49 = vpop.f32.mrf.mxu1  ;;  %v2093_v44 = vpop.f32.mrf.mxu2  ;;  %v234_v33 = vld [vmem:[%s4239_s19 + $0x78] sm:$0xff]  ;;  %v1365_v34 = vld [vmem:[%s4239_s19 + $0x23d0] sm:$0xff] }
 0x180   : > { %2631 = vmatpush.msra.mxu0 %v233_v35  ;;  %2681 = vmatpush.msrb.mxu3 %v1219_v36  ;;  %3851 = vst [vmem:[%s4684_s26 + $0x200] sm:$0x7] %v2068_v46  ;;  %v2143_v30 = vadd.f32 %v2142_v49, %v2117_v7  ;;  %v2094_v61 = vadd.f32 %v2093_v44, %v4731_v6  ;;  %v901_v36 = vld [vmem:[%s4239_s19 + $0x1550] sm:$0xff]  ;;  %v872_v7 = vld [vmem:[%s4239_s19 + $0x1468] sm:$0xff]  ;;  %v438_v49 = vld [vmem:[%s4239_s19 + $0x6d8] sm:$0xff] }
 0x181   : > { %2701 = vmatpush.msrb.mxu2 %v466_v37  ;;  %2651 = vmatpush.msra.mxu1 %v871_v38  ;;  %v496_v37 = vld [vmem:[%s4239_s19 + $0x8a8] sm:$0xff]  ;;  %v409_v44 = vld [vmem:[%s4239_s19 + $0x5f0] sm:$0xff] }
 0x182   : > { %2720 = vmatpush.msrb.mxu0 %v1133_v41  ;;  %2682 = vmatpush.msrb.mxu3 %v1190_v9  ;;  %3823 = vst [vmem:[%s4684_s26 + $0x120] sm:$0xff] %v2143_v30  ;;  %v1134_v41 = vld [vmem:[%s4239_s19 + $0x1c98] sm:$0xff]  ;;  %v1336_v9 = vld [vmem:[%s4239_s19 + $0x22e8] sm:$0xff] }
 0x183   : > { %2702 = vmatpush.msrb.mxu2 %v437_v18  ;;  %2554 = vmatmul.f32.vlgmr.msrb.gmra.mxu1 %v5066_v26  ;;  %v1105_v18 = vld [vmem:[%s4239_s19 + $0x1bb0] sm:$0xff]  ;;  %v814_v30 = vld [vmem:[%s4239_s19 + $0x1298] sm:$0xff] }
 0x184   : > { %2652 = vmatpush.msra.mxu1 %v842_v47  ;;  %2721 = vmatpush.msrb.mxu0 %v1104_v48  ;;  %v1307_v47 = vld [vmem:[%s4239_s19 + $0x2200] sm:$0xff] }
 0x185   : > { %2683 = vmatpush.msrb.mxu3 %v1161_v53  ;;  %2703 = vmatpush.msrb.mxu2 %v408_v28  ;;  %v843_v48 = vld [vmem:[%s4239_s19 + $0x1380] sm:$0xff]  ;;  %v1076_v53 = vld [vmem:[%s4239_s19 + $0x1ac8] sm:$0xff]  ;;  %v1278_v28 = vld [vmem:[%s4239_s19 + $0x2118] sm:$0xff] }
 0x186   : > { %2580 = vmatmul.f32.vlgmr.msra.gmra.mxu3 %v5112_v62  ;;  %2653 = vmatpush.msra.mxu1 %v813_v54  ;;  %v1047_v54 = vld [vmem:[%s4239_s19 + $0x19e0] sm:$0xff] }
 0x187   : > { %2722 = vmatpush.msrb.mxu0 %v1075_v56  ;;  %2772 = vmatpush.msra.mxu3 %v670_v57  ;;  %v2119_v4 = vpop.f32.mrf.mxu0  ;;  %v2165_v1 = vpop.f32.mrf.mxu3  ;;  %v1249_v56 = vld [vmem:[%s4239_s19 + $0x2030] sm:$0xff] }
 0x188   : > { %2704 = vmatpush.msrb.mxu2 %v379_v58  ;;  %2654 = vmatpush.msra.mxu1 %v784_v59  ;;  %v2120_v60 = vadd.f32 %v2119_v4, %v2094_v61  ;;  %v2166_v14 = vadd.f32 %v2165_v1, %v4661_v17  ;;  %v785_v57 = vld [vmem:[%s4239_s19 + $0x11b0] sm:$0xff]  ;;  %v380_v58 = vld [vmem:[%s4239_s19 + $0x508] sm:$0xff]  ;;  %v1018_v61 = vld [vmem:[%s4239_s19 + $0x18f8] sm:$0xff] }
 0x189   : > { %4022 = vmatmul.msk.f32.vlgmr.msra.gmra.mxu2 %vm1426_vm1, %v5030_v20  ;;  %2723 = vmatpush.msrb.mxu0 %v1046_v63  ;;  %v2191_v22 = vpop.f32.mrf.mxu2  ;;  %v1220_v63 = vld [vmem:[%s4239_s19 + $0x1f48] sm:$0xff]  ;;  %v351_v4 = vld [vmem:[%s4239_s19 + $0x420] sm:$0xff] }
 0x18a   : > { %2773 = vmatpush.msra.mxu3 %v641_v0  ;;  %2705 = vmatpush.msrb.mxu2 %v350_v2  ;;  %v2145_v15 = vpop.f32.mrf.mxu1  ;;  %v2192_v24 = vadd.f32 %v2191_v22, %v2166_v14  ;;  %v756_v2 = vld [vmem:[%s4239_s19 + $0x10c8] sm:$0xff]  ;;  %v727_v1 = vld [vmem:[%s4239_s19 + $0xfe0] sm:$0xff]  ;;  %v1162_v14 = vld [vmem:[%s4239_s19 + $0x1d78] sm:$0xff] }
 0x18b   : > { %4019 = vmatmul.msk.f32.gmra.mxu0 %vm1426_vm1, %v5085_v39  ;;  %2655 = vmatpush.msra.mxu1 %v755_v3  ;;  %v2146_v21 = vadd.f32 %v2145_v15, %v2120_v60  ;;  %v1191_v60 = vld [vmem:[%s4239_s19 + $0x1e60] sm:$0xff]  ;;  %v698_v15 = vld [vmem:[%s4239_s19 + $0xef8] sm:$0xff] }
 0x18c   : > { %2724 = vmatpush.msrb.mxu0 %v1017_v5  ;;  %2774 = vmatpush.msra.mxu3 %v612_v50  ;;  %v989_v5 = vld [vmem:[%s4239_s19 + $0x1810] sm:$0xff]  ;;  %v671_v22 = vld [vmem:[%s4239_s19 + $0xe20] sm:$0xff] }
 0x18d   : > { %2706 = vmatpush.msrb.mxu2 %v321_v11  ;;  %2557 = vmatmul.f32.gmra.mxu1 %v5099_v19  ;;  %3852 = vst [vmem:[%s4684_s26 + $0x208] sm:$0x7] %v2146_v21  ;;  %v322_v11 = vld [vmem:[%s4239_s19 + $0x338] sm:$0xff]  ;;  %v931_v21 = vld [vmem:[%s4239_s19 + $0x1640] sm:$0xff] }
 0x18e   : > { %2656 = vmatpush.msra.mxu1 %v726_v12  ;;  %2725 = vmatpush.msrb.mxu0 %v988_v13  ;;  %v960_v13 = vld [vmem:[%s4239_s19 + $0x1728] sm:$0xff] }
 0x18f   : > { %2775 = vmatpush.msra.mxu3 %v583_v52  ;;  %2707 = vmatpush.msrb.mxu2 %v292_v16  ;;  %v293_v52 = vld [vmem:[%s4239_s19 + $0x250] sm:$0xff] }
 0x190   : > { %2583 = vmatmul.f32.gmra.mxu3 %v5153_v31  ;;  %2657 = vmatpush.msra.mxu1 %v697_v55 }
 0x191   : > { %2726 = vmatpush.msrb.mxu0 %v959_v23  ;;  %2776 = vmatpush.msra.mxu3 %v554_v25  ;;  %v2217_v35 = vpop.f32.mrf.mxu0  ;;  %v1395_v23 = vld [vmem:[%s4239_s19 + $0x24c0] sm:$0x1f]  ;;  %v264_v25 = vld [vmem:[%s4239_s19 + $0x168] sm:$0xff] }
 0x192   : > { %2708 = vmatpush.msrb.mxu2 %v263_v27  ;;  %4029 = vmatpush.msk.msrb.mxu1 %vm1436_vm0, %v1394_v29  ;;  %v2218_v38 = vadd.f32 %v2217_v35, %v2192_v24  ;;  %v2168_v40 = vpop.f32.mrf.mxu3  ;;  %v642_v24 = vld [vmem:[%s4239_s19 + $0xd38] sm:$0xff]  ;;  %v235_v35 = vld [vmem:[%s4239_s19 + $0x80] sm:$0xff] }
 0x193   : > { %4023 = vmatmul.msk.f32.gmra.mxu2 %vm1426_vm1, %v5085_v39  ;;  %2727 = vmatpush.msrb.mxu0 %v930_v32  ;;  %v2169_v0 = vadd.f32 %v2168_v40, %v4706_v45  ;;  %v1366_v32 = vld [vmem:[%s4239_s19 + $0x23d8] sm:$0xff]  ;;  %v1337_v40 = vld [vmem:[%s4239_s19 + $0x22f0] sm:$0xff] }
 0x194   : > { %2777 = vmatpush.msra.mxu3 %v525_v10  ;;  %2709 = vmatpush.msrb.mxu2 %v234_v33  ;;  %3794 = vst [vmem:[%s4684_s26 + $0x40] sm:$0xff] %v2218_v38  ;;  %v613_v38 = vld [vmem:[%s4239_s19 + $0xc50] sm:$0xff] }
 0x195   : > { %2754 = vmatpush.msrb.mxu1 %v1365_v34  ;;  %4020 = vmatmul.msk.f32.gmra.mxu0 %vm1426_vm1, %v5128_v8  ;;  %v2194_v46 = vpop.f32.mrf.mxu2 }
 0x196   : > { %2728 = vmatpush.msrb.mxu0 %v901_v36  ;;  %2778 = vmatpush.msra.mxu3 %v496_v37  ;;  %v2195_v12 = vadd.f32 %v2194_v46, %v2169_v0  ;;  %v873_v36 = vld [vmem:[%s4239_s19 + $0x1470] sm:$0xff] }
 0x197   : > { %2798 = vmatpush.msra.mxu2 %v1134_v41  ;;  %2755 = vmatpush.msrb.mxu1 %v1336_v9  ;;  %v1135_v9 = vld [vmem:[%s4239_s19 + $0x1ca0] sm:$0xff]  ;;  %v497_v0 = vld [vmem:[%s4239_s19 + $0x8b0] sm:$0xff] }
 0x198   : > { %2560 = vmatmul.f32.gmra.mxu1 %v5139_v42  ;;  %2729 = vmatpush.msrb.mxu0 %v872_v7  ;;  %v844_v7 = vld [vmem:[%s4239_s19 + $0x1388] sm:$0xff] }
 0x199   : > { %2779 = vmatpush.msra.mxu3 %v467_v43  ;;  %2799 = vmatpush.msra.mxu2 %v1105_v18  ;;  %v584_v43 = vld [vmem:[%s4239_s19 + $0xb68] sm:$0xff] }
 0x19a   : > { %2756 = vmatpush.msrb.mxu1 %v1307_v47  ;;  %2586 = vmatmul.f32.gmra.mxu3 %v5185_v51  ;;  %v1308_v18 = vld [vmem:[%s4239_s19 + $0x2208] sm:$0xff]  ;;  %v1106_v47 = vld [vmem:[%s4239_s19 + $0x1bb8] sm:$0xff] }
 0x19b   : > { %2730 = vmatpush.msrb.mxu0 %v843_v48  ;;  %2780 = vmatpush.msra.mxu3 %v438_v49  ;;  %v2171_v59 = vpop.f32.mrf.mxu3  ;;  %v815_v48 = vld [vmem:[%s4239_s19 + $0x12a0] sm:$0xff] }
 0x19c   : > { %2800 = vmatpush.msra.mxu2 %v1076_v53  ;;  %2757 = vmatpush.msrb.mxu1 %v1278_v28  ;;  %v2243_v3 = vpop.f32.mrf.mxu1  ;;  %v2172_v33 = vadd.f32 %v2171_v59, %v4731_v6  ;;  %v1279_v49 = vld [vmem:[%s4239_s19 + $0x2120] sm:$0xff]  ;;  %v1077_v28 = vld [vmem:[%s4239_s19 + $0x1ad0] sm:$0xff]  ;;  %v1048_v59 = vld [vmem:[%s4239_s19 + $0x19e8] sm:$0xff] }
 0x19d   : > { %4024 = vmatmul.msk.f32.gmra.mxu2 %vm1426_vm1, %v5128_v8  ;;  %2731 = vmatpush.msrb.mxu0 %v814_v30  ;;  %v2244_v16 = vadd.f32 %v2243_v3, %v4661_v17  ;;  %v1221_v3 = vld [vmem:[%s4239_s19 + $0x1f50] sm:$0xff] }
 0x19e   : > { %2781 = vmatpush.msra.mxu3 %v409_v44  ;;  %2801 = vmatpush.msra.mxu2 %v1047_v54  ;;  %v2197_v50 = vpop.f32.mrf.mxu2  ;;  %v786_v44 = vld [vmem:[%s4239_s19 + $0x11b8] sm:$0xff] }
 0x19f   : > { %2758 = vmatpush.msrb.mxu1 %v1249_v56  ;;  %2632 = vmatmul.f32.vlgmr.msra.gmra.mxu0 %v5066_v26  ;;  %v2198_v46 = vadd.f32 %v2197_v50, %v2172_v33  ;;  %v526_v56 = vld [vmem:[%s4239_s19 + $0x998] sm:$0xff]  ;;  %v468_v50 = vld [vmem:[%s4239_s19 + $0x7c8] sm:$0xff]  ;;  %v903_v33 = vld [vmem:[%s4239_s19 + $0x1560] sm:$0xff] }
 0x1a0   : > { %2732 = vmatpush.msrb.mxu0 %v785_v57  ;;  %2782 = vmatpush.msra.mxu3 %v380_v58  ;;  %v1250_v57 = vld [vmem:[%s4239_s19 + $0x2038] sm:$0xff] }
 0x1a1   : > { %2802 = vmatpush.msra.mxu2 %v1018_v61  ;;  %2759 = vmatpush.msrb.mxu1 %v1220_v63 }
 0x1a2   : > { %2658 = vmatmul.f32.vlgmr.msra.gmra.mxu1 %v5112_v62  ;;  %2733 = vmatpush.msrb.mxu0 %v756_v2  ;;  %v757_v2 = vld [vmem:[%s4239_s19 + $0x10d0] sm:$0xff] }
 0x1a3   : > { %2783 = vmatpush.msra.mxu3 %v351_v4  ;;  %2803 = vmatpush.msra.mxu2 %v989_v5  ;;  %v1019_v5 = vld [vmem:[%s4239_s19 + $0x1900] sm:$0xff] }
 0x1a4   : > { %2760 = vmatpush.msrb.mxu1 %v1191_v60  ;;  %4026 = vmatmul.msk.f32.vlgmr.msrb.gmra.mxu3 %vm1426_vm1, %v5030_v20  ;;  %v2220_v55 = vpop.f32.mrf.mxu0  ;;  %v902_v20 = vld [vmem:[%s4239_s19 + $0x1558] sm:$0xff] }
 0x1a5   : > { %2734 = vmatpush.msrb.mxu0 %v727_v1  ;;  %2784 = vmatpush.msra.mxu3 %v322_v11  ;;  %v2221_v27 = vadd.f32 %v2220_v55, %v2195_v12  ;;  %v2269_v29 = vpop.f32.mrf.mxu3  ;;  %v1192_v1 = vld [vmem:[%s4239_s19 + $0x1e68] sm:$0xff]  ;;  %v990_v11 = vld [vmem:[%s4239_s19 + $0x1818] sm:$0xff]  ;;  %v439_v12 = vld [vmem:[%s4239_s19 + $0x6e0] sm:$0xff] }
 0x1a6   : > { %2804 = vmatpush.msra.mxu2 %v960_v13  ;;  %2761 = vmatpush.msrb.mxu1 %v1162_v14  ;;  %v2270_v10 = vadd.f32 %v2269_v29, %v2244_v16  ;;  %v2246_v34 = vpop.f32.mrf.mxu1  ;;  %v699_v13 = vld [vmem:[%s4239_s19 + $0xf00] sm:$0xff]  ;;  %v381_v29 = vld [vmem:[%s4239_s19 + $0x510] sm:$0xff] }
 0x1a7   : > { %2735 = vmatpush.msrb.mxu0 %v698_v15  ;;  %2785 = vmatpush.msra.mxu3 %v293_v52  ;;  %3824 = vst [vmem:[%s4684_s26 + $0x128] sm:$0xff] %v2221_v27  ;;  %v2247_v53 = vadd.f32 %v2246_v34, %v4706_v45  ;;  %v1163_v14 = vld [vmem:[%s4239_s19 + $0x1d80] sm:$0xff]  ;;  %v1396_v52 = vld [vmem:[%s4239_s19 + $0x24c8] sm:$0x1f] }
 0x1a8   : > { %2805 = vmatpush.msra.mxu2 %v931_v21  ;;  %2850 = vmatpush.msra.mxu1 %v671_v22  ;;  %v2295_v37 = vpop.f32.mrf.mxu2  ;;  %v410_v21 = vld [vmem:[%s4239_s19 + $0x5f8] sm:$0xff]  ;;  %v672_v22 = vld [vmem:[%s4239_s19 + $0xe28] sm:$0xff] }
 0x1a9   : > { %4033 = vmatpush.msk.msra.mxu0 %vm1436_vm0, %v1395_v23  ;;  %2786 = vmatpush.msra.mxu3 %v264_v25  ;;  %v2296_v41 = vadd.f32 %v2295_v37, %v2270_v10  ;;  %v932_v23 = vld [vmem:[%s4239_s19 + $0x1648] sm:$0xff]  ;;  %v1367_v25 = vld [vmem:[%s4239_s19 + $0x23e0] sm:$0xff]  ;;  %v614_v37 = vld [vmem:[%s4239_s19 + $0xc58] sm:$0xff] }
 0x1aa   : > { %2635 = vmatmul.f32.gmra.mxu0 %v5099_v19  ;;  %2806 = vmatpush.msra.mxu2 %v902_v20 }
 0x1ab   : > { %2851 = vmatpush.msra.mxu1 %v642_v24  ;;  %2832 = vmatpush.msra.mxu0 %v1366_v32  ;;  %3795 = vst [vmem:[%s4684_s26 + $0x48] sm:$0xff] %v2296_v41  ;;  %v643_v24 = vld [vmem:[%s4239_s19 + $0xd40] sm:$0xff]  ;;  %v585_v41 = vld [vmem:[%s4239_s19 + $0xb70] sm:$0xff] }
 0x1ac   : > { %2661 = vmatmul.f32.gmra.mxu1 %v5153_v31  ;;  %2710 = vmatmul.f32.vlgmr.msrb.gmra.mxu2 %v5066_v26  ;;  %v555_v26 = vld [vmem:[%s4239_s19 + $0xa80] sm:$0xff] }
 0x1ad   : > { %2787 = vmatpush.msra.mxu3 %v235_v35  ;;  %2807 = vmatpush.msra.mxu2 %v873_v36  ;;  %v5395_v35 = vld [vmem:[%s6295_s0 + $0x10] sm:$0xff]  ;;  %v352_v36 = vld [vmem:[%s4239_s19 + $0x428] sm:$0xff] }
 0x1ae   : > { %2852 = vmatpush.msra.mxu1 %v613_v38  ;;  %2833 = vmatpush.msra.mxu0 %v1337_v40  ;;  %v2223_v30 = vpop.f32.mrf.mxu0  ;;  %v874_v38 = vld [vmem:[%s4239_s19 + $0x1478] sm:$0xff]  ;;  %v1309_v40 = vld [vmem:[%s4239_s19 + $0x2210] sm:$0xff] }
 0x1af   : > { %2876 = vmatpush.msrb.mxu3 %v1135_v9  ;;  %2808 = vmatpush.msra.mxu2 %v844_v7  ;;  %v2224_v54 = vadd.f32 %v2223_v30, %v2198_v46  ;;  %v2272_v58 = vpop.f32.mrf.mxu3  ;;  %v845_v7 = vld [vmem:[%s4239_s19 + $0x1390] sm:$0xff]  ;;  %v294_v46 = vld [vmem:[%s4239_s19 + $0x258] sm:$0xff]  ;;  %v5418_v30 = vld [vmem:[%s6295_s0] sm:$0xff] }
 0x1b0   : > { %2853 = vmatpush.msra.mxu1 %v584_v43  ;;  %2834 = vmatpush.msra.mxu0 %v1308_v18  ;;  %v2273_v63 = vadd.f32 %v2272_v58, %v2247_v53  ;;  %v1280_v43 = vld [vmem:[%s4239_s19 + $0x2128] sm:$0xff] }
 0x1b1   : > { %2877 = vmatpush.msrb.mxu3 %v1106_v47  ;;  %2809 = vmatpush.msra.mxu2 %v815_v48  ;;  %3853 = vst [vmem:[%s4684_s26 + $0x210] sm:$0x7] %v2224_v54  ;;  %v2249_v61 = vpop.f32.mrf.mxu1  ;;  %v556_v47 = vld [vmem:[%s4239_s19 + $0xa88] sm:$0xff]  ;;  %v527_v54 = vld [vmem:[%s4239_s19 + $0x9a0] sm:$0xff] }
 0x1b2   : > { %2854 = vmatpush.msra.mxu1 %v555_v26  ;;  %2835 = vmatpush.msra.mxu0 %v1279_v49  ;;  %v2298_v4 = vpop.f32.mrf.mxu2  ;;  %v2250_v15 = vadd.f32 %v2249_v61, %v4731_v6  ;;  %v816_v26 = vld [vmem:[%s4239_s19 + $0x12a8] sm:$0xff]  ;;  %v1251_v49 = vld [vmem:[%s4239_s19 + $0x2040] sm:$0xff]  ;;  %v498_v61 = vld [vmem:[%s4239_s19 + $0x8b8] sm:$0xff] }
 0x1b3   : > { %2878 = vmatpush.msrb.mxu3 %v1077_v28  ;;  %2638 = vmatmul.f32.gmra.mxu0 %v5139_v42  ;;  %v2299_v60 = vadd.f32 %v2298_v4, %v2273_v63  ;;  %v5429_v58 = vld [vmem:[%s6295_s0 + $0x28] sm:$0xff]  ;;  %v758_v63 = vld [vmem:[%s4239_s19 + $0x10d8] sm:$0xff]  ;;  %v729_v4 = vld [vmem:[%s4239_s19 + $0xff0] sm:$0xff] }
 0x1b4   : > { %4027 = vmatmul.msk.f32.gmra.mxu3 %vm1426_vm1, %v5085_v39  ;;  %2810 = vmatpush.msra.mxu2 %v786_v44  ;;  %v728_v39 = vld [vmem:[%s4239_s19 + $0xfe8] sm:$0xff]  ;;  %v265_v44 = vld [vmem:[%s4239_s19 + $0x170] sm:$0xff] }
 0x1b5   : > { %2855 = vmatpush.msra.mxu1 %v526_v56  ;;  %2836 = vmatpush.msra.mxu0 %v1250_v57  ;;  %3825 = vst [vmem:[%s4684_s26 + $0x130] sm:$0xff] %v2299_v60  ;;  %v787_v56 = vld [vmem:[%s4239_s19 + $0x11c0] sm:$0xff]  ;;  %v1222_v57 = vld [vmem:[%s4239_s19 + $0x1f58] sm:$0xff]  ;;  %v440_v60 = vld [vmem:[%s4239_s19 + $0x6e8] sm:$0xff] }
 0x1b6   : > { %2879 = vmatpush.msrb.mxu3 %v1048_v59  ;;  %2664 = vmatmul.f32.gmra.mxu1 %v5185_v51  ;;  %v236_v59 = vld [vmem:[%s4239_s19 + $0x88] sm:$0xff] }
 0x1b7   : > { %2713 = vmatmul.f32.gmra.mxu2 %v5099_v19  ;;  %2856 = vmatpush.msra.mxu1 %v497_v0  ;;  %v961_v19 = vld [vmem:[%s4239_s19 + $0x1730] sm:$0xff] }
 0x1b8   : > { %2811 = vmatpush.msra.mxu2 %v757_v2  ;;  %2837 = vmatpush.msra.mxu0 %v1221_v3  ;;  %v2321_v16 = vpop.f32.mrf.mxu0  ;;  %v1193_v0 = vld [vmem:[%s4239_s19 + $0x1e70] sm:$0xff]  ;;  %v1136_v2 = vld [vmem:[%s4239_s19 + $0x1ca8] sm:$0xff] }
 0x1b9   : > { %2880 = vmatpush.msrb.mxu3 %v1019_v5  ;;  %2857 = vmatpush.msra.mxu1 %v468_v50  ;;  %v2275_v55 = vpop.f32.mrf.mxu3  ;;  %v2322_v32 = vadd.f32 %v2321_v16, %v4661_v17  ;;  %v469_v3 = vld [vmem:[%s4239_s19 + $0x7d0] sm:$0xff]  ;;  %v1164_v5 = vld [vmem:[%s4239_s19 + $0x1d88] sm:$0xff]  ;;  %v1107_v50 = vld [vmem:[%s4239_s19 + $0x1bc0] sm:$0xff] }
 0x1ba   : > { %2812 = vmatpush.msra.mxu2 %v728_v39  ;;  %2838 = vmatpush.msra.mxu0 %v1192_v1  ;;  %v2276_v27 = vadd.f32 %v2275_v55, %v2250_v15  ;;  %v673_v39 = vld [vmem:[%s4239_s19 + $0xe30] sm:$0xff]  ;;  %v700_v1 = vld [vmem:[%s4239_s19 + $0xf08] sm:$0xff] }
 0x1bb   : > { %2881 = vmatpush.msrb.mxu3 %v990_v11  ;;  %2858 = vmatpush.msra.mxu1 %v439_v12  ;;  %v2347_v20 = vpop.f32.mrf.mxu1  ;;  %v1078_v12 = vld [vmem:[%s4239_s19 + $0x1ad8] sm:$0xff] }
 0x1bc   : > { %2813 = vmatpush.msra.mxu2 %v699_v13  ;;  %2839 = vmatpush.msra.mxu0 %v1163_v14  ;;  %v2301_v10 = vpop.f32.mrf.mxu2  ;;  %v2348_v9 = vadd.f32 %v2347_v20, %v2322_v32  ;;  %v5455_v13 = vld [vmem:[%s6295_s0 + $0x18] sm:$0xff]  ;;  %v411_v14 = vld [vmem:[%s4239_s19 + $0x600] sm:$0xff]  ;;  %v353_v20 = vld [vmem:[%s4239_s19 + $0x430] sm:$0xff] }
 0x1bd   : > { %2882 = vmatpush.msrb.mxu3 %v961_v19  ;;  %2736 = vmatmul.f32.vlgmr.msrb.gmra.mxu0 %v5112_v62  ;;  %v2302_v34 = vadd.f32 %v2301_v10, %v2276_v27  ;;  %v1397_v19 = vld [vmem:[%s4239_s19 + $0x24d0] sm:$0x1f]  ;;  %v615_v27 = vld [vmem:[%s4239_s19 + $0xc60] sm:$0xff]  ;;  %v586_v32 = vld [vmem:[%s4239_s19 + $0xb78] sm:$0xff] }
 0x1be   : > { %4037 = vmatpush.msk.msrb.mxu2 %vm1436_vm0, %v1396_v52  ;;  %4028 = vmatmul.msk.f32.gmra.mxu3 %vm1426_vm1, %v5128_v8  ;;  %v1338_v8 = vld [vmem:[%s4239_s19 + $0x22f8] sm:$0xff]  ;;  %v644_v52 = vld [vmem:[%s4239_s19 + $0xd48] sm:$0xff] }
 0x1bf   : > { %2859 = vmatpush.msra.mxu1 %v410_v21  ;;  %2928 = vmatpush.msrb.mxu0 %v672_v22  ;;  %3854 = vst [vmem:[%s4684_s26 + $0x218] sm:$0x7] %v2302_v34  ;;  %v1049_v21 = vld [vmem:[%s4239_s19 + $0x19f0] sm:$0xff]  ;;  %v382_v22 = vld [vmem:[%s4239_s19 + $0x518] sm:$0xff] }
 0x1c0   : > { %2883 = vmatpush.msrb.mxu3 %v932_v23  ;;  %2910 = vmatpush.msrb.mxu2 %v1367_v25  ;;  %v5469_v23 = vld [vmem:[%s6295_s0 + $0x40] sm:$0x7]  ;;  %v1368_v25 = vld [vmem:[%s4239_s19 + $0x23e8] sm:$0xff]  ;;  %v1310_v34 = vld [vmem:[%s4239_s19 + $0x2218] sm:$0xff] }
 0x1c1   : > { %2716 = vmatmul.f32.gmra.mxu2 %v5139_v42  ;;  %4030 = vmatmul.msk.f32.vlgmr.msrb.gmra.mxu1 %vm1426_vm1, %v5395_v35  ;;  %v323_v42 = vld [vmem:[%s4239_s19 + $0x340] sm:$0xff] }
 0x1c2   : > { %2860 = vmatpush.msra.mxu1 %v381_v29  ;;  %2929 = vmatpush.msrb.mxu0 %v643_v24  ;;  %v1339_v24 = vld [vmem:[%s4239_s19 + $0x2300] sm:$0xff] }
 0x1c3   : > { %2884 = vmatpush.msrb.mxu3 %v903_v33  ;;  %2911 = vmatpush.msrb.mxu2 %v1338_v8  ;;  %v2324_v18 = vpop.f32.mrf.mxu0  ;;  %v2373_v48 = vpop.f32.mrf.mxu3  ;;  %v991_v33 = vld [vmem:[%s4239_s19 + $0x1820] sm:$0xff] }
 0x1c4   : > { %2861 = vmatpush.msra.mxu1 %v352_v36  ;;  %2930 = vmatpush.msrb.mxu0 %v614_v37  ;;  %v2374_v28 = vadd.f32 %v2373_v48, %v2348_v9  ;;  %v2325_v15 = vadd.f32 %v2324_v18, %v4706_v45  ;;  %v324_v37 = vld [vmem:[%s4239_s19 + $0x348] sm:$0xff]  ;;  %v962_v9 = vld [vmem:[%s4239_s19 + $0x1738] sm:$0xff]  ;;  %v1281_v18 = vld [vmem:[%s4239_s19 + $0x2130] sm:$0xff] }
 0x1c5   : > { %2885 = vmatpush.msrb.mxu3 %v874_v38  ;;  %2912 = vmatpush.msrb.mxu2 %v1309_v40  ;;  %v5412_v53 = vpop.f32.mrf.mxu1  ;;  %v557_v38 = vld [vmem:[%s4239_s19 + $0xa90] sm:$0xff] }
 0x1c6   : > { %2862 = vmatpush.msra.mxu1 %v323_v42  ;;  %2931 = vmatpush.msrb.mxu0 %v585_v41  ;;  %3796 = vst [vmem:[%s4684_s26 + $0x50] sm:$0xff] %v2374_v28  ;;  %v2351_v29 = vadd.f32 %v5412_v53, %v2325_v15  ;;  %v5488_v41 = vld [vmem:[%s6295_s0 + $0x30] sm:$0x7]  ;;  %v1252_v53 = vld [vmem:[%s4239_s19 + $0x2048] sm:$0xff]  ;;  %v499_v28 = vld [vmem:[%s4239_s19 + $0x8c0] sm:$0xff] }
 0x1c7   : > { %2886 = vmatpush.msrb.mxu3 %v845_v7  ;;  %2913 = vmatpush.msrb.mxu2 %v1280_v43  ;;  %v295_v43 = vld [vmem:[%s4239_s19 + $0x260] sm:$0xff]  ;;  %v933_v48 = vld [vmem:[%s4239_s19 + $0x1650] sm:$0xff] }
 0x1c8   : > { %2739 = vmatmul.f32.gmra.mxu0 %v5153_v31  ;;  %2788 = vmatmul.f32.vlgmr.msra.gmra.mxu3 %v5418_v30  ;;  %v817_v15 = vld [vmem:[%s4239_s19 + $0x12b0] sm:$0xff] }
 0x1c9   : > { %2863 = vmatpush.msra.mxu1 %v294_v46  ;;  %2932 = vmatpush.msrb.mxu0 %v556_v47  ;;  %v528_v47 = vld [vmem:[%s4239_s19 + $0x9a8] sm:$0xff] }
 0x1ca   : > { %2887 = vmatpush.msrb.mxu3 %v816_v26  ;;  %2914 = vmatpush.msrb.mxu2 %v1251_v49  ;;  %v266_v49 = vld [vmem:[%s4239_s19 + $0x178] sm:$0xff] }
 0x1cb   : > { %4031 = vmatmul.msk.f32.gmra.mxu1 %vm1426_vm1, %v5429_v58  ;;  %2814 = vmatmul.f32.vlgmr.msra.gmra.mxu2 %v5112_v62 }
 0x1cc   : > { %2864 = vmatpush.msra.mxu1 %v265_v44  ;;  %2933 = vmatpush.msrb.mxu0 %v527_v54  ;;  %v5442_v62 = vpop.f32.mrf.mxu0  ;;  %v904_v44 = vld [vmem:[%s4239_s19 + $0x1568] sm:$0xff] }
 0x1cd   : > { %2888 = vmatpush.msrb.mxu3 %v787_v56  ;;  %2915 = vmatpush.msrb.mxu2 %v1222_v57  ;;  %v2328_v46 = vadd.f32 %v5442_v62, %v4731_v6  ;;  %v237_v56 = vld [vmem:[%s4239_s19 + $0x90] sm:$0xff]  ;;  %v846_v62 = vld [vmem:[%s4239_s19 + $0x1398] sm:$0xff] }
 0x1ce   : > { %2865 = vmatpush.msra.mxu1 %v236_v59  ;;  %2934 = vmatpush.msrb.mxu0 %v498_v61  ;;  %v470_v59 = vld [vmem:[%s4239_s19 + $0x7d8] sm:$0xff]  ;;  %v875_v61 = vld [vmem:[%s4239_s19 + $0x1480] sm:$0xff] }
 0x1cf   : > { %2889 = vmatpush.msrb.mxu3 %v758_v63  ;;  %2916 = vmatpush.msrb.mxu2 %v1193_v0  ;;  %v5448_v11 = vpop.f32.mrf.mxu1  ;;  %v2399_v16 = vpop.f32.mrf.mxu2  ;;  %v1137_v63 = vld [vmem:[%s4239_s19 + $0x1cb0] sm:$0xff] }
 0x1d0   : > { %2954 = vmatpush.msrb.mxu1 %v1136_v2  ;;  %2935 = vmatpush.msrb.mxu0 %v469_v3  ;;  %v2400_v55 = vadd.f32 %v2399_v16, %v4661_v17  ;;  %v2354_v57 = vadd.f32 %v5448_v11, %v2328_v46  ;;  %v441_v2 = vld [vmem:[%s4239_s19 + $0x6f0] sm:$0xff]  ;;  %v5522_v11 = vld [vmem:[%s6295_s0 + $0x8] sm:$0xff]  ;;  %v674_v16 = vld [vmem:[%s4239_s19 + $0xe38] sm:$0xff] }
 0x1d1   : > { %2890 = vmatpush.msrb.mxu3 %v729_v4  ;;  %2917 = vmatpush.msrb.mxu2 %v1164_v5  ;;  %v1194_v5 = vld [vmem:[%s4239_s19 + $0x1e78] sm:$0xff] }
 0x1d2   : > { %2955 = vmatpush.msrb.mxu1 %v1107_v50  ;;  %2742 = vmatmul.f32.gmra.mxu0 %v5185_v51 }
 0x1d3   : > { %2791 = vmatmul.f32.gmra.mxu3 %v5455_v13  ;;  %2936 = vmatpush.msrb.mxu0 %v440_v60 }
 0x1d4   : > { %3006 = vmatpush.msra.mxu2 %v673_v39  ;;  %2891 = vmatpush.msrb.mxu3 %v700_v1  ;;  %v1108_v39 = vld [vmem:[%s4239_s19 + $0x1bc8] sm:$0xff] }
 0x1d5   : > { %2956 = vmatpush.msrb.mxu1 %v1078_v12  ;;  %2817 = vmatmul.f32.gmra.mxu2 %v5153_v31  ;;  %v1020_v31 = vld [vmem:[%s4239_s19 + $0x1908] sm:$0xff]  ;;  %v1165_v12 = vld [vmem:[%s4239_s19 + $0x1d90] sm:$0xff] }
 0x1d6   : > { %4032 = vmatmul.msk.f32.gmra.mxu1 %vm1426_vm1, %v5469_v23  ;;  %2937 = vmatpush.msrb.mxu0 %v411_v14  ;;  %v2376_v36 = vpop.f32.mrf.mxu3  ;;  %v412_v14 = vld [vmem:[%s4239_s19 + $0x608] sm:$0xff] }
 0x1d7   : > { %4041 = vmatpush.msk.msra.mxu3 %vm1436_vm0, %v1397_v19  ;;  %3007 = vmatpush.msra.mxu2 %v644_v52  ;;  %v2425_v10 = vpop.f32.mrf.mxu0  ;;  %v2377_v40 = vadd.f32 %v2376_v36, %v2351_v29  ;;  %v1079_v19 = vld [vmem:[%s4239_s19 + $0x1ae0] sm:$0xff]  ;;  %v1021_v29 = vld [vmem:[%s4239_s19 + $0x1910] sm:$0xff]  ;;  %v992_v36 = vld [vmem:[%s4239_s19 + $0x1828] sm:$0xff] }
 0x1d8   : > { %2957 = vmatpush.msrb.mxu1 %v1049_v21  ;;  %2938 = vmatpush.msrb.mxu0 %v382_v22  ;;  %v2426_v8 = vadd.f32 %v2425_v10, %v2400_v55  ;;  %v383_v21 = vld [vmem:[%s4239_s19 + $0x520] sm:$0xff]  ;;  %v788_v22 = vld [vmem:[%s4239_s19 + $0x11c8] sm:$0xff]  ;;  %v325_v10 = vld [vmem:[%s4239_s19 + $0x350] sm:$0xff] }
 0x1d9   : > { %2988 = vmatpush.msra.mxu3 %v1368_v25  ;;  %3008 = vmatpush.msra.mxu2 %v615_v27  ;;  %v2451_v42 = vpop.f32.mrf.mxu1  ;;  %3826 = vst [vmem:[%s4684_s26 + $0x138] sm:$0xff] %v2377_v40  ;;  %v2402_v26 = vpop.f32.mrf.mxu2  ;;  %v1050_v25 = vld [vmem:[%s4239_s19 + $0x19f8] sm:$0xff]  ;;  %v645_v27 = vld [vmem:[%s4239_s19 + $0xd50] sm:$0xff] }
 0x1da   : > { %2958 = vmatpush.msrb.mxu1 %v1020_v31  ;;  %2939 = vmatpush.msrb.mxu0 %v353_v20  ;;  %v2452_v7 = vadd.f32 %v2451_v42, %v2426_v8  ;;  %v2403_v54 = vadd.f32 %v2402_v26, %v4706_v45  ;;  %v354_v31 = vld [vmem:[%s4239_s19 + $0x438] sm:$0xff]  ;;  %v759_v20 = vld [vmem:[%s4239_s19 + $0x10e0] sm:$0xff]  ;;  %v701_v42 = vld [vmem:[%s4239_s19 + $0xf10] sm:$0xff] }
 0x1db   : > { %2989 = vmatpush.msra.mxu3 %v1339_v24  ;;  %3009 = vmatpush.msra.mxu2 %v586_v32  ;;  %v616_v32 = vld [vmem:[%s4239_s19 + $0xc68] sm:$0xff]  ;;  %v730_v8 = vld [vmem:[%s4239_s19 + $0xff8] sm:$0xff] }
 0x1dc   : > { %2959 = vmatpush.msrb.mxu1 %v991_v33  ;;  %2794 = vmatmul.f32.gmra.mxu3 %v5488_v41  ;;  %3797 = vst [vmem:[%s4684_s26 + $0x58] sm:$0xff] %v2452_v7  ;;  %v5555_v7 = vld [vmem:[%s6295_s0 + $0x20] sm:$0xff]  ;;  %v1398_v26 = vld [vmem:[%s4239_s19 + $0x24d8] sm:$0x1f] }
 0x1dd   : > { %4034 = vmatmul.msk.f32.vlgmr.msra.gmra.mxu0 %vm1426_vm1, %v5395_v35  ;;  %2990 = vmatpush.msra.mxu3 %v1310_v34 }
 0x1de   : > { %2940 = vmatpush.msrb.mxu0 %v324_v37  ;;  %3010 = vmatpush.msra.mxu2 %v557_v38  ;;  %v587_v37 = vld [vmem:[%s4239_s19 + $0xb80] sm:$0xff] }
 0x1df   : > { %2960 = vmatpush.msrb.mxu1 %v962_v9  ;;  %2820 = vmatmul.f32.gmra.mxu2 %v5185_v51  ;;  %v1223_v51 = vld [vmem:[%s4239_s19 + $0x1f60] sm:$0xff] }
 0x1e0   : > { %2941 = vmatpush.msrb.mxu0 %v295_v43  ;;  %2991 = vmatpush.msra.mxu3 %v1281_v18  ;;  %v296_v43 = vld [vmem:[%s4239_s19 + $0x268] sm:$0xff]  ;;  %v963_v18 = vld [vmem:[%s4239_s19 + $0x1740] sm:$0xff] }
 0x1e1   : > { %3011 = vmatpush.msra.mxu2 %v528_v47  ;;  %2961 = vmatpush.msrb.mxu1 %v933_v48  ;;  %v2428_v0 = vpop.f32.mrf.mxu0  ;;  %v2379_v4 = vpop.f32.mrf.mxu3  ;;  %v558_v47 = vld [vmem:[%s4239_s19 + $0xa98] sm:$0xff]  ;;  %v267_v48 = vld [vmem:[%s4239_s19 + $0x180] sm:$0xff] }
 0x1e2   : > { %2942 = vmatpush.msrb.mxu0 %v266_v49  ;;  %2992 = vmatpush.msra.mxu3 %v1252_v53  ;;  %v2429_v3 = vadd.f32 %v2428_v0, %v2403_v54  ;;  %v2380_v50 = vadd.f32 %v2379_v4, %v2354_v57  ;;  %v934_v53 = vld [vmem:[%s4239_s19 + $0x1658] sm:$0xff]  ;;  %v1369_v54 = vld [vmem:[%s4239_s19 + $0x23f0] sm:$0xff] }
 0x1e3   : > { %3012 = vmatpush.msra.mxu2 %v499_v28  ;;  %2962 = vmatpush.msrb.mxu1 %v904_v44  ;;  %v2454_v60 = vpop.f32.mrf.mxu1  ;;  %v2405_v52 = vpop.f32.mrf.mxu2  ;;  %v529_v28 = vld [vmem:[%s4239_s19 + $0x9b0] sm:$0xff]  ;;  %v238_v44 = vld [vmem:[%s4239_s19 + $0x98] sm:$0xff] }
 0x1e4   : > { %2866 = vmatmul.f32.vlgmr.msra.gmra.mxu1 %v5418_v30  ;;  %2943 = vmatpush.msrb.mxu0 %v237_v56  ;;  %v2455_v1 = vadd.f32 %v2454_v60, %v2429_v3  ;;  %3855 = vst [vmem:[%s4684_s26 + $0x220] sm:$0x7] %v2380_v50  ;;  %v2406_v55 = vadd.f32 %v2405_v52, %v4731_v6  ;;  %v905_v56 = vld [vmem:[%s4239_s19 + $0x1570] sm:$0xff]  ;;  %v471_v3 = vld [vmem:[%s4239_s19 + $0x7e0] sm:$0xff] }
 0x1e5   : > { %2993 = vmatpush.msra.mxu3 %v1223_v51  ;;  %3013 = vmatpush.msra.mxu2 %v470_v59  ;;  %v500_v51 = vld [vmem:[%s4239_s19 + $0x8c8] sm:$0xff]  ;;  %v1138_v59 = vld [vmem:[%s4239_s19 + $0x1cb8] sm:$0xff]  ;;  %v1109_v4 = vld [vmem:[%s4239_s19 + $0x1bd0] sm:$0xff] }
 0x1e6   : > { %2963 = vmatpush.msrb.mxu1 %v875_v61  ;;  %3032 = vmatpush.msra.mxu0 %v1137_v63  ;;  %3827 = vst [vmem:[%s4684_s26 + $0x140] sm:$0xff] %v2455_v1  ;;  %v1340_v63 = vld [vmem:[%s4239_s19 + $0x2308] sm:$0xff]  ;;  %v847_v50 = vld [vmem:[%s4239_s19 + $0x13a0] sm:$0xff]  ;;  %v1253_v52 = vld [vmem:[%s4239_s19 + $0x2050] sm:$0xff] }
 0x1e7   : > { %2892 = vmatmul.f32.vlgmr.msrb.gmra.mxu3 %v5522_v11  ;;  %3014 = vmatpush.msra.mxu2 %v441_v2  ;;  %v876_v2 = vld [vmem:[%s4239_s19 + $0x1488] sm:$0xff] }
 0x1e8   : > { %2994 = vmatpush.msra.mxu3 %v1194_v5  ;;  %2964 = vmatpush.msrb.mxu1 %v846_v62  ;;  %v1311_v5 = vld [vmem:[%s4239_s19 + $0x2220] sm:$0xff]  ;;  %v5586_v62 = vld [vmem:[%s6295_s0 + $0x38] sm:$0x7]  ;;  %v1080_v1 = vld [vmem:[%s4239_s19 + $0x1ae8] sm:$0xff] }
 0x1e9   : > { %3033 = vmatpush.msra.mxu0 %v1108_v39  ;;  %4038 = vmatmul.msk.f32.vlgmr.msrb.gmra.mxu2 %vm1426_vm1, %v5395_v35  ;;  %v442_v39 = vld [vmem:[%s4239_s19 + $0x6f8] sm:$0xff] }
 0x1ea   : > { %2995 = vmatpush.msra.mxu3 %v1165_v12  ;;  %3015 = vmatpush.msra.mxu2 %v412_v14  ;;  %v1282_v12 = vld [vmem:[%s4239_s19 + $0x2138] sm:$0xff] }
 0x1eb   : > { %2965 = vmatpush.msrb.mxu1 %v817_v15  ;;  %3034 = vmatpush.msra.mxu0 %v1079_v19  ;;  %v2431_v24 = vpop.f32.mrf.mxu0  ;;  %v2477_v34 = vpop.f32.mrf.mxu3  ;;  %v818_v14 = vld [vmem:[%s4239_s19 + $0x12b8] sm:$0xff]  ;;  %v413_v15 = vld [vmem:[%s4239_s19 + $0x610] sm:$0xff]  ;;  %v1051_v19 = vld [vmem:[%s4239_s19 + $0x1a00] sm:$0xff] }
 0x1ec   : > { %3084 = vmatpush.msrb.mxu3 %v674_v16  ;;  %4035 = vmatmul.msk.f32.gmra.mxu0 %vm1426_vm1, %v5429_v58  ;;  %v2432_v33 = vadd.f32 %v2431_v24, %v2406_v55  ;;  %v2478_v38 = vadd.f32 %v2477_v34, %v4661_v17  ;;  %v789_v16 = vld [vmem:[%s4239_s19 + $0x11d0] sm:$0xff]  ;;  %v1224_v55 = vld [vmem:[%s4239_s19 + $0x1f68] sm:$0xff]  ;;  %v1195_v24 = vld [vmem:[%s4239_s19 + $0x1e80] sm:$0xff] }
 0x1ed   : > { %3016 = vmatpush.msra.mxu2 %v383_v21  ;;  %2966 = vmatpush.msrb.mxu1 %v788_v22  ;;  %v2503_v46 = vpop.f32.mrf.mxu2  ;;  %v384_v21 = vld [vmem:[%s4239_s19 + $0x528] sm:$0xff]  ;;  %v1022_v22 = vld [vmem:[%s4239_s19 + $0x1918] sm:$0xff] }
 0x1ee   : > { %3035 = vmatpush.msra.mxu0 %v1050_v25  ;;  %3085 = vmatpush.msrb.mxu3 %v645_v27  ;;  %v2457_v40 = vpop.f32.mrf.mxu1  ;;  %v2504_v49 = vadd.f32 %v2503_v46, %v2478_v38  ;;  %v760_v27 = vld [vmem:[%s4239_s19 + $0x10e8] sm:$0xff]  ;;  %v702_v38 = vld [vmem:[%s4239_s19 + $0xf18] sm:$0xff] }
 0x1ef   : > { %2869 = vmatmul.f32.gmra.mxu1 %v5455_v13  ;;  %3017 = vmatpush.msra.mxu2 %v354_v31  ;;  %v2458_v9 = vadd.f32 %v2457_v40, %v2432_v33  ;;  %v355_v31 = vld [vmem:[%s4239_s19 + $0x440] sm:$0xff]  ;;  %v964_v34 = vld [vmem:[%s4239_s19 + $0x1748] sm:$0xff]  ;;  %v297_v40 = vld [vmem:[%s4239_s19 + $0x270] sm:$0xff] }
 0x1f0   : > { %2967 = vmatpush.msrb.mxu1 %v759_v20  ;;  %3036 = vmatpush.msra.mxu0 %v1021_v29  ;;  %v993_v29 = vld [vmem:[%s4239_s19 + $0x1830] sm:$0xff] }
 0x1f1   : > { %3086 = vmatpush.msrb.mxu3 %v616_v32  ;;  %3018 = vmatpush.msra.mxu2 %v325_v10  ;;  %3856 = vst [vmem:[%s4684_s26 + $0x228] sm:$0x7] %v2458_v9  ;;  %v731_v10 = vld [vmem:[%s4239_s19 + $0x1000] sm:$0xff] }
 0x1f2   : > { %2895 = vmatmul.f32.gmra.mxu3 %v5555_v7  ;;  %2968 = vmatpush.msrb.mxu1 %v730_v8  ;;  %v326_v8 = vld [vmem:[%s4239_s19 + $0x358] sm:$0xff]  ;;  %v675_v9 = vld [vmem:[%s4239_s19 + $0xe40] sm:$0xff] }
 0x1f3   : > { %3037 = vmatpush.msra.mxu0 %v992_v36  ;;  %3087 = vmatpush.msrb.mxu3 %v587_v37  ;;  %v1166_v36 = vld [vmem:[%s4239_s19 + $0x1d98] sm:$0xff] }
 0x1f4   : > { %4039 = vmatmul.msk.f32.gmra.mxu2 %vm1426_vm1, %v5429_v58  ;;  %2969 = vmatpush.msrb.mxu1 %v701_v42  ;;  %v935_v42 = vld [vmem:[%s4239_s19 + $0x1660] sm:$0xff] }
 0x1f5   : > { %3019 = vmatpush.msra.mxu2 %v296_v43  ;;  %3038 = vmatpush.msra.mxu0 %v963_v18  ;;  %v2529_v57 = vpop.f32.mrf.mxu0  ;;  %v1399_v18 = vld [vmem:[%s4239_s19 + $0x24e0] sm:$0x1f] }
 0x1f6   : > { %3088 = vmatpush.msrb.mxu3 %v558_v47  ;;  %4036 = vmatmul.msk.f32.gmra.mxu0 %vm1426_vm1, %v5469_v23  ;;  %v2530_v61 = vadd.f32 %v2529_v57, %v2504_v49  ;;  %v2480_v0 = vpop.f32.mrf.mxu3  ;;  %v268_v47 = vld [vmem:[%s4239_s19 + $0x188] sm:$0xff]  ;;  %v646_v49 = vld [vmem:[%s4239_s19 + $0xd58] sm:$0xff]  ;;  %v877_v57 = vld [vmem:[%s4239_s19 + $0x1490] sm:$0xff] }
 0x1f7   : > { %3020 = vmatpush.msra.mxu2 %v267_v48  ;;  %4045 = vmatpush.msk.msra.mxu1 %vm1436_vm0, %v1398_v26  ;;  %v2481_v20 = vadd.f32 %v2480_v0, %v4706_v45  ;;  %v906_v48 = vld [vmem:[%s4239_s19 + $0x1578] sm:$0xff]  ;;  %v1139_v0 = vld [vmem:[%s4239_s19 + $0x1cc0] sm:$0xff] }
 0x1f8   : > { %3039 = vmatpush.msra.mxu0 %v934_v53  ;;  %3089 = vmatpush.msrb.mxu3 %v529_v28  ;;  %3798 = vst [vmem:[%s4684_s26 + $0x60] sm:$0xff] %v2530_v61  ;;  %v1370_v28 = vld [vmem:[%s4239_s19 + $0x23f8] sm:$0xff]  ;;  %v1341_v61 = vld [vmem:[%s4239_s19 + $0x2310] sm:$0xff] }
 0x1f9   : > { %2872 = vmatmul.f32.gmra.mxu1 %v5488_v41  ;;  %3021 = vmatpush.msra.mxu2 %v238_v44  ;;  %v2506_v60 = vpop.f32.mrf.mxu2  ;;  %v239_v44 = vld [vmem:[%s4239_s19 + $0xa0] sm:$0xff] }
 0x1fa   : > { %3066 = vmatpush.msra.mxu1 %v1369_v54  ;;  %3040 = vmatpush.msra.mxu0 %v905_v56  ;;  %v2507_v37 = vadd.f32 %v2506_v60, %v2481_v20  ;;  %v1110_v60 = vld [vmem:[%s4239_s19 + $0x1bd8] sm:$0xff] }
 0x1fb   : > { %3090 = vmatpush.msrb.mxu3 %v500_v51  ;;  %3110 = vmatpush.msrb.mxu2 %v1138_v59  ;;  %v617_v51 = vld [vmem:[%s4239_s19 + $0xc70] sm:$0xff] }
 0x1fc   : > { %2898 = vmatmul.f32.gmra.mxu3 %v5586_v62  ;;  %3067 = vmatpush.msra.mxu1 %v1340_v63 }
 0x1fd   : > { %3041 = vmatpush.msra.mxu0 %v876_v2  ;;  %3091 = vmatpush.msrb.mxu3 %v471_v3  ;;  %v848_v2 = vld [vmem:[%s4239_s19 + $0x13a8] sm:$0xff] }
 0x1fe   : > { %3111 = vmatpush.msrb.mxu2 %v1109_v4  ;;  %3068 = vmatpush.msra.mxu1 %v1311_v5  ;;  %v588_v4 = vld [vmem:[%s4239_s19 + $0xb88] sm:$0xff] }
 0x1ff   : > { %4040 = vmatmul.msk.f32.gmra.mxu2 %vm1426_vm1, %v5469_v23  ;;  %3042 = vmatpush.msra.mxu0 %v847_v50  ;;  %v2483_v25 = vpop.f32.mrf.mxu3  ;;  %v1312_v50 = vld [vmem:[%s4239_s19 + $0x2228] sm:$0xff] }
 0x200   : > { %3092 = vmatpush.msrb.mxu3 %v442_v39  ;;  %3112 = vmatpush.msrb.mxu2 %v1080_v1  ;;  %v2555_v32 = vpop.f32.mrf.mxu1  ;;  %v2484_v54 = vadd.f32 %v2483_v25, %v4731_v6  ;;  %v819_v39 = vld [vmem:[%s4239_s19 + $0x12c0] sm:$0xff] }
 0x201   : > { %2944 = vmatmul.f32.vlgmr.msrb.gmra.mxu0 %v5418_v30  ;;  %3069 = vmatpush.msra.mxu1 %v1282_v12  ;;  %v2556_v43 = vadd.f32 %v2555_v32, %v4661_v17  ;;  %v559_v1 = vld [vmem:[%s4239_s19 + $0xaa0] sm:$0xff] }
 0x202   : > { %3043 = vmatpush.msra.mxu0 %v818_v14  ;;  %3093 = vmatpush.msrb.mxu3 %v413_v15  ;;  %v2509_v33 = vpop.f32.mrf.mxu2  ;;  %v1283_v12 = vld [vmem:[%s4239_s19 + $0x2140] sm:$0xff] }
 0x203   : > { %3113 = vmatpush.msrb.mxu2 %v1051_v19  ;;  %2970 = vmatmul.f32.vlgmr.msrb.gmra.mxu1 %v5522_v11  ;;  %v2510_v5 = vadd.f32 %v2509_v33, %v2484_v54  ;;  %v1081_v19 = vld [vmem:[%s4239_s19 + $0x1af0] sm:$0xff]  ;;  %v732_v33 = vld [vmem:[%s4239_s19 + $0x1008] sm:$0xff] }
 0x204   : > { %3070 = vmatpush.msra.mxu1 %v1253_v52  ;;  %3044 = vmatpush.msra.mxu0 %v789_v16  ;;  %v790_v52 = vld [vmem:[%s4239_s19 + $0x11d8] sm:$0xff] }
 0x205   : > { %3094 = vmatpush.msrb.mxu3 %v384_v21  ;;  %3114 = vmatpush.msrb.mxu2 %v1022_v22  ;;  %v530_v21 = vld [vmem:[%s4239_s19 + $0x9b8] sm:$0xff] }
 0x206   : > { %4042 = vmatmul.msk.f32.vlgmr.msra.gmra.mxu3 %vm1426_vm1, %v5395_v35  ;;  %3071 = vmatpush.msra.mxu1 %v1224_v55  ;;  %v1254_v22 = vld [vmem:[%s4239_s19 + $0x2058] sm:$0xff]  ;;  %v1052_v55 = vld [vmem:[%s4239_s19 + $0x1a08] sm:$0xff] }
 0x207   : > { %3045 = vmatpush.msra.mxu0 %v760_v27  ;;  %3095 = vmatpush.msrb.mxu3 %v355_v31  ;;  %v761_v27 = vld [vmem:[%s4239_s19 + $0x10f0] sm:$0xff] }
 0x208   : > { %3115 = vmatpush.msrb.mxu2 %v993_v29  ;;  %3072 = vmatpush.msra.mxu1 %v1195_v24  ;;  %v2532_v46 = vpop.f32.mrf.mxu0  ;;  %v501_v31 = vld [vmem:[%s4239_s19 + $0x8d0] sm:$0xff] }
 0x209   : > { %3022 = vmatmul.f32.vlgmr.msra.gmra.mxu2 %v5418_v30  ;;  %3046 = vmatpush.msra.mxu0 %v731_v10  ;;  %v2533_v26 = vadd.f32 %v2532_v46, %v2507_v37  ;;  %v2581_v53 = vpop.f32.mrf.mxu3  ;;  %v1225_v24 = vld [vmem:[%s4239_s19 + $0x1f70] sm:$0xff]  ;;  %v1023_v10 = vld [vmem:[%s4239_s19 + $0x1920] sm:$0xff]  ;;  %v994_v37 = vld [vmem:[%s4239_s19 + $0x1838] sm:$0xff] }
 0x20a   : > { %3096 = vmatpush.msrb.mxu3 %v326_v8  ;;  %3116 = vmatpush.msrb.mxu2 %v964_v34  ;;  %v2582_v56 = vadd.f32 %v2581_v53, %v2556_v43  ;;  %v2558_v59 = vpop.f32.mrf.mxu1  ;;  %v472_v34 = vld [vmem:[%s4239_s19 + $0x7e8] sm:$0xff]  ;;  %v965_v43 = vld [vmem:[%s4239_s19 + $0x1750] sm:$0xff] }
 0x20b   : > { %2947 = vmatmul.f32.gmra.mxu0 %v5455_v13  ;;  %3073 = vmatpush.msra.mxu1 %v1166_v36  ;;  %3828 = vst [vmem:[%s4684_s26 + $0x148] sm:$0xff] %v2533_v26  ;;  %v2559_v14 = vadd.f32 %v2558_v59, %v4706_v45  ;;  %v1196_v36 = vld [vmem:[%s4239_s19 + $0x1e88] sm:$0xff]  ;;  %v1371_v26 = vld [vmem:[%s4239_s19 + $0x2400] sm:$0xff] }
 0x20c   : > { %3047 = vmatpush.msra.mxu0 %v702_v38  ;;  %3097 = vmatpush.msrb.mxu3 %v297_v40  ;;  %v2607_v63 = vpop.f32.mrf.mxu2  ;;  %v703_v38 = vld [vmem:[%s4239_s19 + $0xf20] sm:$0xff]  ;;  %v936_v53 = vld [vmem:[%s4239_s19 + $0x1668] sm:$0xff] }
 0x20d   : > { %3117 = vmatpush.msrb.mxu2 %v935_v42  ;;  %3162 = vmatpush.msrb.mxu1 %v675_v9  ;;  %v2608_v3 = vadd.f32 %v2607_v63, %v2582_v56  ;;  %v443_v40 = vld [vmem:[%s4239_s19 + $0x700] sm:$0xff]  ;;  %v356_v63 = vld [vmem:[%s4239_s19 + $0x448] sm:$0xff] }
 0x20e   : > { %2973 = vmatmul.f32.gmra.mxu1 %v5555_v7  ;;  %4049 = vmatpush.msk.msrb.mxu0 %vm1436_vm0, %v1399_v18  ;;  %v1167_v42 = vld [vmem:[%s4239_s19 + $0x1da0] sm:$0xff]  ;;  %v1400_v18 = vld [vmem:[%s4239_s19 + $0x24e8] sm:$0x1f] }
 0x20f   : > { %3098 = vmatpush.msrb.mxu3 %v268_v47  ;;  %3118 = vmatpush.msrb.mxu2 %v906_v48  ;;  %3799 = vst [vmem:[%s4684_s26 + $0x68] sm:$0xff] %v2608_v3  ;;  %v414_v47 = vld [vmem:[%s4239_s19 + $0x618] sm:$0xff]  ;;  %v676_v48 = vld [vmem:[%s4239_s19 + $0xe48] sm:$0xff]  ;;  %v647_v56 = vld [vmem:[%s4239_s19 + $0xd60] sm:$0xff] }
 0x210   : > { %3163 = vmatpush.msrb.mxu1 %v646_v49  ;;  %4043 = vmatmul.msk.f32.gmra.mxu3 %vm1426_vm1, %v5429_v58  ;;  %v327_v3 = vld [vmem:[%s4239_s19 + $0x360] sm:$0xff] }
 0x211   : > { %3144 = vmatpush.msrb.mxu0 %v1370_v28  ;;  %3099 = vmatpush.msrb.mxu3 %v239_v44  ;;  %v385_v28 = vld [vmem:[%s4239_s19 + $0x530] sm:$0xff] }
 0x212   : > { %3119 = vmatpush.msrb.mxu2 %v877_v57  ;;  %3164 = vmatpush.msrb.mxu1 %v617_v51  ;;  %v2535_v15 = vpop.f32.mrf.mxu0  ;;  %v907_v57 = vld [vmem:[%s4239_s19 + $0x1580] sm:$0xff]  ;;  %v1342_v51 = vld [vmem:[%s4239_s19 + $0x2318] sm:$0xff] }
 0x213   : > { %3025 = vmatmul.f32.gmra.mxu2 %v5455_v13  ;;  %3145 = vmatpush.msrb.mxu0 %v1341_v61  ;;  %v2536_v16 = vadd.f32 %v2535_v15, %v2510_v5  ;;  %v2584_v25 = vpop.f32.mrf.mxu3 }
 0x214   : > { %3188 = vmatpush.msra.mxu3 %v1139_v0  ;;  %3120 = vmatpush.msrb.mxu2 %v848_v2  ;;  %v2585_v29 = vadd.f32 %v2584_v25, %v2559_v14  ;;  %v618_v0 = vld [vmem:[%s4239_s19 + $0xc78] sm:$0xff]  ;;  %v1255_v14 = vld [vmem:[%s4239_s19 + $0x2060] sm:$0xff]  ;;  %v240_v25 = vld [vmem:[%s4239_s19 + $0xa8] sm:$0xff] }
 0x215   : > { %3165 = vmatpush.msrb.mxu1 %v588_v4  ;;  %2950 = vmatmul.f32.gmra.mxu0 %v5488_v41  ;;  %3857 = vst [vmem:[%s4684_s26 + $0x230] sm:$0x7] %v2536_v16  ;;  %v2561_v20 = vpop.f32.mrf.mxu1  ;;  %v878_v2 = vld [vmem:[%s4239_s19 + $0x1498] sm:$0xff]  ;;  %v589_v4 = vld [vmem:[%s4239_s19 + $0xb90] sm:$0xff] }
 0x216   : > { %3146 = vmatpush.msrb.mxu0 %v1312_v50  ;;  %3189 = vmatpush.msra.mxu3 %v1110_v60  ;;  %v2610_v32 = vpop.f32.mrf.mxu2  ;;  %v2562_v9 = vadd.f32 %v2561_v20, %v4731_v6  ;;  %v849_v50 = vld [vmem:[%s4239_s19 + $0x13b0] sm:$0xff]  ;;  %v1284_v60 = vld [vmem:[%s4239_s19 + $0x2148] sm:$0xff] }
 0x217   : > { %3121 = vmatpush.msrb.mxu2 %v819_v39  ;;  %3166 = vmatpush.msrb.mxu1 %v559_v1  ;;  %v2611_v8 = vadd.f32 %v2610_v32, %v2585_v29  ;;  %v298_v1 = vld [vmem:[%s4239_s19 + $0x278] sm:$0xff]  ;;  %v1140_v20 = vld [vmem:[%s4239_s19 + $0x1cc8] sm:$0xff]  ;;  %v473_v29 = vld [vmem:[%s4239_s19 + $0x7f0] sm:$0xff] }
 0x218   : > { %2976 = vmatmul.f32.gmra.mxu1 %v5586_v62  ;;  %3147 = vmatpush.msrb.mxu0 %v1283_v12  ;;  %v560_v12 = vld [vmem:[%s4239_s19 + $0xaa8] sm:$0xff] }
 0x219   : > { %3190 = vmatpush.msra.mxu3 %v1081_v19  ;;  %3122 = vmatpush.msrb.mxu2 %v790_v52  ;;  %3829 = vst [vmem:[%s4684_s26 + $0x150] sm:$0xff] %v2611_v8  ;;  %v820_v19 = vld [vmem:[%s4239_s19 + $0x12c8] sm:$0xff]  ;;  %v269_v52 = vld [vmem:[%s4239_s19 + $0x190] sm:$0xff] }
 0x21a   : > { %3167 = vmatpush.msrb.mxu1 %v530_v21  ;;  %4044 = vmatmul.msk.f32.gmra.mxu3 %vm1426_vm1, %v5469_v23  ;;  %v1168_v32 = vld [vmem:[%s4239_s19 + $0x1da8] sm:$0xff] }
 0x21b   : > { %3148 = vmatpush.msrb.mxu0 %v1254_v22  ;;  %3191 = vmatpush.msra.mxu3 %v1052_v55  ;;  %v531_v22 = vld [vmem:[%s4239_s19 + $0x9c0] sm:$0xff]  ;;  %v1226_v55 = vld [vmem:[%s4239_s19 + $0x1f78] sm:$0xff]  ;;  %v444_v8 = vld [vmem:[%s4239_s19 + $0x708] sm:$0xff] }
 0x21c   : > { %3123 = vmatpush.msrb.mxu2 %v761_v27  ;;  %3168 = vmatpush.msrb.mxu1 %v501_v31  ;;  %v2633_v46 = vpop.f32.mrf.mxu0  ;;  %v502_v27 = vld [vmem:[%s4239_s19 + $0x8d8] sm:$0xff] }
 0x21d   : > { %3028 = vmatmul.f32.gmra.mxu2 %v5488_v41  ;;  %3149 = vmatpush.msrb.mxu0 %v1225_v24  ;;  %v2587_v49 = vpop.f32.mrf.mxu3  ;;  %v2634_v59 = vadd.f32 %v2633_v46, %v4661_v17  ;;  %v762_v31 = vld [vmem:[%s4239_s19 + $0x10f8] sm:$0xff]  ;;  %v733_v24 = vld [vmem:[%s4239_s19 + $0x1010] sm:$0xff] }
 0x21e   : > { %3192 = vmatpush.msra.mxu3 %v1023_v10  ;;  %3124 = vmatpush.msrb.mxu2 %v732_v33  ;;  %v2588_v44 = vadd.f32 %v2587_v49, %v2562_v9  ;;  %v1111_v33 = vld [vmem:[%s4239_s19 + $0x1be0] sm:$0xff]  ;;  %v1053_v46 = vld [vmem:[%s4239_s19 + $0x1a10] sm:$0xff] }
 0x21f   : > { %3169 = vmatpush.msrb.mxu1 %v472_v34  ;;  %3048 = vmatmul.f32.vlgmr.msra.gmra.mxu0 %v5522_v11  ;;  %v2659_v54 = vpop.f32.mrf.mxu1  ;;  %v415_v9 = vld [vmem:[%s4239_s19 + $0x620] sm:$0xff] }
 0x220   : > { %3150 = vmatpush.msrb.mxu0 %v1196_v36  ;;  %3193 = vmatpush.msra.mxu3 %v994_v37  ;;  %v2660_v5 = vadd.f32 %v2659_v54, %v2634_v59  ;;  %v677_v37 = vld [vmem:[%s4239_s19 + $0xe50] sm:$0xff]  ;;  %v328_v59 = vld [vmem:[%s4239_s19 + $0x368] sm:$0xff] }
 0x221   : > { %3125 = vmatpush.msrb.mxu2 %v703_v38  ;;  %3170 = vmatpush.msrb.mxu1 %v443_v40  ;;  %v704_v38 = vld [vmem:[%s4239_s19 + $0xf28] sm:$0xff]  ;;  %v1082_v40 = vld [vmem:[%s4239_s19 + $0x1af8] sm:$0xff] }
 0x222   : > { %4046 = vmatmul.msk.f32.vlgmr.msra.gmra.mxu1 %vm1426_vm1, %v5395_v35  ;;  %3151 = vmatpush.msrb.mxu0 %v1167_v42  ;;  %v2613_v35 = vpop.f32.mrf.mxu2 }
 0x223   : > { %3194 = vmatpush.msra.mxu3 %v965_v43  ;;  %4053 = vmatpush.msk.msra.mxu2 %vm1436_vm0, %v1400_v18  ;;  %v2614_v61 = vadd.f32 %v2613_v35, %v2588_v44  ;;  %v1401_v43 = vld [vmem:[%s4239_s19 + $0x24f0] sm:$0x1f]  ;;  %v648_v18 = vld [vmem:[%s4239_s19 + $0xd68] sm:$0xff]  ;;  %v1343_v44 = vld [vmem:[%s4239_s19 + $0x2320] sm:$0xff] }
 0x224   : > { %3171 = vmatpush.msrb.mxu1 %v414_v47  ;;  %3240 = vmatpush.msra.mxu0 %v676_v48  ;;  %v386_v47 = vld [vmem:[%s4239_s19 + $0x538] sm:$0xff]  ;;  %v1372_v48 = vld [vmem:[%s4239_s19 + $0x2408] sm:$0xff] }
 0x225   : > { %3100 = vmatmul.f32.vlgmr.msrb.gmra.mxu3 %v5418_v30  ;;  %3222 = vmatpush.msra.mxu2 %v1371_v26  ;;  %3858 = vst [vmem:[%s4684_s26 + $0x238] sm:$0x7] %v2614_v61  ;;  %v1313_v30 = vld [vmem:[%s4239_s19 + $0x2230] sm:$0xff]  ;;  %v619_v26 = vld [vmem:[%s4239_s19 + $0xc80] sm:$0xff] }
 0x226   : > { %3195 = vmatpush.msra.mxu3 %v936_v53  ;;  %3172 = vmatpush.msrb.mxu1 %v385_v28  ;;  %v357_v28 = vld [vmem:[%s4239_s19 + $0x450] sm:$0xff] }
 0x227   : > { %3241 = vmatpush.msra.mxu0 %v647_v56  ;;  %3126 = vmatmul.f32.vlgmr.msrb.gmra.mxu2 %v5522_v11  ;;  %v2636_v39 = vpop.f32.mrf.mxu0  ;;  %v2685_v15 = vpop.f32.mrf.mxu3  ;;  %v590_v56 = vld [vmem:[%s4239_s19 + $0xb98] sm:$0xff] }
 0x228   : > { %3196 = vmatpush.msra.mxu3 %v907_v57  ;;  %3223 = vmatpush.msra.mxu2 %v1342_v51  ;;  %v2686_v21 = vadd.f32 %v2685_v15, %v2660_v5  ;;  %v2637_v34 = vadd.f32 %v2636_v39, %v4706_v45  ;;  %v5748_v57 = vld [vmem:[%s6295_s0 + $0x10] sm:$0xff]  ;;  %v995_v51 = vld [vmem:[%s4239_s19 + $0x1840] sm:$0xff]  ;;  %v270_v15 = vld [vmem:[%s4239_s19 + $0x198] sm:$0xff] }
 0x229   : > { %3173 = vmatpush.msrb.mxu1 %v356_v63  ;;  %3242 = vmatpush.msra.mxu0 %v618_v0  ;;  %v2662_v16 = vpop.f32.mrf.mxu1 }
 0x22a   : > { %3051 = vmatmul.f32.gmra.mxu0 %v5555_v7  ;;  %3197 = vmatpush.msra.mxu3 %v878_v2  ;;  %3800 = vst [vmem:[%s4684_s26 + $0x70] sm:$0xff] %v2686_v21  ;;  %v1314_v2 = vld [vmem:[%s4239_s19 + $0x2238] sm:$0xff]  ;;  %v908_v21 = vld [vmem:[%s4239_s19 + $0x1588] sm:$0xff] }
 0x22b   : > { %3224 = vmatpush.msra.mxu2 %v1313_v30  ;;  %3174 = vmatpush.msrb.mxu1 %v327_v3  ;;  %v561_v30 = vld [vmem:[%s4239_s19 + $0xab0] sm:$0xff]  ;;  %v5761_v3 = vld [vmem:[%s6295_s0] sm:$0xff] }
 0x22c   : > { %3243 = vmatpush.msra.mxu0 %v589_v4  ;;  %4047 = vmatmul.msk.f32.gmra.mxu1 %vm1426_vm1, %v5429_v58  ;;  %v791_v58 = vld [vmem:[%s4239_s19 + $0x11e0] sm:$0xff]  ;;  %v966_v4 = vld [vmem:[%s4239_s19 + $0x1758] sm:$0xff] }
 0x22d   : > { %3198 = vmatpush.msra.mxu3 %v849_v50  ;;  %3225 = vmatpush.msra.mxu2 %v1284_v60  ;;  %v299_v50 = vld [vmem:[%s4239_s19 + $0x280] sm:$0xff]  ;;  %v1285_v60 = vld [vmem:[%s4239_s19 + $0x2150] sm:$0xff] }
 0x22e   : > { %3175 = vmatpush.msrb.mxu1 %v298_v1  ;;  %3244 = vmatpush.msra.mxu0 %v560_v12  ;;  %v532_v1 = vld [vmem:[%s4239_s19 + $0x9c8] sm:$0xff]  ;;  %v937_v12 = vld [vmem:[%s4239_s19 + $0x1670] sm:$0xff] }
 0x22f   : > { %3103 = vmatmul.f32.gmra.mxu3 %v5455_v13  ;;  %3226 = vmatpush.msra.mxu2 %v1255_v14  ;;  %v1197_v13 = vld [vmem:[%s4239_s19 + $0x1e90] sm:$0xff]  ;;  %v2711_v36 = vpop.f32.mrf.mxu2 }
 0x230   : > { %3199 = vmatpush.msra.mxu3 %v820_v19  ;;  %3176 = vmatpush.msrb.mxu1 %v269_v52  ;;  %v2639_v10 = vpop.f32.mrf.mxu0  ;;  %v2712_v49 = vadd.f32 %v2711_v36, %v4661_v17  ;;  %v1256_v19 = vld [vmem:[%s4239_s19 + $0x2068] sm:$0xff]  ;;  %v503_v52 = vld [vmem:[%s4239_s19 + $0x8e0] sm:$0xff] }
 0x231   : > { %3245 = vmatpush.msra.mxu0 %v531_v22  ;;  %3129 = vmatmul.f32.gmra.mxu2 %v5555_v7  ;;  %v2640_v61 = vadd.f32 %v2639_v10, %v4731_v6  ;;  %v445_v10 = vld [vmem:[%s4239_s19 + $0x710] sm:$0xff]  ;;  %v1112_v36 = vld [vmem:[%s4239_s19 + $0x1be8] sm:$0xff] }
 0x232   : > { %3200 = vmatpush.msra.mxu3 %v791_v58  ;;  %3227 = vmatpush.msra.mxu2 %v1226_v55  ;;  %v1227_v58 = vld [vmem:[%s4239_s19 + $0x1f80] sm:$0xff] }
 0x233   : > { %3177 = vmatpush.msrb.mxu1 %v240_v25  ;;  %3246 = vmatpush.msra.mxu0 %v502_v27  ;;  %v2665_v42 = vpop.f32.mrf.mxu1  ;;  %v474_v25 = vld [vmem:[%s4239_s19 + $0x7f8] sm:$0xff] }
 0x234   : > { %3054 = vmatmul.f32.gmra.mxu0 %v5586_v62  ;;  %3201 = vmatpush.msra.mxu3 %v762_v31  ;;  %v2666_v14 = vadd.f32 %v2665_v42, %v2640_v61  ;;  %v5784_v31 = vld [vmem:[%s6295_s0 + $0x28] sm:$0xff]  ;;  %v821_v42 = vld [vmem:[%s4239_s19 + $0x12d0] sm:$0xff] }
 0x235   : > { %3228 = vmatpush.msra.mxu2 %v1197_v13  ;;  %3266 = vmatpush.msra.mxu1 %v1140_v20  ;;  %v879_v13 = vld [vmem:[%s4239_s19 + $0x14a0] sm:$0xff]  ;;  %v1141_v20 = vld [vmem:[%s4239_s19 + $0x1cd0] sm:$0xff]  ;;  %v996_v61 = vld [vmem:[%s4239_s19 + $0x1848] sm:$0xff] }
 0x236   : > { %3247 = vmatpush.msra.mxu0 %v473_v29  ;;  %4048 = vmatmul.msk.f32.gmra.mxu1 %vm1426_vm1, %v5469_v23  ;;  %v2663_v23 = vadd.f32 %v2662_v16, %v2637_v34 }
 0x237   : > { %3202 = vmatpush.msra.mxu3 %v733_v24  ;;  %3229 = vmatpush.msra.mxu2 %v1168_v32  ;;  %v2688_v53 = vpop.f32.mrf.mxu3  ;;  %v1198_v32 = vld [vmem:[%s4239_s19 + $0x1e98] sm:$0xff] }
 0x238   : > { %3267 = vmatpush.msra.mxu1 %v1111_v33  ;;  %3248 = vmatpush.msra.mxu0 %v444_v8  ;;  %v2689_v54 = vadd.f32 %v2688_v53, %v2663_v23  ;;  %v5796_v33 = vld [vmem:[%s6295_s0 + $0x18] sm:$0xff]  ;;  %v1025_v53 = vld [vmem:[%s4239_s19 + $0x1930] sm:$0xff] }
 0x239   : > { %3318 = vmatpush.msrb.mxu2 %v677_v37  ;;  %3106 = vmatmul.f32.gmra.mxu3 %v5488_v41  ;;  %v1024_v41 = vld [vmem:[%s4239_s19 + $0x1928] sm:$0xff]  ;;  %v850_v8 = vld [vmem:[%s4239_s19 + $0x13b8] sm:$0xff]  ;;  %v1169_v37 = vld [vmem:[%s4239_s19 + $0x1db0] sm:$0xff] }
 0x23a   : > { %3203 = vmatpush.msra.mxu3 %v704_v38  ;;  %3268 = vmatpush.msra.mxu1 %v1082_v40  ;;  %v2737_v35 = vpop.f32.mrf.mxu0  ;;  %3830 = vst [vmem:[%s4684_s26 + $0x158] sm:$0xff] %v2689_v54  ;;  %v2714_v63 = vpop.f32.mrf.mxu2  ;;  %v416_v40 = vld [vmem:[%s4239_s19 + $0x628] sm:$0xff] }
 0x23b   : > { %3249 = vmatpush.msra.mxu0 %v415_v9  ;;  %3319 = vmatpush.msrb.mxu2 %v648_v18  ;;  %v2738_v0 = vadd.f32 %v2737_v35, %v2712_v49  ;;  %v2715_v16 = vadd.f32 %v2714_v63, %v4706_v45  ;;  %v1083_v9 = vld [vmem:[%s4239_s19 + $0x1b00] sm:$0xff]  ;;  %v620_v54 = vld [vmem:[%s4239_s19 + $0xc88] sm:$0xff] }
 0x23c   : > { %4057 = vmatpush.msk.msrb.mxu3 %vm1436_vm0, %v1401_v43  ;;  %3269 = vmatpush.msra.mxu1 %v1053_v46  ;;  %v678_v43 = vld [vmem:[%s4239_s19 + $0xe58] sm:$0xff]  ;;  %v387_v18 = vld [vmem:[%s4239_s19 + $0x540] sm:$0xff]  ;;  %v792_v46 = vld [vmem:[%s4239_s19 + $0x11e8] sm:$0xff] }
 0x23d   : > { %3132 = vmatmul.f32.gmra.mxu2 %v5586_v62  ;;  %3250 = vmatpush.msra.mxu0 %v386_v47  ;;  %v649_v47 = vld [vmem:[%s4239_s19 + $0xd70] sm:$0xff]  ;;  %v5819_v49 = vld [vmem:[%s6295_s0 + $0x40] sm:$0x7] }
 0x23e   : > { %3300 = vmatpush.msrb.mxu3 %v1372_v48  ;;  %3320 = vmatpush.msrb.mxu2 %v619_v26  ;;  %v2763_v5 = vpop.f32.mrf.mxu1  ;;  %v358_v26 = vld [vmem:[%s4239_s19 + $0x458] sm:$0xff]  ;;  %v591_v63 = vld [vmem:[%s4239_s19 + $0xba0] sm:$0xff] }
 0x23f   : > { %4050 = vmatmul.msk.f32.vlgmr.msrb.gmra.mxu0 %vm1426_vm1, %v5748_v57  ;;  %3270 = vmatpush.msra.mxu1 %v1024_v41  ;;  %v2764_v39 = vadd.f32 %v2763_v5, %v2738_v0  ;;  %v763_v41 = vld [vmem:[%s4239_s19 + $0x1100] sm:$0xff] }
 0x240   : > { %3251 = vmatpush.msra.mxu0 %v357_v28  ;;  %3301 = vmatpush.msrb.mxu3 %v1343_v44 }
 0x241   : > { %3321 = vmatpush.msrb.mxu2 %v590_v56  ;;  %3178 = vmatmul.f32.vlgmr.msrb.gmra.mxu1 %v5761_v3  ;;  %3801 = vst [vmem:[%s4684_s26 + $0x78] sm:$0xff] %v2764_v39  ;;  %v2691_v22 = vpop.f32.mrf.mxu3  ;;  %v329_v56 = vld [vmem:[%s4239_s19 + $0x370] sm:$0xff]  ;;  %v271_v39 = vld [vmem:[%s4239_s19 + $0x1a0] sm:$0xff] }
 0x242   : > { %3271 = vmatpush.msra.mxu1 %v995_v51  ;;  %3252 = vmatpush.msra.mxu0 %v328_v59  ;;  %v2692_v55 = vadd.f32 %v2691_v22, %v2666_v14  ;;  %v5830_v51 = vld [vmem:[%s6295_s0 + $0x30] sm:$0x7]  ;;  %v734_v59 = vld [vmem:[%s4239_s19 + $0x1018] sm:$0xff] }
 0x243   : > { %3302 = vmatpush.msrb.mxu3 %v1314_v2  ;;  %3322 = vmatpush.msrb.mxu2 %v561_v30  ;;  %v300_v30 = vld [vmem:[%s4239_s19 + $0x288] sm:$0xff]  ;;  %v533_v14 = vld [vmem:[%s4239_s19 + $0x9d0] sm:$0xff] }
 0x244   : > { %3204 = vmatmul.f32.vlgmr.msra.gmra.mxu3 %v5522_v11  ;;  %3272 = vmatpush.msra.mxu1 %v966_v4  ;;  %v241_v11 = vld [vmem:[%s4239_s19 + $0xb0] sm:$0xff]  ;;  %3859 = vst [vmem:[%s4684_s26 + $0x240] sm:$0x7] %v2692_v55  ;;  %v2717_v29 = vpop.f32.mrf.mxu2 }
 0x245   : > { %3253 = vmatpush.msra.mxu0 %v299_v50  ;;  %3303 = vmatpush.msrb.mxu3 %v1285_v60  ;;  %v2740_v27 = vpop.f32.mrf.mxu0  ;;  %v2718_v23 = vadd.f32 %v2717_v29, %v4731_v6  ;;  %v705_v4 = vld [vmem:[%s4239_s19 + $0xf30] sm:$0xff]  ;;  %v967_v50 = vld [vmem:[%s4239_s19 + $0x1760] sm:$0xff]  ;;  %v562_v60 = vld [vmem:[%s4239_s19 + $0xab8] sm:$0xff] }
 0x246   : > { %3323 = vmatpush.msrb.mxu2 %v532_v1  ;;  %3273 = vmatpush.msra.mxu1 %v937_v12  ;;  %v2741_v24 = vadd.f32 %v2740_v27, %v2715_v16  ;;  %v1402_v1 = vld [vmem:[%s4239_s19 + $0x24f8] sm:$0x1f]  ;;  %v909_v16 = vld [vmem:[%s4239_s19 + $0x1590] sm:$0xff]  ;;  %v5860_v27 = vld [vmem:[%s6295_s0 + $0x8] sm:$0xff] }
 0x247   : > { %4054 = vmatmul.msk.f32.vlgmr.msra.gmra.mxu2 %vm1426_vm1, %v5748_v57  ;;  %3254 = vmatpush.msra.mxu0 %v270_v15  ;;  %v1113_v29 = vld [vmem:[%s4239_s19 + $0x1bf0] sm:$0xff] }
 0x248   : > { %3304 = vmatpush.msrb.mxu3 %v1256_v19  ;;  %3324 = vmatpush.msrb.mxu2 %v503_v52  ;;  %v2766_v34 = vpop.f32.mrf.mxu1  ;;  %v242_v19 = vld [vmem:[%s4239_s19 + $0xb8] sm:$0xff]  ;;  %v1373_v52 = vld [vmem:[%s4239_s19 + $0x2410] sm:$0xff] }
 0x249   : > { %4051 = vmatmul.msk.f32.gmra.mxu0 %vm1426_vm1, %v5784_v31  ;;  %3274 = vmatpush.msra.mxu1 %v908_v21  ;;  %v2767_v38 = vadd.f32 %v2766_v34, %v2741_v24  ;;  %v1315_v24 = vld [vmem:[%s4239_s19 + $0x2240] sm:$0xff]  ;;  %v1286_v34 = vld [vmem:[%s4239_s19 + $0x2158] sm:$0xff] }
 0x24a   : > { %3255 = vmatpush.msra.mxu0 %v241_v11  ;;  %3305 = vmatpush.msrb.mxu3 %v1227_v58  ;;  %v504_v11 = vld [vmem:[%s4239_s19 + $0x8e8] sm:$0xff]  ;;  %v1142_v58 = vld [vmem:[%s4239_s19 + $0x1cd8] sm:$0xff] }
 0x24b   : > { %3325 = vmatpush.msrb.mxu2 %v474_v25  ;;  %3181 = vmatmul.f32.gmra.mxu1 %v5796_v33  ;;  %3831 = vst [vmem:[%s4684_s26 + $0x160] sm:$0xff] %v2767_v38  ;;  %v2789_v48 = vpop.f32.mrf.mxu3  ;;  %v1344_v25 = vld [vmem:[%s4239_s19 + $0x2328] sm:$0xff]  ;;  %v1055_v38 = vld [vmem:[%s4239_s19 + $0x1a20] sm:$0xff] }
 0x24c   : > { %3275 = vmatpush.msra.mxu1 %v879_v13  ;;  %3344 = vmatpush.msrb.mxu0 %v1141_v20  ;;  %v2790_v0 = vadd.f32 %v2789_v48, %v4661_v17  ;;  %v880_v13 = vld [vmem:[%s4239_s19 + $0x14a8] sm:$0xff]  ;;  %v475_v20 = vld [vmem:[%s4239_s19 + $0x800] sm:$0xff] }
 0x24d   : > { %3306 = vmatpush.msrb.mxu3 %v1198_v32  ;;  %3326 = vmatpush.msrb.mxu2 %v445_v10  ;;  %v851_v32 = vld [vmem:[%s4239_s19 + $0x13c0] sm:$0xff]  ;;  %v446_v10 = vld [vmem:[%s4239_s19 + $0x718] sm:$0xff] }
 0x24e   : > { %3207 = vmatmul.f32.gmra.mxu3 %v5555_v7  ;;  %3276 = vmatpush.msra.mxu1 %v850_v8  ;;  %v1054_v7 = vld [vmem:[%s4239_s19 + $0x1a18] sm:$0xff]  ;;  %v2815_v44 = vpop.f32.mrf.mxu2  ;;  %v1084_v8 = vld [vmem:[%s4239_s19 + $0x1b08] sm:$0xff]  ;;  %v5888_v48 = vld [vmem:[%s6295_s0 + $0x20] sm:$0xff] }
 0x24f   : > { %3345 = vmatpush.msrb.mxu0 %v1112_v36  ;;  %3307 = vmatpush.msrb.mxu3 %v1169_v37  ;;  %v2743_v28 = vpop.f32.mrf.mxu0  ;;  %v2816_v12 = vadd.f32 %v2815_v44, %v2790_v0  ;;  %v417_v36 = vld [vmem:[%s4239_s19 + $0x630] sm:$0xff]  ;;  %v822_v37 = vld [vmem:[%s4239_s19 + $0x12d8] sm:$0xff]  ;;  %v1199_v44 = vld [vmem:[%s4239_s19 + $0x1ea0] sm:$0xff] }
 0x250   : > { %3327 = vmatpush.msrb.mxu2 %v416_v40  ;;  %3277 = vmatpush.msra.mxu1 %v821_v42  ;;  %v2744_v35 = vadd.f32 %v2743_v28, %v2718_v23  ;;  %v388_v23 = vld [vmem:[%s4239_s19 + $0x548] sm:$0xff]  ;;  %v997_v28 = vld [vmem:[%s4239_s19 + $0x1850] sm:$0xff] }
 0x251   : > { %4055 = vmatmul.msk.f32.gmra.mxu2 %vm1426_vm1, %v5784_v31  ;;  %3346 = vmatpush.msrb.mxu0 %v1083_v9  ;;  %v1257_v9 = vld [vmem:[%s4239_s19 + $0x2070] sm:$0xff] }
 0x252   : > { %3396 = vmatpush.msra.mxu3 %v678_v43  ;;  %3328 = vmatpush.msrb.mxu2 %v387_v18  ;;  %v793_v18 = vld [vmem:[%s4239_s19 + $0x11f0] sm:$0xff] }
 0x253   : > { %4052 = vmatmul.msk.f32.gmra.mxu0 %vm1426_vm1, %v5819_v49  ;;  %3278 = vmatpush.msra.mxu1 %v792_v46  ;;  %v2769_v2 = vpop.f32.mrf.mxu1  ;;  %v301_v0 = vld [vmem:[%s4239_s19 + $0x290] sm:$0xff] }
 0x254   : > { %3347 = vmatpush.msrb.mxu0 %v1054_v7  ;;  %3397 = vmatpush.msra.mxu3 %v649_v47  ;;  %v2770_v5 = vadd.f32 %v2769_v2, %v2744_v35  ;;  %v1026_v7 = vld [vmem:[%s4239_s19 + $0x1938] sm:$0xff]  ;;  %v1228_v47 = vld [vmem:[%s4239_s19 + $0x1f88] sm:$0xff] }
 0x255   : > { %3329 = vmatpush.msrb.mxu2 %v358_v26  ;;  %3184 = vmatmul.f32.gmra.mxu1 %v5830_v51  ;;  %v764_v26 = vld [vmem:[%s4239_s19 + $0x1108] sm:$0xff] }
 0x256   : > { %3279 = vmatpush.msra.mxu1 %v763_v41  ;;  %3348 = vmatpush.msrb.mxu0 %v1025_v53  ;;  %3860 = vst [vmem:[%s4684_s26 + $0x248] sm:$0x7] %v2770_v5  ;;  %v2792_v15 = vpop.f32.mrf.mxu3  ;;  %v359_v41 = vld [vmem:[%s4239_s19 + $0x460] sm:$0xff] }
 0x257   : > { %3398 = vmatpush.msra.mxu3 %v620_v54  ;;  %3330 = vmatpush.msrb.mxu2 %v329_v56  ;;  %v2793_v43 = vadd.f32 %v2792_v15, %v4706_v45  ;;  %v735_v54 = vld [vmem:[%s4239_s19 + $0x1020] sm:$0xff]  ;;  %v330_v56 = vld [vmem:[%s4239_s19 + $0x378] sm:$0xff] }
 0x258   : > { %3210 = vmatmul.f32.gmra.mxu3 %v5586_v62  ;;  %3280 = vmatpush.msra.mxu1 %v734_v59  ;;  %v938_v62 = vld [vmem:[%s4239_s19 + $0x1678] sm:$0xff]  ;;  %v2818_v21 = vpop.f32.mrf.mxu2  ;;  %v968_v59 = vld [vmem:[%s4239_s19 + $0x1768] sm:$0xff] }
 0x259   : > { %3349 = vmatpush.msrb.mxu0 %v996_v61  ;;  %3399 = vmatpush.msra.mxu3 %v591_v63  ;;  %v2819_v53 = vadd.f32 %v2818_v21, %v2793_v43  ;;  %v1170_v61 = vld [vmem:[%s4239_s19 + $0x1db8] sm:$0xff]  ;;  %v1085_v43 = vld [vmem:[%s4239_s19 + $0x1b10] sm:$0xff] }
 0x25a   : > { %3331 = vmatpush.msrb.mxu2 %v300_v30  ;;  %3281 = vmatpush.msra.mxu1 %v705_v4  ;;  %v2841_v22 = vpop.f32.mrf.mxu0  ;;  %v706_v30 = vld [vmem:[%s4239_s19 + $0xf38] sm:$0xff]  ;;  %v939_v4 = vld [vmem:[%s4239_s19 + $0x1680] sm:$0xff] }
 0x25b   : > { %4056 = vmatmul.msk.f32.gmra.mxu2 %vm1426_vm1, %v5819_v49  ;;  %3350 = vmatpush.msrb.mxu0 %v967_v50  ;;  %v2842_v55 = vadd.f32 %v2841_v22, %v2816_v12  ;;  %v1403_v12 = vld [vmem:[%s4239_s19 + $0x2500] sm:$0x1f]  ;;  %v910_v15 = vld [vmem:[%s4239_s19 + $0x1598] sm:$0xff]  ;;  %v881_v22 = vld [vmem:[%s4239_s19 + $0x14b0] sm:$0xff] }
 0x25c   : > { %3400 = vmatpush.msra.mxu3 %v562_v60  ;;  %3332 = vmatpush.msrb.mxu2 %v271_v39  ;;  %v679_v60 = vld [vmem:[%s4239_s19 + $0xe60] sm:$0xff]  ;;  %v5919_v21 = vld [vmem:[%s6295_s0 + $0x38] sm:$0x7] }
 0x25d   : > { %4061 = vmatpush.msk.msrb.mxu1 %vm1436_vm0, %v1402_v1  ;;  %3256 = vmatmul.f32.vlgmr.msra.gmra.mxu0 %v5761_v3  ;;  %3802 = vst [vmem:[%s4684_s26 + $0x80] sm:$0xff] %v2842_v55  ;;  %v621_v55 = vld [vmem:[%s4239_s19 + $0xc90] sm:$0xff] }
 0x25e   : > { %3351 = vmatpush.msrb.mxu0 %v938_v62  ;;  %3401 = vmatpush.msra.mxu3 %v533_v14  ;;  %v272_v14 = vld [vmem:[%s4239_s19 + $0x1a8] sm:$0xff] }
 0x25f   : > { %3333 = vmatpush.msrb.mxu2 %v242_v19  ;;  %3378 = vmatpush.msrb.mxu1 %v1373_v52  ;;  %v2795_v40 = vpop.f32.mrf.mxu3  ;;  %v650_v52 = vld [vmem:[%s4239_s19 + $0xd78] sm:$0xff] }
 0x260   : > { %3282 = vmatmul.f32.vlgmr.msra.gmra.mxu1 %v5860_v27  ;;  %3352 = vmatpush.msrb.mxu0 %v909_v16  ;;  %v2796_v39 = vadd.f32 %v2795_v40, %v4731_v6  ;;  %v1374_v16 = vld [vmem:[%s4239_s19 + $0x2418] sm:$0xff]  ;;  %v563_v40 = vld [vmem:[%s4239_s19 + $0xac0] sm:$0xff] }
 0x261   : > { %3402 = vmatpush.msra.mxu3 %v504_v11  ;;  %3422 = vmatpush.msra.mxu2 %v1142_v58  ;;  %v2867_v42 = vpop.f32.mrf.mxu1  ;;  %v243_v58 = vld [vmem:[%s4239_s19 + $0xc0] sm:$0xff] }
 0x262   : > { %3379 = vmatpush.msrb.mxu1 %v1344_v25  ;;  %4058 = vmatmul.msk.f32.vlgmr.msrb.gmra.mxu3 %vm1426_vm1, %v5748_v57  ;;  %v2821_v46 = vpop.f32.mrf.mxu2  ;;  %v2868_v35 = vadd.f32 %v2867_v42, %v4661_v17  ;;  %v1345_v25 = vld [vmem:[%s4239_s19 + $0x2330] sm:$0xff] }
 0x263   : > { %3353 = vmatpush.msrb.mxu0 %v880_v13  ;;  %3403 = vmatpush.msra.mxu3 %v475_v20  ;;  %v2822_v11 = vadd.f32 %v2821_v46, %v2796_v39  ;;  %v1143_v13 = vld [vmem:[%s4239_s19 + $0x1ce0] sm:$0xff] }
 0x264   : > { %3423 = vmatpush.msra.mxu2 %v1113_v29  ;;  %3380 = vmatpush.msrb.mxu1 %v1315_v24  ;;  %v852_v29 = vld [vmem:[%s4239_s19 + $0x13c8] sm:$0xff] }
 0x265   : > { %3354 = vmatpush.msrb.mxu0 %v851_v32  ;;  %3404 = vmatpush.msra.mxu3 %v446_v10  ;;  %v592_v24 = vld [vmem:[%s4239_s19 + $0xba8] sm:$0xff] }
 0x266   : > { %3424 = vmatpush.msra.mxu2 %v1084_v8  ;;  %3381 = vmatpush.msrb.mxu1 %v1286_v34  ;;  %v1316_v10 = vld [vmem:[%s4239_s19 + $0x2248] sm:$0xff]  ;;  %v1114_v8 = vld [vmem:[%s4239_s19 + $0x1bf8] sm:$0xff] }
 0x267   : > { %3259 = vmatmul.f32.gmra.mxu0 %v5796_v33  ;;  %3405 = vmatpush.msra.mxu3 %v417_v36  ;;  %v823_v36 = vld [vmem:[%s4239_s19 + $0x12e0] sm:$0xff] }
 0x268   : > { %3355 = vmatpush.msrb.mxu0 %v822_v37  ;;  %3425 = vmatpush.msra.mxu2 %v1055_v38 }
 0x269   : > { %3334 = vmatmul.f32.vlgmr.msrb.gmra.mxu2 %v5761_v3  ;;  %3382 = vmatpush.msrb.mxu1 %v1257_v9  ;;  %v2844_v63 = vpop.f32.mrf.mxu0  ;;  %v1287_v9 = vld [vmem:[%s4239_s19 + $0x2160] sm:$0xff] }
 0x26a   : > { %3285 = vmatmul.f32.gmra.mxu1 %v5888_v48  ;;  %3356 = vmatpush.msrb.mxu0 %v793_v18  ;;  %v2845_v2 = vadd.f32 %v2844_v63, %v2819_v53  ;;  %v2893_v50 = vpop.f32.mrf.mxu3  ;;  %v794_v18 = vld [vmem:[%s4239_s19 + $0x11f8] sm:$0xff]  ;;  %v505_v53 = vld [vmem:[%s4239_s19 + $0x8f0] sm:$0xff] }
 0x26b   : > { %3406 = vmatpush.msra.mxu3 %v388_v23  ;;  %3426 = vmatpush.msra.mxu2 %v1026_v7  ;;  %v2894_v1 = vadd.f32 %v2893_v50, %v2868_v35  ;;  %v534_v23 = vld [vmem:[%s4239_s19 + $0x9d8] sm:$0xff]  ;;  %v476_v35 = vld [vmem:[%s4239_s19 + $0x808] sm:$0xff]  ;;  %v1171_v50 = vld [vmem:[%s4239_s19 + $0x1dc0] sm:$0xff] }
 0x26c   : > { %3383 = vmatpush.msrb.mxu1 %v1228_v47  ;;  %4059 = vmatmul.msk.f32.gmra.mxu3 %vm1426_vm1, %v5784_v31  ;;  %v2870_v5 = vpop.f32.mrf.mxu1  ;;  %3832 = vst [vmem:[%s4684_s26 + $0x168] sm:$0xff] %v2845_v2  ;;  %v2919_v62 = vpop.f32.mrf.mxu2  ;;  %v1258_v7 = vld [vmem:[%s4239_s19 + $0x2078] sm:$0xff] }
 0x26d   : > { %3357 = vmatpush.msrb.mxu0 %v764_v26  ;;  %3407 = vmatpush.msra.mxu3 %v359_v41  ;;  %v2920_v19 = vadd.f32 %v2919_v62, %v2894_v1  ;;  %v2871_v20 = vadd.f32 %v2870_v5, %v4706_v45  ;;  %v1056_v26 = vld [vmem:[%s4239_s19 + $0x1a28] sm:$0xff]  ;;  %v765_v41 = vld [vmem:[%s4239_s19 + $0x1110] sm:$0xff]  ;;  %v998_v63 = vld [vmem:[%s4239_s19 + $0x1858] sm:$0xff] }
 0x26e   : > { %3427 = vmatpush.msra.mxu2 %v997_v28  ;;  %3384 = vmatpush.msrb.mxu1 %v1199_v44  ;;  %v1229_v28 = vld [vmem:[%s4239_s19 + $0x1f90] sm:$0xff]  ;;  %v1027_v44 = vld [vmem:[%s4239_s19 + $0x1940] sm:$0xff] }
 0x26f   : > { %3358 = vmatpush.msrb.mxu0 %v735_v54  ;;  %3408 = vmatpush.msra.mxu3 %v330_v56  ;;  %3803 = vst [vmem:[%s4684_s26 + $0x88] sm:$0xff] %v2920_v19  ;;  %v736_v56 = vld [vmem:[%s4239_s19 + $0x1028] sm:$0xff] }
 0x270   : > { %3428 = vmatpush.msra.mxu2 %v968_v59  ;;  %3385 = vmatpush.msrb.mxu1 %v1170_v61  ;;  %v1200_v61 = vld [vmem:[%s4239_s19 + $0x1ea8] sm:$0xff] }
 0x271   : > { %3262 = vmatmul.f32.gmra.mxu0 %v5830_v51  ;;  %3409 = vmatpush.msra.mxu3 %v301_v0  ;;  %v707_v0 = vld [vmem:[%s4239_s19 + $0xf40] sm:$0xff]  ;;  %v940_v19 = vld [vmem:[%s4239_s19 + $0x1688] sm:$0xff] }
 0x272   : > { %3359 = vmatpush.msrb.mxu0 %v706_v30  ;;  %3429 = vmatpush.msra.mxu2 %v939_v4  ;;  %v447_v4 = vld [vmem:[%s4239_s19 + $0x720] sm:$0xff] }
 0x273   : > { %3474 = vmatpush.msra.mxu1 %v679_v60  ;;  %3337 = vmatmul.f32.gmra.mxu2 %v5796_v33  ;;  %v2847_v32 = vpop.f32.mrf.mxu0  ;;  %v969_v60 = vld [vmem:[%s4239_s19 + $0x1770] sm:$0xff] }
 0x274   : > { %4065 = vmatpush.msk.msra.mxu0 %vm1436_vm0, %v1403_v12  ;;  %3288 = vmatmul.f32.gmra.mxu1 %v5919_v21  ;;  %v2848_v34 = vadd.f32 %v2847_v32, %v2822_v11  ;;  %v1404_v12 = vld [vmem:[%s4239_s19 + $0x2508] sm:$0x1f] }
 0x275   : > { %3410 = vmatpush.msra.mxu3 %v272_v14  ;;  %3430 = vmatpush.msra.mxu2 %v910_v15  ;;  %v2896_v38 = vpop.f32.mrf.mxu3  ;;  %v418_v14 = vld [vmem:[%s4239_s19 + $0x638] sm:$0xff]  ;;  %v680_v15 = vld [vmem:[%s4239_s19 + $0xe68] sm:$0xff] }
 0x276   : > { %3475 = vmatpush.msra.mxu1 %v650_v52  ;;  %3456 = vmatpush.msra.mxu0 %v1374_v16  ;;  %v2873_v37 = vpop.f32.mrf.mxu1  ;;  %3861 = vst [vmem:[%s4684_s26 + $0x250] sm:$0x7] %v2848_v34  ;;  %v2897_v42 = vadd.f32 %v2896_v38, %v2871_v20  ;;  %v1375_v52 = vld [vmem:[%s4239_s19 + $0x2420] sm:$0xff]  ;;  %v389_v16 = vld [vmem:[%s4239_s19 + $0x550] sm:$0xff]  ;;  %v622_v20 = vld [vmem:[%s4239_s19 + $0xc98] sm:$0xff] }
 0x277   : > { %4060 = vmatmul.msk.f32.gmra.mxu3 %vm1426_vm1, %v5819_v49  ;;  %3431 = vmatpush.msra.mxu2 %v881_v22  ;;  %v2922_v46 = vpop.f32.mrf.mxu2  ;;  %v2874_v54 = vadd.f32 %v2873_v37, %v4731_v6  ;;  %v331_v34 = vld [vmem:[%s4239_s19 + $0x380] sm:$0xff]  ;;  %v853_v38 = vld [vmem:[%s4239_s19 + $0x13d0] sm:$0xff] }
 0x278   : > { %3411 = vmatpush.msra.mxu3 %v243_v58  ;;  %3476 = vmatpush.msra.mxu1 %v621_v55  ;;  %v2923_v47 = vadd.f32 %v2922_v46, %v2897_v42  ;;  %v651_v58 = vld [vmem:[%s4239_s19 + $0xd80] sm:$0xff]  ;;  %v1288_v42 = vld [vmem:[%s4239_s19 + $0x2168] sm:$0xff] }
 0x279   : > { %3457 = vmatpush.msra.mxu0 %v1345_v25  ;;  %3432 = vmatpush.msra.mxu2 %v852_v29  ;;  %v911_v55 = vld [vmem:[%s4239_s19 + $0x15a0] sm:$0xff]  ;;  %v1346_v25 = vld [vmem:[%s4239_s19 + $0x2338] sm:$0xff] }
 0x27a   : > { %3500 = vmatpush.msrb.mxu3 %v1143_v13  ;;  %3477 = vmatpush.msra.mxu1 %v592_v24  ;;  %3833 = vst [vmem:[%s4684_s26 + $0x170] sm:$0xff] %v2923_v47  ;;  %v360_v13 = vld [vmem:[%s4239_s19 + $0x468] sm:$0xff]  ;;  %v882_v29 = vld [vmem:[%s4239_s19 + $0x14b8] sm:$0xff]  ;;  %v1259_v46 = vld [vmem:[%s4239_s19 + $0x2080] sm:$0xff] }
 0x27b   : > { %3458 = vmatpush.msra.mxu0 %v1316_v10  ;;  %3433 = vmatpush.msra.mxu2 %v823_v36  ;;  %v1317_v10 = vld [vmem:[%s4239_s19 + $0x2250] sm:$0xff] }
 0x27c   : > { %3501 = vmatpush.msrb.mxu3 %v1114_v8  ;;  %3360 = vmatmul.f32.vlgmr.msrb.gmra.mxu0 %v5860_v27  ;;  %v593_v36 = vld [vmem:[%s4239_s19 + $0xbb0] sm:$0xff] }
 0x27d   : > { %3478 = vmatpush.msra.mxu1 %v563_v40  ;;  %3340 = vmatmul.f32.gmra.mxu2 %v5830_v51 }
 0x27e   : > { %3459 = vmatpush.msra.mxu0 %v1287_v9  ;;  %3502 = vmatpush.msrb.mxu3 %v1085_v43  ;;  %v2945_v59 = vpop.f32.mrf.mxu0  ;;  %v302_v9 = vld [vmem:[%s4239_s19 + $0x298] sm:$0xff]  ;;  %v564_v43 = vld [vmem:[%s4239_s19 + $0xac8] sm:$0xff] }
 0x27f   : > { %4062 = vmatmul.msk.f32.vlgmr.msrb.gmra.mxu1 %vm1426_vm1, %v5748_v57  ;;  %3434 = vmatpush.msra.mxu2 %v794_v18  ;;  %v2899_v2 = vpop.f32.mrf.mxu3  ;;  %v2946_v39 = vadd.f32 %v2945_v59, %v4661_v17  ;;  %v824_v18 = vld [vmem:[%s4239_s19 + $0x12e8] sm:$0xff]  ;;  %v1201_v59 = vld [vmem:[%s4239_s19 + $0x1eb0] sm:$0xff] }
 0x280   : > { %3479 = vmatpush.msra.mxu1 %v534_v23  ;;  %3460 = vmatpush.msra.mxu0 %v1258_v7  ;;  %v2971_v30 = vpop.f32.mrf.mxu1  ;;  %v2900_v5 = vadd.f32 %v2899_v2, %v2874_v54  ;;  %v273_v23 = vld [vmem:[%s4239_s19 + $0x1b0] sm:$0xff]  ;;  %v766_v54 = vld [vmem:[%s4239_s19 + $0x1118] sm:$0xff] }
 0x281   : > { %3503 = vmatpush.msrb.mxu3 %v1056_v26  ;;  %3435 = vmatpush.msra.mxu2 %v765_v41  ;;  %v2972_v22 = vadd.f32 %v2971_v30, %v2946_v39  ;;  %v535_v26 = vld [vmem:[%s4239_s19 + $0x9e0] sm:$0xff]  ;;  %v477_v30 = vld [vmem:[%s4239_s19 + $0x810] sm:$0xff]  ;;  %v448_v39 = vld [vmem:[%s4239_s19 + $0x728] sm:$0xff] }
 0x282   : > { %3412 = vmatmul.f32.vlgmr.msra.gmra.mxu3 %v5761_v3  ;;  %3480 = vmatpush.msra.mxu1 %v505_v53  ;;  %v2925_v1 = vpop.f32.mrf.mxu2  ;;  %v795_v41 = vld [vmem:[%s4239_s19 + $0x1200] sm:$0xff]  ;;  %v1230_v53 = vld [vmem:[%s4239_s19 + $0x1f98] sm:$0xff] }
 0x283   : > { %3461 = vmatpush.msra.mxu0 %v1229_v28  ;;  %3504 = vmatpush.msrb.mxu3 %v1027_v44  ;;  %v2926_v62 = vadd.f32 %v2925_v1, %v2900_v5  ;;  %v244_v28 = vld [vmem:[%s4239_s19 + $0xc8] sm:$0xff]  ;;  %v506_v44 = vld [vmem:[%s4239_s19 + $0x8f8] sm:$0xff]  ;;  %v681_v1 = vld [vmem:[%s4239_s19 + $0xe70] sm:$0xff] }
 0x284   : > { %3436 = vmatpush.msra.mxu2 %v736_v56  ;;  %3481 = vmatpush.msra.mxu1 %v476_v35  ;;  %v1172_v5 = vld [vmem:[%s4239_s19 + $0x1dc8] sm:$0xff] }
 0x285   : > { %3462 = vmatpush.msra.mxu0 %v1200_v61  ;;  %3505 = vmatpush.msrb.mxu3 %v998_v63  ;;  %3862 = vst [vmem:[%s4684_s26 + $0x258] sm:$0x7] %v2926_v62  ;;  %v1144_v61 = vld [vmem:[%s4239_s19 + $0x1ce8] sm:$0xff]  ;;  %v1086_v62 = vld [vmem:[%s4239_s19 + $0x1b18] sm:$0xff] }
 0x286   : > { %3363 = vmatmul.f32.gmra.mxu0 %v5888_v48  ;;  %3437 = vmatpush.msra.mxu2 %v707_v0 }
 0x287   : > { %3482 = vmatpush.msra.mxu1 %v447_v4  ;;  %3438 = vmatmul.f32.vlgmr.msra.gmra.mxu2 %v5860_v27  ;;  %v737_v4 = vld [vmem:[%s4239_s19 + $0x1030] sm:$0xff] }
 0x288   : > { %3463 = vmatpush.msra.mxu0 %v1171_v50  ;;  %3506 = vmatpush.msrb.mxu3 %v969_v60  ;;  %v2948_v11 = vpop.f32.mrf.mxu0  ;;  %v1115_v50 = vld [vmem:[%s4239_s19 + $0x1c00] sm:$0xff] }
 0x289   : > { %4069 = vmatpush.msk.msrb.mxu2 %vm1436_vm0, %v1404_v12  ;;  %4063 = vmatmul.msk.f32.gmra.mxu1 %vm1426_vm1, %v5784_v31  ;;  %v2997_v32 = vpop.f32.mrf.mxu3  ;;  %v2949_v40 = vadd.f32 %v2948_v11, %v4706_v45  ;;  %v708_v12 = vld [vmem:[%s4239_s19 + $0xf48] sm:$0xff]  ;;  %v390_v11 = vld [vmem:[%s4239_s19 + $0x558] sm:$0xff] }
 0x28a   : > { %3483 = vmatpush.msra.mxu1 %v418_v14  ;;  %3552 = vmatpush.msrb.mxu0 %v680_v15  ;;  %v2998_v8 = vadd.f32 %v2997_v32, %v2972_v22  ;;  %v419_v15 = vld [vmem:[%s4239_s19 + $0x640] sm:$0xff]  ;;  %v594_v32 = vld [vmem:[%s4239_s19 + $0xbb8] sm:$0xff] }
 0x28b   : > { %3507 = vmatpush.msrb.mxu3 %v940_v19  ;;  %3534 = vmatpush.msrb.mxu2 %v1375_v52  ;;  %v2974_v24 = vpop.f32.mrf.mxu1  ;;  %v652_v52 = vld [vmem:[%s4239_s19 + $0xd88] sm:$0xff] }
 0x28c   : > { %3415 = vmatmul.f32.gmra.mxu3 %v5796_v33  ;;  %3484 = vmatpush.msra.mxu1 %v389_v16  ;;  %v3023_v37 = vpop.f32.mrf.mxu2  ;;  %3804 = vst [vmem:[%s4684_s26 + $0x90] sm:$0xff] %v2998_v8  ;;  %v2975_v7 = vadd.f32 %v2974_v24, %v2949_v40  ;;  %v1057_v16 = vld [vmem:[%s4239_s19 + $0x1a30] sm:$0xff]  ;;  %v999_v8 = vld [vmem:[%s4239_s19 + $0x1860] sm:$0xff] }
 0x28d   : > { %3553 = vmatpush.msrb.mxu0 %v651_v58  ;;  %3508 = vmatpush.msrb.mxu3 %v911_v55  ;;  %v3024_v60 = vadd.f32 %v3023_v37, %v4661_v17  ;;  %v361_v24 = vld [vmem:[%s4239_s19 + $0x470] sm:$0xff]  ;;  %v303_v40 = vld [vmem:[%s4239_s19 + $0x2a0] sm:$0xff] }
 0x28e   : > { %3535 = vmatpush.msrb.mxu2 %v1346_v25  ;;  %3485 = vmatpush.msra.mxu1 %v360_v13  ;;  %v623_v25 = vld [vmem:[%s4239_s19 + $0xca0] sm:$0xff]  ;;  %v1028_v13 = vld [vmem:[%s4239_s19 + $0x1948] sm:$0xff] }
 0x28f   : > { %3554 = vmatpush.msrb.mxu0 %v622_v20  ;;  %3509 = vmatpush.msrb.mxu3 %v882_v29 }
 0x290   : > { %3536 = vmatpush.msrb.mxu2 %v1317_v10  ;;  %3366 = vmatmul.f32.gmra.mxu0 %v5919_v21 }
 0x291   : > { %3486 = vmatpush.msra.mxu1 %v331_v34  ;;  %3555 = vmatpush.msrb.mxu0 %v593_v36  ;;  %v1405_v34 = vld [vmem:[%s4239_s19 + $0x2510] sm:$0x1f] }
 0x292   : > { %3441 = vmatmul.f32.gmra.mxu2 %v5888_v48  ;;  %3510 = vmatpush.msrb.mxu3 %v853_v38  ;;  %v2951_v47 = vpop.f32.mrf.mxu0  ;;  %v565_v36 = vld [vmem:[%s4239_s19 + $0xad0] sm:$0xff]  ;;  %v970_v38 = vld [vmem:[%s4239_s19 + $0x1778] sm:$0xff] }
 0x293   : > { %3537 = vmatpush.msrb.mxu2 %v1288_v42  ;;  %4064 = vmatmul.msk.f32.gmra.mxu1 %vm1426_vm1, %v5819_v49  ;;  %v3000_v35 = vpop.f32.mrf.mxu3  ;;  %v2952_v0 = vadd.f32 %v2951_v47, %v4731_v6  ;;  %v536_v42 = vld [vmem:[%s4239_s19 + $0x9e8] sm:$0xff] }
 0x294   : > { %3487 = vmatpush.msra.mxu1 %v302_v9  ;;  %3556 = vmatpush.msrb.mxu0 %v564_v43  ;;  %v3001_v63 = vadd.f32 %v3000_v35, %v2975_v7  ;;  %v941_v9 = vld [vmem:[%s4239_s19 + $0x1690] sm:$0xff]  ;;  %v912_v7 = vld [vmem:[%s4239_s19 + $0x15a8] sm:$0xff]  ;;  %v1318_v35 = vld [vmem:[%s4239_s19 + $0x2258] sm:$0xff] }
 0x295   : > { %3511 = vmatpush.msrb.mxu3 %v824_v18  ;;  %3538 = vmatpush.msrb.mxu2 %v1259_v46  ;;  %v2977_v56 = vpop.f32.mrf.mxu1  ;;  %v274_v18 = vld [vmem:[%s4239_s19 + $0x1b8] sm:$0xff] }
 0x296   : > { %3418 = vmatmul.f32.gmra.mxu3 %v5830_v51  ;;  %3488 = vmatpush.msra.mxu1 %v273_v23  ;;  %v3026_v2 = vpop.f32.mrf.mxu2  ;;  %3834 = vst [vmem:[%s4684_s26 + $0x178] sm:$0xff] %v3001_v63  ;;  %v2978_v14 = vadd.f32 %v2977_v56, %v2952_v0  ;;  %v507_v23 = vld [vmem:[%s4239_s19 + $0x900] sm:$0xff]  ;;  %v1289_v0 = vld [vmem:[%s4239_s19 + $0x2170] sm:$0xff] }
 0x297   : > { %3557 = vmatpush.msrb.mxu0 %v535_v26  ;;  %3512 = vmatpush.msrb.mxu3 %v795_v41  ;;  %v3027_v37 = vadd.f32 %v3026_v2, %v4706_v45  ;;  %v1347_v41 = vld [vmem:[%s4239_s19 + $0x2340] sm:$0xff]  ;;  %v1116_v2 = vld [vmem:[%s4239_s19 + $0x1c08] sm:$0xff] }
 0x298   : > { %3539 = vmatpush.msrb.mxu2 %v1230_v53  ;;  %3489 = vmatpush.msra.mxu1 %v244_v28  ;;  %v245_v28 = vld [vmem:[%s4239_s19 + $0xd0] sm:$0xff] }
 0x299   : > { %3558 = vmatpush.msrb.mxu0 %v506_v44  ;;  %3513 = vmatpush.msrb.mxu3 %v766_v54  ;;  %v478_v44 = vld [vmem:[%s4239_s19 + $0x818] sm:$0xff]  ;;  %v883_v54 = vld [vmem:[%s4239_s19 + $0x14c0] sm:$0xff] }
 0x29a   : > { %3540 = vmatpush.msrb.mxu2 %v1201_v59  ;;  %3578 = vmatpush.msrb.mxu1 %v1144_v61  ;;  %v1145_v59 = vld [vmem:[%s4239_s19 + $0x1cf0] sm:$0xff]  ;;  %v854_v61 = vld [vmem:[%s4239_s19 + $0x13d8] sm:$0xff] }
 0x29b   : > { %4066 = vmatmul.msk.f32.vlgmr.msra.gmra.mxu0 %vm1426_vm1, %v5748_v57  ;;  %3444 = vmatmul.f32.gmra.mxu2 %v5919_v21 }
 0x29c   : > { %3559 = vmatpush.msrb.mxu0 %v477_v30  ;;  %3514 = vmatpush.msrb.mxu3 %v737_v4  ;;  %v3049_v19 = vpop.f32.mrf.mxu0  ;;  %v420_v30 = vld [vmem:[%s4239_s19 + $0x648] sm:$0xff]  ;;  %v825_v4 = vld [vmem:[%s4239_s19 + $0x12f0] sm:$0xff] }
 0x29d   : > { %3541 = vmatpush.msrb.mxu2 %v1172_v5  ;;  %3579 = vmatpush.msrb.mxu1 %v1115_v50  ;;  %v3050_v22 = vadd.f32 %v3049_v19, %v3024_v60  ;;  %v3003_v58 = vpop.f32.mrf.mxu3  ;;  %v1260_v5 = vld [vmem:[%s4239_s19 + $0x2088] sm:$0xff]  ;;  %v1087_v60 = vld [vmem:[%s4239_s19 + $0x1b20] sm:$0xff] }
 0x29e   : > { %3560 = vmatpush.msrb.mxu0 %v448_v39  ;;  %3515 = vmatpush.msrb.mxu3 %v708_v12  ;;  %v3004_v20 = vadd.f32 %v3003_v58, %v2978_v14  ;;  %v391_v39 = vld [vmem:[%s4239_s19 + $0x560] sm:$0xff]  ;;  %v1202_v58 = vld [vmem:[%s4239_s19 + $0x1eb8] sm:$0xff] }
 0x29f   : > { %3630 = vmatpush.msra.mxu2 %v681_v1  ;;  %3580 = vmatpush.msrb.mxu1 %v1086_v62  ;;  %v3075_v55 = vpop.f32.mrf.mxu1  ;;  %v796_v1 = vld [vmem:[%s4239_s19 + $0x1208] sm:$0xff]  ;;  %v1231_v14 = vld [vmem:[%s4239_s19 + $0x1fa0] sm:$0xff] }
 0x2a0   : > { %3516 = vmatmul.f32.vlgmr.msrb.gmra.mxu3 %v5860_v27  ;;  %3561 = vmatpush.msrb.mxu0 %v419_v15  ;;  %v3076_v29 = vadd.f32 %v3075_v55, %v3050_v22  ;;  %3863 = vst [vmem:[%s4684_s26 + $0x260] sm:$0x7] %v3004_v20  ;;  %v3029_v10 = vpop.f32.mrf.mxu2  ;;  %v1058_v15 = vld [vmem:[%s4239_s19 + $0x1a38] sm:$0xff]  ;;  %v767_v22 = vld [vmem:[%s4239_s19 + $0x1120] sm:$0xff]  ;;  %v1029_v55 = vld [vmem:[%s4239_s19 + $0x1950] sm:$0xff] }
 0x2a1   : > { %3631 = vmatpush.msra.mxu2 %v652_v52  ;;  %3581 = vmatpush.msrb.mxu1 %v1057_v16  ;;  %v3030_v63 = vadd.f32 %v3029_v10, %v4731_v6  ;;  %v362_v52 = vld [vmem:[%s4239_s19 + $0x478] sm:$0xff]  ;;  %v1173_v20 = vld [vmem:[%s4239_s19 + $0x1dd0] sm:$0xff] }
 0x2a2   : > { %3490 = vmatmul.f32.vlgmr.msra.gmra.mxu1 %v5761_v3  ;;  %3562 = vmatpush.msrb.mxu0 %v390_v11  ;;  %3805 = vst [vmem:[%s4684_s26 + $0x98] sm:$0xff] %v3076_v29  ;;  %v332_v3 = vld [vmem:[%s4239_s19 + $0x388] sm:$0xff]  ;;  %v709_v10 = vld [vmem:[%s4239_s19 + $0xf50] sm:$0xff] }
 0x2a3   : > { %3632 = vmatpush.msra.mxu2 %v623_v25  ;;  %3582 = vmatpush.msrb.mxu1 %v1028_v13  ;;  %v333_v25 = vld [vmem:[%s4239_s19 + $0x390] sm:$0xff]  ;;  %v738_v13 = vld [vmem:[%s4239_s19 + $0x1038] sm:$0xff]  ;;  %v1000_v29 = vld [vmem:[%s4239_s19 + $0x1868] sm:$0xff] }
 0x2a4   : > { %4067 = vmatmul.msk.f32.gmra.mxu0 %vm1426_vm1, %v5784_v31  ;;  %4070 = vmatmul.msk.f32.vlgmr.msrb.gmra.mxu2 %vm1426_vm1, %v5748_v57  ;;  %v1376_v57 = vld [vmem:[%s4239_s19 + $0x2428] sm:$0xff] }
 0x2a5   : > { %3563 = vmatpush.msrb.mxu0 %v361_v24  ;;  %3633 = vmatpush.msra.mxu2 %v594_v32  ;;  %v304_v32 = vld [vmem:[%s4239_s19 + $0x2a8] sm:$0xff] }
 0x2a6   : > { %3583 = vmatpush.msrb.mxu1 %v999_v8  ;;  %4073 = vmatpush.msk.msra.mxu3 %vm1436_vm0, %v1405_v34  ;;  %v971_v8 = vld [vmem:[%s4239_s19 + $0x1780] sm:$0xff] }
 0x2a7   : > { %3564 = vmatpush.msrb.mxu0 %v332_v3  ;;  %3634 = vmatpush.msra.mxu2 %v565_v36  ;;  %v3052_v43 = vpop.f32.mrf.mxu0  ;;  %v275_v34 = vld [vmem:[%s4239_s19 + $0x1c0] sm:$0xff]  ;;  %v6105_v3 = vld [vmem:[%s6295_s0 + $0x10] sm:$0xff]  ;;  %v942_v36 = vld [vmem:[%s4239_s19 + $0x1698] sm:$0xff] }
 0x2a8   : > { %3584 = vmatpush.msrb.mxu1 %v970_v38  ;;  %3519 = vmatmul.f32.gmra.mxu3 %v5888_v48  ;;  %v3053_v46 = vadd.f32 %v3052_v43, %v3027_v37  ;;  %v3101_v26 = vpop.f32.mrf.mxu3  ;;  %v682_v37 = vld [vmem:[%s4239_s19 + $0xe78] sm:$0xff] }
 0x2a9   : > { %3565 = vmatpush.msrb.mxu0 %v303_v40  ;;  %3635 = vmatpush.msra.mxu2 %v536_v42  ;;  %v3078_v47 = vpop.f32.mrf.mxu1  ;;  %v3102_v16 = vadd.f32 %v3101_v26, %v4661_v17  ;;  %v246_v42 = vld [vmem:[%s4239_s19 + $0xd8] sm:$0xff]  ;;  %v1377_v26 = vld [vmem:[%s4239_s19 + $0x2430] sm:$0xff] }
 0x2aa   : > { %3585 = vmatpush.msrb.mxu1 %v941_v9  ;;  %3612 = vmatpush.msra.mxu3 %v1376_v57  ;;  %v3079_v53 = vadd.f32 %v3078_v47, %v3053_v46  ;;  %v3127_v56 = vpop.f32.mrf.mxu2  ;;  %v1406_v9 = vld [vmem:[%s4239_s19 + $0x2518] sm:$0x1f]  ;;  %v913_v57 = vld [vmem:[%s4239_s19 + $0x15b0] sm:$0xff]  ;;  %v884_v47 = vld [vmem:[%s4239_s19 + $0x14c8] sm:$0xff] }
 0x2ab   : > { %3493 = vmatmul.f32.gmra.mxu1 %v5796_v33  ;;  %3566 = vmatpush.msrb.mxu0 %v274_v18  ;;  %v449_v33 = vld [vmem:[%s4239_s19 + $0x730] sm:$0xff]  ;;  %v3128_v24 = vadd.f32 %v3127_v56, %v3102_v16  ;;  %v1146_v46 = vld [vmem:[%s4239_s19 + $0x1cf8] sm:$0xff]  ;;  %v1088_v56 = vld [vmem:[%s4239_s19 + $0x1b28] sm:$0xff] }
 0x2ac   : > { %3636 = vmatpush.msra.mxu2 %v507_v23  ;;  %3586 = vmatpush.msrb.mxu1 %v912_v7  ;;  %3835 = vst [vmem:[%s4684_s26 + $0x180] sm:$0xff] %v3079_v53  ;;  %v653_v18 = vld [vmem:[%s4239_s19 + $0xd90] sm:$0xff] }
 0x2ad   : > { %3613 = vmatpush.msra.mxu3 %v1347_v41  ;;  %4068 = vmatmul.msk.f32.gmra.mxu0 %vm1426_vm1, %v5819_v49  ;;  %v624_v41 = vld [vmem:[%s4239_s19 + $0xca8] sm:$0xff]  ;;  %v1117_v53 = vld [vmem:[%s4239_s19 + $0x1c10] sm:$0xff] }
 0x2ae   : > { %3567 = vmatpush.msrb.mxu0 %v245_v28  ;;  %3637 = vmatpush.msra.mxu2 %v478_v44  ;;  %v855_v28 = vld [vmem:[%s4239_s19 + $0x13e0] sm:$0xff]  ;;  %v1001_v16 = vld [vmem:[%s4239_s19 + $0x1870] sm:$0xff] }
 0x2af   : > { %4071 = vmatmul.msk.f32.gmra.mxu2 %vm1426_vm1, %v5784_v31  ;;  %3587 = vmatpush.msrb.mxu1 %v883_v54  ;;  %v595_v54 = vld [vmem:[%s4239_s19 + $0xbc0] sm:$0xff] }
 0x2b0   : > { %3614 = vmatpush.msra.mxu3 %v1318_v35  ;;  %3656 = vmatpush.msra.mxu0 %v1145_v59  ;;  %v826_v59 = vld [vmem:[%s4239_s19 + $0x12f8] sm:$0xff] }
 0x2b1   : > { %3638 = vmatpush.msra.mxu2 %v449_v33  ;;  %3588 = vmatpush.msrb.mxu1 %v854_v61  ;;  %v3055_v50 = vpop.f32.mrf.mxu0  ;;  %v6138_v33 = vld [vmem:[%s6295_s0 + $0x28] sm:$0xff] }
 0x2b2   : > { %3615 = vmatpush.msra.mxu3 %v1289_v0  ;;  %3657 = vmatpush.msra.mxu0 %v1116_v2  ;;  %v3056_v31 = vadd.f32 %v3055_v50, %v3030_v63  ;;  %v3104_v62 = vpop.f32.mrf.mxu3  ;;  %v1348_v61 = vld [vmem:[%s4239_s19 + $0x2348] sm:$0xff]  ;;  %v566_v63 = vld [vmem:[%s4239_s19 + $0xad8] sm:$0xff]  ;;  %v1059_v2 = vld [vmem:[%s4239_s19 + $0x1a40] sm:$0xff] }
 0x2b3   : > { %3522 = vmatmul.f32.gmra.mxu3 %v5919_v21  ;;  %3639 = vmatpush.msra.mxu2 %v420_v30  ;;  %v3081_v12 = vpop.f32.mrf.mxu1  ;;  %v3105_v43 = vadd.f32 %v3104_v62, %v4706_v45 }
 0x2b4   : > { %3589 = vmatpush.msrb.mxu1 %v825_v4  ;;  %3616 = vmatpush.msra.mxu3 %v1260_v5  ;;  %v3082_v19 = vadd.f32 %v3081_v12, %v3056_v31  ;;  %v3130_v11 = vpop.f32.mrf.mxu2  ;;  %v1319_v5 = vld [vmem:[%s4239_s19 + $0x2260] sm:$0xff]  ;;  %v537_v31 = vld [vmem:[%s4239_s19 + $0x9f0] sm:$0xff]  ;;  %v1290_v12 = vld [vmem:[%s4239_s19 + $0x2178] sm:$0xff] }
 0x2b5   : > { %3658 = vmatpush.msra.mxu0 %v1087_v60  ;;  %3496 = vmatmul.f32.gmra.mxu1 %v5830_v51  ;;  %v6089_v51 = vld [vmem:[%s6295_s0] sm:$0xff]  ;;  %v3131_v44 = vadd.f32 %v3130_v11, %v3105_v43  ;;  %v797_v60 = vld [vmem:[%s4239_s19 + $0x1210] sm:$0xff] }
 0x2b6   : > { %3640 = vmatpush.msra.mxu2 %v391_v39  ;;  %3590 = vmatpush.msrb.mxu1 %v796_v1  ;;  %3864 = vst [vmem:[%s4684_s26 + $0x268] sm:$0x7] %v3082_v19  ;;  %v6154_v1 = vld [vmem:[%s6295_s0 + $0x30] sm:$0x7]  ;;  %v508_v19 = vld [vmem:[%s4239_s19 + $0x908] sm:$0xff]  ;;  %v479_v11 = vld [vmem:[%s4239_s19 + $0x820] sm:$0xff] }
 0x2b7   : > { %3617 = vmatpush.msra.mxu3 %v1231_v14  ;;  %3659 = vmatpush.msra.mxu0 %v1058_v15  ;;  %v768_v15 = vld [vmem:[%s4239_s19 + $0x1128] sm:$0xff] }
 0x2b8   : > { %3568 = vmatmul.f32.vlgmr.msrb.gmra.mxu0 %v6089_v51  ;;  %3641 = vmatpush.msra.mxu2 %v362_v52 }
 0x2b9   : > { %4072 = vmatmul.msk.f32.gmra.mxu2 %vm1426_vm1, %v5819_v49  ;;  %3591 = vmatpush.msrb.mxu1 %v767_v22  ;;  %v739_v22 = vld [vmem:[%s4239_s19 + $0x1040] sm:$0xff] }
 0x2ba   : > { %3618 = vmatpush.msra.mxu3 %v1202_v58  ;;  %3660 = vmatpush.msra.mxu0 %v1029_v55  ;;  %v972_v55 = vld [vmem:[%s4239_s19 + $0x1788] sm:$0xff] }
 0x2bb   : > { %3642 = vmatpush.msra.mxu2 %v333_v25  ;;  %3592 = vmatpush.msrb.mxu1 %v738_v13  ;;  %v6171_v13 = vld [vmem:[%s6295_s0 + $0x40] sm:$0x7] }
 0x2bc   : > { %3619 = vmatpush.msra.mxu3 %v1173_v20  ;;  %3661 = vmatpush.msra.mxu0 %v1000_v29  ;;  %v3153_v49 = vpop.f32.mrf.mxu0  ;;  %v3107_v40 = vpop.f32.mrf.mxu3  ;;  %v1261_v20 = vld [vmem:[%s4239_s19 + $0x2090] sm:$0xff]  ;;  %v710_v29 = vld [vmem:[%s4239_s19 + $0xf58] sm:$0xff] }
 0x2bd   : > { %4074 = vmatmul.msk.f32.vlgmr.msra.gmra.mxu3 %vm1426_vm1, %v6105_v3  ;;  %3643 = vmatpush.msra.mxu2 %v304_v32  ;;  %v3154_v38 = vadd.f32 %v3153_v49, %v3128_v24  ;;  %v3108_v39 = vadd.f32 %v3107_v40, %v4731_v6  ;;  %v450_v24 = vld [vmem:[%s4239_s19 + $0x738] sm:$0xff]  ;;  %v943_v32 = vld [vmem:[%s4239_s19 + $0x16a0] sm:$0xff]  ;;  %v1232_v49 = vld [vmem:[%s4239_s19 + $0x1fa8] sm:$0xff] }
 0x2be   : > { %3593 = vmatpush.msrb.mxu1 %v709_v10  ;;  %3662 = vmatpush.msra.mxu0 %v971_v8  ;;  %v3179_v23 = vpop.f32.mrf.mxu1  ;;  %v1407_v40 = vld [vmem:[%s4239_s19 + $0x2520] sm:$0x1f] }
 0x2bf   : > { %3594 = vmatmul.f32.vlgmr.msrb.gmra.mxu1 %v5860_v27  ;;  %3644 = vmatpush.msra.mxu2 %v275_v34  ;;  %3806 = vst [vmem:[%s4684_s26 + $0xa0] sm:$0xff] %v3154_v38  ;;  %v6122_v27 = vld [vmem:[%s6295_s0 + $0x18] sm:$0xff]  ;;  %v3180_v35 = vadd.f32 %v3179_v23, %v4661_v17 }
 0x2c0   : > { %3663 = vmatpush.msra.mxu0 %v942_v36  ;;  %3708 = vmatpush.msrb.mxu3 %v682_v37  ;;  %v3133_v7 = vpop.f32.mrf.mxu2  ;;  %v421_v36 = vld [vmem:[%s4239_s19 + $0x650] sm:$0xff]  ;;  %v914_v38 = vld [vmem:[%s4239_s19 + $0x15b8] sm:$0xff] }
 0x2c1   : > { %3571 = vmatmul.f32.gmra.mxu0 %v6122_v27  ;;  %3645 = vmatpush.msra.mxu2 %v246_v42  ;;  %v3134_v58 = vadd.f32 %v3133_v7, %v3108_v39  ;;  %v6189_v42 = vld [vmem:[%s6295_s0 + $0x8] sm:$0xff]  ;;  %v1378_v23 = vld [vmem:[%s4239_s19 + $0x2438] sm:$0xff] }
 0x2c2   : > { %4077 = vmatpush.msk.msra.mxu1 %vm1436_vm0, %v1406_v9  ;;  %3664 = vmatpush.msra.mxu0 %v913_v57  ;;  %v1203_v9 = vld [vmem:[%s4239_s19 + $0x1ec0] sm:$0xff]  ;;  %v392_v57 = vld [vmem:[%s4239_s19 + $0x568] sm:$0xff] }
 0x2c3   : > { %3709 = vmatpush.msrb.mxu3 %v653_v18  ;;  %3734 = vmatpush.msrb.mxu2 %v1146_v46  ;;  %v885_v46 = vld [vmem:[%s4239_s19 + $0x14d0] sm:$0xff]  ;;  %v740_v39 = vld [vmem:[%s4239_s19 + $0x1048] sm:$0xff] }
 0x2c4   : > { %3665 = vmatpush.msra.mxu0 %v884_v47  ;;  %3690 = vmatpush.msra.mxu1 %v1377_v26  ;;  %v1174_v47 = vld [vmem:[%s4239_s19 + $0x1dd8] sm:$0xff]  ;;  %v363_v26 = vld [vmem:[%s4239_s19 + $0x480] sm:$0xff] }
 0x2c5   : > { %3710 = vmatpush.msrb.mxu3 %v624_v41  ;;  %3735 = vmatpush.msrb.mxu2 %v1117_v53  ;;  %v856_v41 = vld [vmem:[%s4239_s19 + $0x13e8] sm:$0xff]  ;;  %v334_v53 = vld [vmem:[%s4239_s19 + $0x398] sm:$0xff] }
 0x2c6   : > { %4075 = vmatmul.msk.f32.gmra.mxu3 %vm1426_vm1, %v6138_v33  ;;  %3666 = vmatpush.msra.mxu0 %v855_v28  ;;  %v3156_v0 = vpop.f32.mrf.mxu0 }
 0x2c7   : > { %3711 = vmatpush.msrb.mxu3 %v595_v54  ;;  %3736 = vmatpush.msrb.mxu2 %v1088_v56  ;;  %v3157_v30 = vadd.f32 %v3156_v0, %v3131_v44  ;;  %v3205_v4 = vpop.f32.mrf.mxu3  ;;  %v827_v44 = vld [vmem:[%s4239_s19 + $0x1300] sm:$0xff]  ;;  %v305_v54 = vld [vmem:[%s4239_s19 + $0x2b0] sm:$0xff]  ;;  %v798_v56 = vld [vmem:[%s4239_s19 + $0x1218] sm:$0xff] }
 0x2c8   : > { %3597 = vmatmul.f32.gmra.mxu1 %v5888_v48  ;;  %3667 = vmatpush.msra.mxu0 %v826_v59  ;;  %v3206_v50 = vadd.f32 %v3205_v4, %v3180_v35  ;;  %v1030_v48 = vld [vmem:[%s4239_s19 + $0x1958] sm:$0xff]  ;;  %v3182_v62 = vpop.f32.mrf.mxu1  ;;  %v1349_v0 = vld [vmem:[%s4239_s19 + $0x2350] sm:$0xff]  ;;  %v247_v4 = vld [vmem:[%s4239_s19 + $0xe0] sm:$0xff] }
 0x2c9   : > { %3691 = vmatpush.msra.mxu1 %v1348_v61  ;;  %3712 = vmatpush.msrb.mxu3 %v566_v63  ;;  %3836 = vst [vmem:[%s4684_s26 + $0x188] sm:$0xff] %v3157_v30  ;;  %v3183_v25 = vadd.f32 %v3182_v62, %v4706_v45  ;;  %v4168_v61 = vld [vmem:[%s6295_s0 + $0x20] sm:$0xff]  ;;  %v276_v63 = vld [vmem:[%s4239_s19 + $0x1c8] sm:$0xff]  ;;  %v769_v30 = vld [vmem:[%s4239_s19 + $0x1130] sm:$0xff] }
 0x2ca   : > { %3737 = vmatpush.msrb.mxu2 %v1059_v2  ;;  %3574 = vmatmul.f32.gmra.mxu0 %v6154_v1  ;;  %v3231_v14 = vpop.f32.mrf.mxu2  ;;  %v711_v62 = vld [vmem:[%s4239_s19 + $0xf60] sm:$0xff] }
 0x2cb   : > { %3646 = vmatmul.f32.vlgmr.msra.gmra.mxu2 %v6089_v51  ;;  %3692 = vmatpush.msra.mxu1 %v1319_v5  ;;  %v3232_v52 = vadd.f32 %v3231_v14, %v3206_v50  ;;  %v1320_v5 = vld [vmem:[%s4239_s19 + $0x2268] sm:$0xff] }
 0x2cc   : > { %3668 = vmatpush.msra.mxu0 %v797_v60  ;;  %3713 = vmatpush.msrb.mxu3 %v537_v31 }
 0x2cd   : > { %3738 = vmatpush.msrb.mxu2 %v1030_v48  ;;  %3693 = vmatpush.msra.mxu1 %v1290_v12  ;;  %3807 = vst [vmem:[%s4684_s26 + $0xa8] sm:$0xff] %v3232_v52  ;;  %v1291_v12 = vld [vmem:[%s4239_s19 + $0x2180] sm:$0xff] }
 0x2ce   : > { %3669 = vmatpush.msra.mxu0 %v768_v15  ;;  %3714 = vmatpush.msrb.mxu3 %v508_v19  ;;  %v1262_v15 = vld [vmem:[%s4239_s19 + $0x2098] sm:$0xff]  ;;  %v1233_v19 = vld [vmem:[%s4239_s19 + $0x1fb0] sm:$0xff] }
 0x2cf   : > { %3739 = vmatpush.msrb.mxu2 %v1001_v16  ;;  %4076 = vmatmul.msk.f32.gmra.mxu3 %vm1426_vm1, %v6171_v13 }
 0x2d0   : > { %3670 = vmatpush.msra.mxu0 %v739_v22  ;;  %3715 = vmatpush.msrb.mxu3 %v479_v11  ;;  %v3159_v10 = vpop.f32.mrf.mxu0  ;;  %v1204_v11 = vld [vmem:[%s4239_s19 + $0x1ec8] sm:$0xff] }
 0x2d1   : > { %3740 = vmatpush.msrb.mxu2 %v972_v55  ;;  %3600 = vmatmul.f32.gmra.mxu1 %v5919_v21  ;;  %v3160_v8 = vadd.f32 %v3159_v10, %v3134_v58  ;;  %v3208_v34 = vpop.f32.mrf.mxu3  ;;  %v1175_v55 = vld [vmem:[%s4239_s19 + $0x1de0] sm:$0xff] }
 0x2d2   : > { %3694 = vmatpush.msra.mxu1 %v1261_v20  ;;  %3671 = vmatpush.msra.mxu0 %v710_v29  ;;  %v3209_v37 = vadd.f32 %v3208_v34, %v3183_v25  ;;  %v3185_v43 = vpop.f32.mrf.mxu1 }
 0x2d3   : > { %3716 = vmatpush.msrb.mxu3 %v450_v24  ;;  %3741 = vmatpush.msrb.mxu2 %v943_v32  ;;  %3865 = vst [vmem:[%s4684_s26 + $0x270] sm:$0x7] %v3160_v8  ;;  %v3186_v28 = vadd.f32 %v3185_v43, %v4731_v6 }
 0x2d4   : > { %3649 = vmatmul.f32.gmra.mxu2 %v6122_v27  ;;  %3672 = vmatmul.f32.vlgmr.msra.gmra.mxu0 %v6189_v42  ;;  %v3234_v18 = vpop.f32.mrf.mxu2 }
 0x2d5   : > { %3695 = vmatpush.msra.mxu1 %v1232_v49  ;;  %3717 = vmatpush.msrb.mxu3 %v421_v36  ;;  %v3235_v7 = vadd.f32 %v3234_v18, %v3209_v37 }
 0x2d6   : > { %3742 = vmatpush.msrb.mxu2 %v914_v38  ;;  %4081 = vmatpush.msk.msrb.mxu0 %vm1436_vm0, %v1407_v40 }
 0x2d7   : > { %3696 = vmatpush.msra.mxu1 %v1203_v9  ;;  %3718 = vmatpush.msrb.mxu3 %v392_v57  ;;  %3837 = vst [vmem:[%s4684_s26 + $0x190] sm:$0xff] %v3235_v7 }
 0x2d8   : > { %3743 = vmatpush.msrb.mxu2 %v885_v46  ;;  %3768 = vmatpush.msrb.mxu0 %v1378_v23 }
 0x2d9   : > { %3697 = vmatpush.msra.mxu1 %v1174_v47  ;;  %3719 = vmatpush.msrb.mxu3 %v363_v26 }
 0x2da   : > { %3744 = vmatpush.msrb.mxu2 %v856_v41  ;;  %4078 = vmatmul.msk.f32.vlgmr.msra.gmra.mxu1 %vm1426_vm1, %v6105_v3  ;;  %v3257_v35 = vpop.f32.mrf.mxu0 }
 0x2db   : > { %3720 = vmatpush.msrb.mxu3 %v334_v53  ;;  %4087 = vmatpush.msk.msrb.mxu1 %vm1436_vm0, %v1407_v40  ;;  %v3211_v59 = vpop.f32.mrf.mxu3  ;;  %v3258_v50 = vadd.f32 %v3257_v35, %v4661_v17 }
 0x2dc   : > { %3745 = vmatpush.msrb.mxu2 %v827_v44  ;;  %3675 = vmatmul.f32.gmra.mxu0 %v4168_v61  ;;  %v3212_v2 = vadd.f32 %v3211_v59, %v3186_v28 }
 0x2dd   : > { %3652 = vmatmul.f32.gmra.mxu2 %v6154_v1  ;;  %3721 = vmatpush.msrb.mxu3 %v305_v54  ;;  %v3283_v60 = vpop.f32.mrf.mxu1 }
 0x2de   : > { %3746 = vmatpush.msrb.mxu2 %v798_v56  ;;  %4088 = vmatpush.msrb.mxu1 %v1378_v23  ;;  %v3237_v31 = vpop.f32.mrf.mxu2  ;;  %v3284_v14 = vadd.f32 %v3283_v60, %v3258_v50 }
 0x2df   : > { %3722 = vmatpush.msrb.mxu3 %v276_v63  ;;  %3769 = vmatpush.msrb.mxu0 %v1349_v0  ;;  %v3238_v48 = vadd.f32 %v3237_v31, %v3212_v2 }
 0x2e0   : > { %3747 = vmatpush.msrb.mxu2 %v769_v30  ;;  %4089 = vmatpush.msrb.mxu1 %v1349_v0 }
 0x2e1   : > { %3723 = vmatpush.msrb.mxu3 %v247_v4  ;;  %3770 = vmatpush.msrb.mxu0 %v1320_v5  ;;  %3866 = vst [vmem:[%s4684_s26 + $0x278] sm:$0x7] %v3238_v48 }
 0x2e2   : > { %3748 = vmatpush.msrb.mxu2 %v740_v39  ;;  %4079 = vmatmul.msk.f32.gmra.mxu1 %vm1426_vm1, %v6138_v33 }
 0x2e3   : > { %3724 = vmatmul.f32.vlgmr.msrb.gmra.mxu3 %v6089_v51  ;;  %3771 = vmatpush.msrb.mxu0 %v1291_v12 }
 0x2e4   : > { %3749 = vmatpush.msrb.mxu2 %v711_v62  ;;  %3678 = vmatmul.f32.gmra.mxu0 %v5919_v21  ;;  %v3260_v52 = vpop.f32.mrf.mxu0 }
 0x2e5   : > { %3750 = vmatmul.f32.vlgmr.msrb.gmra.mxu2 %v6189_v42  ;;  %4090 = vmatpush.msrb.mxu1 %v1320_v5  ;;  %v3309_v16 = vpop.f32.mrf.mxu3  ;;  %v3261_v51 = vadd.f32 %v3260_v52, %v4706_v45 }
 0x2e6   : > { %3772 = vmatpush.msrb.mxu0 %v1262_v15  ;;  %v3310_v22 = vadd.f32 %v3309_v16, %v3284_v14 }
 0x2e7   : > { %4091 = vmatpush.msrb.mxu1 %v1291_v12  ;;  %v3286_v58 = vpop.f32.mrf.mxu1 }
 0x2e8   : > { %3773 = vmatpush.msrb.mxu0 %v1233_v19  ;;  %3808 = vst [vmem:[%s4684_s26 + $0xb0] sm:$0xff] %v3310_v22  ;;  %v3287_v21 = vadd.f32 %v3286_v58, %v3261_v51 }
 0x2e9   : > { %4092 = vmatpush.msrb.mxu1 %v1262_v15 }
 0x2ea   : > { %3774 = vmatpush.msrb.mxu0 %v1204_v11  ;;  %4080 = vmatmul.msk.f32.gmra.mxu1 %vm1426_vm1, %v6171_v13 }
 0x2eb   : > { %3727 = vmatmul.f32.gmra.mxu3 %v6122_v27  ;;  %4093 = vmatpush.msrb.mxu1 %v1233_v19 }
 0x2ec   : > { %3775 = vmatpush.msrb.mxu0 %v1175_v55  ;;  %v3335_v25 = vpop.f32.mrf.mxu2 }
 0x2ed   : > { %3753 = vmatmul.f32.gmra.mxu2 %v4168_v61  ;;  %4082 = vmatmul.msk.f32.vlgmr.msrb.gmra.mxu0 %vm1426_vm1, %v6105_v3  ;;  %v4169_v3 = vld [vmem:[%s6295_s0 + $0x38] sm:$0x7]  ;;  %v3336_v10 = vadd.f32 %v3335_v25, %v4661_v17 }
 0x2ee   : > { %4094 = vmatpush.msrb.mxu1 %v1204_v11  ;;  %v3263_v20 = vpop.f32.mrf.mxu0 }
 0x2ef   : > { %v3312_v29 = vpop.f32.mrf.mxu3  ;;  %v3264_v27 = vadd.f32 %v3263_v20, %v4731_v6 }
 0x2f0   : > { %4095 = vmatpush.msrb.mxu1 %v1175_v55  ;;  %v3313_v24 = vadd.f32 %v3312_v29, %v3287_v21 }
 0x2f1   : > { %v3289_v32 = vpop.f32.mrf.mxu1 }
 0x2f2   : > { %4083 = vmatmul.msk.f32.vlgmr.msrb.gmra.mxu1 %vm1426_vm1, %v6138_v33  ;;  %3838 = vst [vmem:[%s4684_s26 + $0x198] sm:$0xff] %v3313_v24  ;;  %v3290_v8 = vadd.f32 %v3289_v32, %v3264_v27 }
 0x2f3   : > { %3730 = vmatmul.f32.gmra.mxu3 %v6154_v1 }
 0x2f5   : > { %3756 = vmatmul.f32.gmra.mxu2 %v4169_v3 }
 0x2f6   : > { %v3338_v34 = vpop.f32.mrf.mxu2 }
 0x2f7   : > { %v3339_v40 = vadd.f32 %v3338_v34, %v4706_v45 }
 0x2f9   : > { %v3361_v49 = vpop.f32.mrf.mxu0 }
 0x2fa   : > { %4084 = vmatmul.msk.f32.gmra.mxu1 %vm1426_vm1, %v6171_v13  ;;  %v3362_v33 = vadd.f32 %v3361_v49, %v3336_v10  ;;  %v3315_v36 = vpop.f32.mrf.mxu3 }
 0x2fb   : > { %v3316_v37 = vadd.f32 %v3315_v36, %v3290_v8 }
 0x2fc   : > { %v3387_v1 = vpop.f32.mrf.mxu1 }
 0x2fd   : > { %3867 = vst [vmem:[%s4684_s26 + $0x280] sm:$0x7] %v3316_v37  ;;  %v3388_v38 = vadd.f32 %v3387_v1, %v3362_v33 }
 0x2ff   : > { %3809 = vst [vmem:[%s4684_s26 + $0xb8] sm:$0xff] %v3388_v38 }
 0x300   : > { %v3341_v42 = vpop.f32.mrf.mxu2 }
 0x301   : > { %v3342_v13 = vadd.f32 %v3341_v42, %v4731_v6 }
 0x303   : > { %v3364_v9 = vpop.f32.mrf.mxu0 }
 0x304   : > { %v3365_v57 = vadd.f32 %v3364_v9, %v3339_v40 }
 0x305   : > { %v3413_v43 = vpop.f32.mrf.mxu3 }
 0x306   : > { %v3390_v18 = vpop.f32.mrf.mxu1  ;;  %v3414_v53 = vadd.f32 %v3413_v43, %v4661_v17 }
 0x307   : > { %v3391_v46 = vadd.f32 %v3390_v18, %v3365_v57 }
 0x309   : > { %3839 = vst [vmem:[%s4684_s26 + $0x1a0] sm:$0xff] %v3391_v46 }
 0x30a   : > { %v3439_v23 = vpop.f32.mrf.mxu2 }
 0x30b   : > { %v3440_v44 = vadd.f32 %v3439_v23, %v3414_v53 }
 0x30d   : > { %v3367_v7 = vpop.f32.mrf.mxu0 }
 0x30e   : > { %v3368_v47 = vadd.f32 %v3367_v7, %v3342_v13 }
 0x30f   : > { %v3416_v26 = vpop.f32.mrf.mxu3 }
 0x310   : > { %v3393_v41 = vpop.f32.mrf.mxu1  ;;  %v3417_v61 = vadd.f32 %v3416_v26, %v4706_v45 }
 0x311   : > { %v3394_v28 = vadd.f32 %v3393_v41, %v3368_v47 }
 0x313   : > { %3868 = vst [vmem:[%s4684_s26 + $0x288] sm:$0x7] %v3394_v28 }
 0x315   : > { %v3442_v54 = vpop.f32.mrf.mxu2 }
 0x316   : > { %v3443_v63 = vadd.f32 %v3442_v54, %v3417_v61 }
 0x318   : > { %v3465_v56 = vpop.f32.mrf.mxu0 }
 0x319   : > { %v3466_v35 = vadd.f32 %v3465_v56, %v3440_v44  ;;  %v3419_v59 = vpop.f32.mrf.mxu3 }
 0x31a   : > { %v3420_v50 = vadd.f32 %v3419_v59, %v4731_v6 }
 0x31b   : > { %3810 = vst [vmem:[%s4684_s26 + $0xc0] sm:$0xff] %v3466_v35 }
 0x31e   : > { %v3445_v0 = vpop.f32.mrf.mxu2 }
 0x31f   : > { %v3491_v2 = vpop.f32.mrf.mxu1  ;;  %v3446_v39 = vadd.f32 %v3445_v0, %v3420_v50 }
 0x320   : > { %v3492_v4 = vadd.f32 %v3491_v2, %v4661_v17 }
 0x321   : > { %v3468_v30 = vpop.f32.mrf.mxu0 }
 0x322   : > { %v3469_v5 = vadd.f32 %v3468_v30, %v3443_v63 }
 0x323   : > { %v3517_v60 = vpop.f32.mrf.mxu3 }
 0x324   : > { %3840 = vst [vmem:[%s4684_s26 + $0x1a8] sm:$0xff] %v3469_v5  ;;  %v3518_v31 = vadd.f32 %v3517_v60, %v3492_v4 }
 0x327   : > { %v3543_v48 = vpop.f32.mrf.mxu2 }
 0x328   : > { %v3494_v12 = vpop.f32.mrf.mxu1  ;;  %v3544_v62 = vadd.f32 %v3543_v48, %v3518_v31 }
 0x329   : > { %v3495_v52 = vadd.f32 %v3494_v12, %v4706_v45 }
 0x32a   : > { %3811 = vst [vmem:[%s4684_s26 + $0xc8] sm:$0xff] %v3544_v62  ;;  %v3471_v14 = vpop.f32.mrf.mxu0 }
 0x32b   : > { %v3472_v15 = vadd.f32 %v3471_v14, %v3446_v39  ;;  %v3520_v19 = vpop.f32.mrf.mxu3 }
 0x32c   : > { %v3521_v16 = vadd.f32 %v3520_v19, %v3495_v52 }
 0x32d   : > { %3869 = vst [vmem:[%s4684_s26 + $0x290] sm:$0x7] %v3472_v15 }
 0x332   : > { %v3497_v22 = vpop.f32.mrf.mxu1  ;;  %v3546_v11 = vpop.f32.mrf.mxu2 }
 0x333   : > { %v3547_v51 = vadd.f32 %v3546_v11, %v3521_v16  ;;  %v3498_v21 = vadd.f32 %v3497_v22, %v4731_v6 }
 0x335   : > { %3841 = vst [vmem:[%s4684_s26 + $0x1b0] sm:$0xff] %v3547_v51  ;;  %v3569_v58 = vpop.f32.mrf.mxu0 }
 0x336   : > { %v3523_v55 = vpop.f32.mrf.mxu3  ;;  %v3570_v25 = vadd.f32 %v3569_v58, %v4661_v17 }
 0x337   : > { %v3524_v20 = vadd.f32 %v3523_v55, %v3498_v21 }
 0x33c   : > { %v3595_v29 = vpop.f32.mrf.mxu1  ;;  %v3549_v24 = vpop.f32.mrf.mxu2 }
 0x33d   : > { %v3596_v32 = vadd.f32 %v3595_v29, %v3570_v25  ;;  %v3550_v27 = vadd.f32 %v3549_v24, %v3524_v20 }
 0x33e   : > { %v3572_v3 = vpop.f32.mrf.mxu0 }
 0x33f   : > { %3870 = vst [vmem:[%s4684_s26 + $0x298] sm:$0x7] %v3550_v27  ;;  %v3573_v34 = vadd.f32 %v3572_v3, %v4706_v45 }
 0x340   : > { %v3621_v10 = vpop.f32.mrf.mxu3 }
 0x341   : > { %v3622_v8 = vadd.f32 %v3621_v10, %v3596_v32 }
 0x343   : > { %3812 = vst [vmem:[%s4684_s26 + $0xd0] sm:$0xff] %v3622_v8 }
 0x345   : > { %v3598_v49 = vpop.f32.mrf.mxu1 }
 0x346   : > { %v3599_v33 = vadd.f32 %v3598_v49, %v3573_v34 }
 0x347   : > { %v3575_v36 = vpop.f32.mrf.mxu0 }
 0x348   : > { %v3576_v38 = vadd.f32 %v3575_v36, %v4731_v6 }
 0x349   : > { %v3624_v37 = vpop.f32.mrf.mxu3 }
 0x34a   : > { %v3625_v1 = vadd.f32 %v3624_v37, %v3599_v33 }
 0x34c   : > { %3842 = vst [vmem:[%s4684_s26 + $0x1b8] sm:$0xff] %v3625_v1 }
 0x34e   : > { %v3601_v40 = vpop.f32.mrf.mxu1  ;;  %v3647_v42 = vpop.f32.mrf.mxu2 }
 0x34f   : > { %v3602_v9 = vadd.f32 %v3601_v40, %v3576_v38  ;;  %v3648_v43 = vadd.f32 %v3647_v42, %v4661_v17 }
 0x351   : > { %v3673_v57 = vpop.f32.mrf.mxu0 }
 0x352   : > { %v3627_v18 = vpop.f32.mrf.mxu3  ;;  %v3674_v13 = vadd.f32 %v3673_v57, %v3648_v43 }
 0x353   : > { %v3628_v46 = vadd.f32 %v3627_v18, %v3602_v9 }
 0x355   : > { %3871 = vst [vmem:[%s4684_s26 + $0x2a0] sm:$0x7] %v3628_v46 }
 0x357   : > { %v3650_v23 = vpop.f32.mrf.mxu2  ;;  %v3699_v7 = vpop.f32.mrf.mxu1 }
 0x358   : > { %v3700_v47 = vadd.f32 %v3699_v7, %v3674_v13  ;;  %v3651_v41 = vadd.f32 %v3650_v23, %v4706_v45 }
 0x359   : > { %v3676_v26 = vpop.f32.mrf.mxu0 }
 0x35a   : > { %3813 = vst [vmem:[%s4684_s26 + $0xd8] sm:$0xff] %v3700_v47  ;;  %v3677_v53 = vadd.f32 %v3676_v26, %v3651_v41 }
 0x35f   : > { %v3702_v28 = vpop.f32.mrf.mxu1 }
 0x360   : > { %v3653_v44 = vpop.f32.mrf.mxu2  ;;  %v3703_v54 = vadd.f32 %v3702_v28, %v3677_v53 }
 0x361   : > { %v3679_v56 = vpop.f32.mrf.mxu0  ;;  %v3654_v35 = vadd.f32 %v3653_v44, %v4731_v6 }
 0x362   : > { %3843 = vst [vmem:[%s4684_s26 + $0x1c0] sm:$0xff] %v3703_v54 }
 0x363   : > { %v3680_v59 = vadd.f32 %v3679_v56, %v3654_v35 }
 0x366   : > { %v3725_v61 = vpop.f32.mrf.mxu3 }
 0x367   : > { %v3726_v63 = vadd.f32 %v3725_v61, %v4661_v17  ;;  %v3705_v0 = vpop.f32.mrf.mxu1 }
 0x368   : > { %v3706_v2 = vadd.f32 %v3705_v0, %v3680_v59  ;;  %v3751_v30 = vpop.f32.mrf.mxu2 }
 0x369   : > { %v3752_v4 = vadd.f32 %v3751_v30, %v3726_v63 }
 0x36a   : > { %3872 = vst [vmem:[%s4684_s26 + $0x2a8] sm:$0x7] %v3706_v2  ;;  %v3777_v5 = vpop.f32.mrf.mxu0 }
 0x36b   : > { %v3778_v50 = vadd.f32 %v3777_v5, %v3752_v4 }
 0x36d   : > { %3815 = vst.msk [vmem:[%s4684_s26 + $0xe0] sm:$0xff] %vm3814_vm2, %v3778_v50 }
 0x36e   : > { %v3728_v60 = vpop.f32.mrf.mxu3 }
 0x36f   : > { %v3729_v31 = vadd.f32 %v3728_v60, %v4706_v45  ;;  %v3780_v39 = vpop.f32.mrf.mxu1 }
 0x370   : > { %v3754_v48 = vpop.f32.mrf.mxu2 }
 0x371   : > { %v3755_v12 = vadd.f32 %v3754_v48, %v3729_v31 }
 0x373   : > { %v3781_v62 = vadd.f32 %v3780_v39, %v3755_v12 }
 0x375   : > { %3844 = vst.msk [vmem:[%s4684_s26 + $0x1c8] sm:$0xff] %vm3814_vm2, %v3781_v62 }
 0x376   : > { %v3731_v17 = vpop.f32.mrf.mxu3 }
 0x377   : > { %v3732_v14 = vadd.f32 %v3731_v17, %v4731_v6  ;;  %v3783_v19 = vpop.f32.mrf.mxu1 }
 0x378   : > { %v3757_v15 = vpop.f32.mrf.mxu2 }
 0x379   : > { %v3758_v52 = vadd.f32 %v3757_v15, %v3732_v14 }
 0x37b   : > { %v3784_v16 = vadd.f32 %v3783_v19, %v3758_v52 }
 0x37d   : > { %3874 = vst.msk [vmem:[%s4684_s26 + $0x2b0] sm:$0x7] %vm3873_vm3, %v3784_v16 }
 0x37e PF: > { %s13_s14 = sadd.s32 1, %s4192_s14   ;;  %s6299_s12 = smov %s4188_s13 }
 0x37f   : > { %p10_p5 = scmp.ge.s32.totalorder %s13_s14, 4   ;;  %s6300_s13 = smov %s6302_s15 }
 0x381   :  { %12 = sbr.rel (!%p10_p5) target bundleno = 2 (0x2), region = 62 }

</bundles_post_ra>
